<compile_context>
chip_gen: v7x
topology: tpu7x:2x2x1
jax: 0.10.0
libtpu: 0.0.40
codegen_flags: <defaults>
</compile_context>

<pallas_src>
import jax
import jax.numpy as jnp
from jax import lax
from jax.experimental import pallas as pl
from jax.experimental.pallas import tpu as pltpu

F32 = jnp.float32
BF16 = jnp.bfloat16


# -----------------------------------------------------------------------------
# In-kernel helpers
# -----------------------------------------------------------------------------
def _pool_sel_even(w):
    # (w//2, w) one-hot picking rows 2r -- exact selection matmul operand.
    r = lax.broadcasted_iota(jnp.int32, (w // 2, w), 0)
    c = lax.broadcasted_iota(jnp.int32, (w // 2, w), 1)
    return (c == 2 * r).astype(BF16)


def _pool2x2(y, w, sel_e):
    # y: (2*w, C) f32 = two consecutive image rows (each w wide) of conv output.
    # Returns the (w//2, C) f32 2x2-max-pooled row.
    v = jnp.maximum(y[:w, :], y[w:, :])                       # vertical max
    # m[2j] = max(v[2j], v[2j+1]); roll goes to the XLU slot, max to the VPU.
    m = jnp.maximum(v, pltpu.roll(v, shift=w - 1, axis=0))
    return jnp.dot(sel_e, m.astype(BF16), preferred_element_type=F32)


# -----------------------------------------------------------------------------
# Kernel 1: fused conv stack  (conv3x3 + folded BN + ReLU + 2x2 maxpool) x 3
#   grid = (N,) -- one image per grid step, all activations resident in VMEM.
#   inputs : x1col (N, 4096, 32) bf16  im2col'd layer-1 input (K padded 27->32)
#            w1 (32, 32)  bf16, b1 (1, 32)  f32   (BN folded)
#            w2 (288, 64) bf16, b2 (1, 64)  f32
#            w3 (576,128) bf16, b3 (1, 128) f32
#   output : feats (N, 64, 128) bf16    row index = h*8 + w of the 8x8 map
#   scratch: bf16 padded layer-2 / layer-3 activations (halo strips re-zeroed
#            every step; data window fully rewritten per image).
# -----------------------------------------------------------------------------
def _conv_stack_kernel(x1col_ref, w1_ref, b1_ref, w2_ref, b2_ref, w3_ref, b3_ref,
                       o_ref, xp2_ref, xp3_ref):
    # ---- halo-only zeroing (scratch persists across grid steps).  Do NOT
    #      convert to a program_id==0 guard: under v7x per-core grid sharding
    #      the other core's first step would read stale VMEM.
    xp2_ref[:, pl.ds(0, 8), :] = jnp.zeros((34, 8, 32), BF16)    # left pad (col 7 read)
    xp2_ref[:, pl.ds(40, 8), :] = jnp.zeros((34, 8, 32), BF16)   # right pad (col 40 read)
    xp2_ref[0, pl.ds(8, 32), :] = jnp.zeros((32, 32), BF16)      # top halo row
    xp2_ref[33, pl.ds(8, 32), :] = jnp.zeros((32, 32), BF16)     # bottom halo row
    xp3_ref[:, pl.ds(0, 8), :] = jnp.zeros((18, 8, 64), BF16)
    xp3_ref[:, pl.ds(24, 8), :] = jnp.zeros((18, 8, 64), BF16)
    xp3_ref[0, pl.ds(8, 16), :] = jnp.zeros((16, 64), BF16)
    xp3_ref[17, pl.ds(8, 16), :] = jnp.zeros((16, 64), BF16)

    # ------------------ layer 1: 64x64x3 -> 32x32x32 (im2col input) ----------
    w1 = w1_ref[...]                          # (32, 32) bf16
    bias1 = b1_ref[...]                       # (1, 32) f32
    sel1e = _pool_sel_even(64)

    def l1_body(c, carry):
        # Chunk c covers image rows 8c..8c+7 (512 im2col rows, M=512 matmul).
        base = pl.multiple_of(c * 512, 512)
        a = x1col_ref[0, pl.ds(base, 512), :]                    # (512, 32) bf16
        y = jnp.dot(a, w1, preferred_element_type=F32)           # (512, 32) f32
        y = jnp.maximum(y + bias1, 0.0)
        for q in range(4):                                       # 8 rows -> 4 pooled rows
            pooled = _pool2x2(y[q * 128:(q + 1) * 128, :], 64, sel1e)   # (32, 32)
            xp2_ref[1 + 4 * c + q, pl.ds(8, 32), :] = pooled.astype(BF16)
        return carry

    lax.fori_loop(0, 8, l1_body, 0)

    # ------------------ layers 2 & 3: per-dy fused-tap matmuls, M = 4*W ------
    def conv_pool_layer(src_ref, H, W, Cin, Cout, w_ref, b_ref, write_pooled):
        # src rows: 0 = top halo, 1..H = data, H+1 = bottom halo.
        # src cols: 0..7 left pad (only col 7 read), 8..8+W-1 data, 8+W.. right pad.
        K3 = 3 * Cin
        sel_e = _pool_sel_even(W)
        bias = b_ref[...]
        w_dy = [w_ref[dy * K3:(dy + 1) * K3, :] for dy in range(3)]   # (3Cin, Cout)

        def body(h4, carry):
            base = 4 * h4
            # Six full-width row planes, each loaded once (aligned reads).
            planes = [src_ref[base + r, :, :] for r in range(6)]       # (Wp, Cin) bf16
            # Per-row (W, 3*Cin) operand, dx-major / channel-minor -- matches the
            # (dy, dx, c) row order of the flattened HWIO weight.
            rowops = [jnp.concatenate([p[7 + dx:7 + dx + W, :] for dx in range(3)],
                                      axis=1) for p in planes]
            y = jnp.zeros((4 * W, Cout), F32)
            for dy in range(3):
                a = jnp.concatenate(rowops[dy:dy + 4], axis=0)          # (4W, 3Cin)
                y = y + jnp.dot(a, w_dy[dy], preferred_element_type=F32)
            y = jnp.maximum(y + bias, 0.0)
            for q in range(2):                                          # 4 rows -> 2 pooled
                pooled = _pool2x2(y[2 * q * W:(2 * q + 2) * W, :], W, sel_e)
                write_pooled(2 * h4 + q, pooled)
            return carry

        lax.fori_loop(0, H // 4, body, 0)

    def write_l2(row, pooled):                                          # (16, 64) f32
        xp3_ref[1 + row, pl.ds(8, 16), :] = pooled.astype(BF16)

    def write_l3(row, pooled):                                          # (8, 128) f32
        o_ref[0, pl.ds(pl.multiple_of(row * 8, 8), 8), :] = pooled.astype(BF16)

    conv_pool_layer(xp2_ref, 32, 32, 32, 64, w2_ref, b2_ref, write_l2)
    conv_pool_layer(xp3_ref, 16, 16, 64, 128, w3_ref, b3_ref, write_l3)


def conv_stack(x1col, w1, b1, w2, b2, w3, b3):
    N = x1col.shape[0]
    return pl.pallas_call(
        _conv_stack_kernel,
        out_shape=jax.ShapeDtypeStruct((N, 64, 128), jnp.bfloat16),
        grid=(N,),
        in_specs=[
            pl.BlockSpec((1, 4096, 32), lambda n: (n, 0, 0)),
            pl.BlockSpec((32, 32), lambda n: (0, 0)),
            pl.BlockSpec((1, 32), lambda n: (0, 0)),
            pl.BlockSpec((288, 64), lambda n: (0, 0)),
            pl.BlockSpec((1, 64), lambda n: (0, 0)),
            pl.BlockSpec((576, 128), lambda n: (0, 0)),
            pl.BlockSpec((1, 128), lambda n: (0, 0)),
        ],
        out_specs=pl.BlockSpec((1, 64, 128), lambda n: (n, 0, 0)),
        scratch_shapes=[
            pltpu.VMEM((34, 48, 32), jnp.bfloat16),   # padded layer-2 input (bf16)
            pltpu.VMEM((18, 32, 64), jnp.bfloat16),   # padded layer-3 input (bf16)
        ],
        compiler_params=pltpu.CompilerParams(
            dimension_semantics=("parallel",)),
    )(x1col, w1, b1, w2, b2, w3, b3)


# -----------------------------------------------------------------------------
# Kernel 2: MLP head  fc1 -> ReLU -> (Dropout = identity in eval) -> fc2
#   K-tiled over fc1 so the bf16 weight streams once per batch; f32 VMEM
#   accumulator; input feats arrive as bf16 (no in-kernel casts).
# -----------------------------------------------------------------------------
def _mlp_kernel(x_ref, w1_ref, b1_ref, w2_ref, b2_ref, o_ref, acc_ref):
    k = pl.program_id(0)

    @pl.when(k == 0)
    def _():
        acc_ref[...] = jnp.zeros(acc_ref.shape, jnp.float32)

    acc_ref[...] += jnp.dot(x_ref[...], w1_ref[...],
                            preferred_element_type=jnp.float32)

    @pl.when(k == pl.num_programs(0) - 1)
    def _():
        h = jnp.maximum(acc_ref[...] + b1_ref[...], 0.0)
        # Dropout(p=0.6): identity in eval mode.
        o_ref[...] = (jnp.dot(h, w2_ref[...], preferred_element_type=jnp.float32)
                      + b2_ref[...])


def mlp_head(x_flat, w1, b1, w2, b2, *, block_k=2048):
    N, K = x_flat.shape
    hidden = w1.shape[1]
    n_out = w2.shape[1]
    assert K == w1.shape[0], (K, w1.shape)
    assert K % block_k == 0, (K, block_k)        # reduction must tile exactly
    return pl.pallas_call(
        _mlp_kernel,
        out_shape=jax.ShapeDtypeStruct((N, n_out), jnp.float32),
        grid=(K // block_k,),
        in_specs=[
            pl.BlockSpec((N, block_k), lambda k: (0, k)),
            pl.BlockSpec((block_k, hidden), lambda k: (k, 0)),
            pl.BlockSpec((1, hidden), lambda k: (0, 0)),
            pl.BlockSpec((hidden, n_out), lambda k: (0, 0)),
            pl.BlockSpec((1, n_out), lambda k: (0, 0)),
        ],
        out_specs=pl.BlockSpec((N, n_out), lambda k: (0, 0)),
        scratch_shapes=[pltpu.VMEM((N, hidden), jnp.float32)],
        compiler_params=pltpu.CompilerParams(
            dimension_semantics=("arbitrary",)),     # K is a reduction axis
    )(x_flat, w1, b1, w2, b2)


# -----------------------------------------------------------------------------
# Host-side parameter prep & glue
# -----------------------------------------------------------------------------
def fold_bn(w, b, gamma, beta, mean, var, eps=1e-5):
    # BN(conv(x)) == conv_{w*scale}(x) + (b*scale + shift)
    scale = gamma / jnp.sqrt(var + eps)
    return w * scale[None, None, None, :], b * scale + (beta - mean * scale)


def _im2col_3x3(x_nhwc, k_pad):
    # (N, H, W, C) -> (N, H*W, k_pad) patches of the SAME-padded 3x3 conv,
    # zero-padded from 9*C to k_pad columns for lane-dense DMA rows.
    # Column order (dy, dx, c) matches the (9*Cin, Cout) reshape of HWIO weights.
    N, H, W, C = x_nhwc.shape
    xp = jnp.pad(x_nhwc, ((0, 0), (1, 1), (1, 1), (0, 0)))
    taps = [xp[:, dy:dy + H, dx:dx + W, :] for dy in range(3) for dx in range(3)]
    cols = jnp.concatenate(taps, axis=-1).reshape(N, H * W, 9 * C)
    return jnp.pad(cols, ((0, 0), (0, 0), (0, k_pad - 9 * C)))


def init_params(key):
    ks = jax.random.split(key, 10)
    nrm = lambda k, shape, s: s * jax.random.normal(k, shape, jnp.float32)
    p = {
        # conv weights in HWIO == PyTorch weight.permute(2, 3, 1, 0)
        "conv1_w": nrm(ks[0], (3, 3, 3, 32), 0.10), "conv1_b": nrm(ks[1], (32,), 0.10),
        "conv2_w": nrm(ks[2], (3, 3, 32, 64), 0.05), "conv2_b": nrm(ks[3], (64,), 0.05),
        "conv3_w": nrm(ks[4], (3, 3, 64, 128), 0.05), "conv3_b": nrm(ks[5], (128,), 0.05),
        # fc weights as (in, out) == PyTorch weight.T ; fc1 rows are in the
        # PyTorch flatten order (c, h, w).
        "fc1_w": nrm(ks[6], (128 * 8 * 8, 256), 0.01), "fc1_b": nrm(ks[7], (256,), 0.01),
        "fc2_w": nrm(ks[8], (256, 2), 0.05), "fc2_b": nrm(ks[9], (2,), 0.05),
    }
    for i, c in ((1, 32), (2, 64), (3, 128)):  # PyTorch BatchNorm2d defaults
        p[f"bn{i}_gamma"] = jnp.ones((c,), jnp.float32)
        p[f"bn{i}_beta"] = jnp.zeros((c,), jnp.float32)
        p[f"bn{i}_mean"] = jnp.zeros((c,), jnp.float32)
        p[f"bn{i}_var"] = jnp.ones((c,), jnp.float32)
    return p


@jax.jit
def icon_cnn_forward(x_nchw, p):
    # layout: NCHW (PyTorch) -> NHWC internally
    x = jnp.transpose(x_nchw, (0, 2, 3, 1)).astype(jnp.float32)
    N = x.shape[0]
    assert x.shape[1:] == (64, 64, 3), x.shape  # 3 pools -> 8x8, adaptive pool = id

    packed = []
    for li, k_pad in ((1, 32), (2, 0), (3, 0)):
        w, b = fold_bn(p[f"conv{li}_w"], p[f"conv{li}_b"],
                       p[f"bn{li}_gamma"], p[f"bn{li}_beta"],
                       p[f"bn{li}_mean"], p[f"bn{li}_var"])
        cin, cout = w.shape[2], w.shape[3]
        wf = w.reshape(9 * cin, cout)
        if k_pad:
            wf = jnp.pad(wf, ((0, k_pad - 9 * cin), (0, 0)))   # zero rows 27..31
        packed += [wf.astype(jnp.bfloat16), b.reshape(1, cout).astype(jnp.float32)]

    # Layer-1 im2col on the host (pure layout plumbing, no FLOPs), K padded to 32.
    x1col = _im2col_3x3(x, 32).astype(jnp.bfloat16)              # (N, 4096, 32)

    feats = conv_stack(x1col, *packed)                           # (N, 64, 128) bf16

    # AdaptiveAvgPool2d((8, 8)): feature map is already 8x8 -> identity.
    # Kernel emits rows in (h, w) order with channels last; permute the fc1
    # rows from the PyTorch (c, h, w) flatten order to match.
    x_flat = feats.reshape(N, 64 * 128)
    w1p = (p["fc1_w"].reshape(128, 8, 8, 256).transpose(1, 2, 0, 3)
           .reshape(64 * 128, 256).astype(jnp.bfloat16))
    return mlp_head(x_flat, w1p,
                    p["fc1_b"].reshape(1, -1).astype(jnp.float32),
                    p["fc2_w"].astype(jnp.float32),
                    p["fc2_b"].reshape(1, -1).astype(jnp.float32))


if __name__ == "__main__":
    key = jax.random.PRNGKey(0)
    k_param, k_x = jax.random.split(key)
    params = init_params(k_param)
    # 3-channel NCHW input; 64x64 spatial so that three 2x2 max-pools land
    # exactly on the 8x8 adaptive-pool target (adaptive pool == identity).
    x = jax.random.normal(k_x, (2, 3, 64, 64), jnp.float32)
    out = icon_cnn_forward(x, params)
    out = jax.block_until_ready(out)
    assert out.shape == (2, 2) and out.dtype == jnp.float32
    print("KERNEL_OK")
</pallas_src>

<mosaic_0001>
module attributes {stable_mosaic.version = 11 : i64} {
  func.func @_conv_stack_kernel(%arg0: i32, %arg1: memref<1x4096x32xbf16, #tpu.memory_space<vmem>>, %arg2: memref<32x32xbf16, #tpu.memory_space<vmem>>, %arg3: memref<1x32xf32, #tpu.memory_space<vmem>>, %arg4: memref<288x64xbf16, #tpu.memory_space<vmem>>, %arg5: memref<1x64xf32, #tpu.memory_space<vmem>>, %arg6: memref<576x128xbf16, #tpu.memory_space<vmem>>, %arg7: memref<1x128xf32, #tpu.memory_space<vmem>>, %arg8: memref<1x64x128xbf16, #tpu.memory_space<vmem>>, %arg9: memref<34x48x32xbf16, #tpu.memory_space<vmem>>, %arg10: memref<18x32x64xbf16, #tpu.memory_space<vmem>>) attributes {dimension_semantics = [#tpu.dimension_semantics<parallel>], iteration_bounds = array<i64: 2>, scalar_prefetch = 0 : i64, scratch_operands = 2 : i64, tpu.core_type = #tpu.core_type<tc>, window_params = [{transform_indices = @transform_0, window_bounds = array<i64: 1, 4096, 32>}, {pipeline_mode = #tpu.pipeline_mode<synchronous>, transform_indices = @transform_1, window_bounds = array<i64: 32, 32>}, {pipeline_mode = #tpu.pipeline_mode<synchronous>, transform_indices = @transform_2, window_bounds = array<i64: 1, 32>}, {pipeline_mode = #tpu.pipeline_mode<synchronous>, transform_indices = @transform_3, window_bounds = array<i64: 288, 64>}, {pipeline_mode = #tpu.pipeline_mode<synchronous>, transform_indices = @transform_4, window_bounds = array<i64: 1, 64>}, {pipeline_mode = #tpu.pipeline_mode<synchronous>, transform_indices = @transform_5, window_bounds = array<i64: 576, 128>}, {pipeline_mode = #tpu.pipeline_mode<synchronous>, transform_indices = @transform_6, window_bounds = array<i64: 1, 128>}, {transform_indices = @transform_7, window_bounds = array<i64: 1, 64, 128>}]} {
    %cst = arith.constant 0.000000e+00 : bf16
    %0 = vector.broadcast %cst : bf16 to vector<34x8x32xbf16>
    %c0 = arith.constant 0 : index
    %c0_0 = arith.constant 0 : index
    %c0_1 = arith.constant 0 : index
    %1 = vector.load %arg9[%c0, %c0_0, %c0_1] : memref<34x48x32xbf16, #tpu.memory_space<vmem>>, vector<34x8x32xbf16>
    tpu.vector_store %arg9[%c0, %c0_0, %c0_1], %0 {strides = array<i32>} : memref<34x48x32xbf16, #tpu.memory_space<vmem>>, vector<34x8x32xbf16>,
    %cst_2 = arith.constant 0.000000e+00 : bf16
    %2 = vector.broadcast %cst_2 : bf16 to vector<34x8x32xbf16>
    %c0_3 = arith.constant 0 : index
    %c40 = arith.constant 40 : index
    %c0_4 = arith.constant 0 : index
    %3 = vector.load %arg9[%c0_3, %c40, %c0_4] : memref<34x48x32xbf16, #tpu.memory_space<vmem>>, vector<34x8x32xbf16>
    tpu.vector_store %arg9[%c0_3, %c40, %c0_4], %2 {strides = array<i32>} : memref<34x48x32xbf16, #tpu.memory_space<vmem>>, vector<34x8x32xbf16>,
    %cst_5 = arith.constant 0.000000e+00 : bf16
    %4 = vector.broadcast %cst_5 : bf16 to vector<32x32xbf16>
    %c0_6 = arith.constant 0 : index
    %c8 = arith.constant 8 : index
    %c0_7 = arith.constant 0 : index
    %5 = vector.load %arg9[%c0_6, %c8, %c0_7] : memref<34x48x32xbf16, #tpu.memory_space<vmem>>, vector<1x32x32xbf16>
    %6 = vector.shape_cast %5 : vector<1x32x32xbf16> to vector<32x32xbf16>
    %7 = vector.shape_cast %4 : vector<32x32xbf16> to vector<1x32x32xbf16>
    tpu.vector_store %arg9[%c0_6, %c8, %c0_7], %7 {strides = array<i32>} : memref<34x48x32xbf16, #tpu.memory_space<vmem>>, vector<1x32x32xbf16>,
    %cst_8 = arith.constant 0.000000e+00 : bf16
    %8 = vector.broadcast %cst_8 : bf16 to vector<32x32xbf16>
    %c33 = arith.constant 33 : index
    %c8_9 = arith.constant 8 : index
    %c0_10 = arith.constant 0 : index
    %9 = vector.load %arg9[%c33, %c8_9, %c0_10] : memref<34x48x32xbf16, #tpu.memory_space<vmem>>, vector<1x32x32xbf16>
    %10 = vector.shape_cast %9 : vector<1x32x32xbf16> to vector<32x32xbf16>
    %11 = vector.shape_cast %8 : vector<32x32xbf16> to vector<1x32x32xbf16>
    tpu.vector_store %arg9[%c33, %c8_9, %c0_10], %11 {strides = array<i32>} : memref<34x48x32xbf16, #tpu.memory_space<vmem>>, vector<1x32x32xbf16>,
    %cst_11 = arith.constant 0.000000e+00 : bf16
    %12 = vector.broadcast %cst_11 : bf16 to vector<18x8x64xbf16>
    %c0_12 = arith.constant 0 : index
    %c0_13 = arith.constant 0 : index
    %c0_14 = arith.constant 0 : index
    %13 = vector.load %arg10[%c0_12, %c0_13, %c0_14] : memref<18x32x64xbf16, #tpu.memory_space<vmem>>, vector<18x8x64xbf16>
    tpu.vector_store %arg10[%c0_12, %c0_13, %c0_14], %12 {strides = array<i32>} : memref<18x32x64xbf16, #tpu.memory_space<vmem>>, vector<18x8x64xbf16>,
    %cst_15 = arith.constant 0.000000e+00 : bf16
    %14 = vector.broadcast %cst_15 : bf16 to vector<18x8x64xbf16>
    %c0_16 = arith.constant 0 : index
    %c24 = arith.constant 24 : index
    %c0_17 = arith.constant 0 : index
    %15 = vector.load %arg10[%c0_16, %c24, %c0_17] : memref<18x32x64xbf16, #tpu.memory_space<vmem>>, vector<18x8x64xbf16>
    tpu.vector_store %arg10[%c0_16, %c24, %c0_17], %14 {strides = array<i32>} : memref<18x32x64xbf16, #tpu.memory_space<vmem>>, vector<18x8x64xbf16>,
    %cst_18 = arith.constant 0.000000e+00 : bf16
    %16 = vector.broadcast %cst_18 : bf16 to vector<16x64xbf16>
    %c0_19 = arith.constant 0 : index
    %c8_20 = arith.constant 8 : index
    %c0_21 = arith.constant 0 : index
    %17 = vector.load %arg10[%c0_19, %c8_20, %c0_21] : memref<18x32x64xbf16, #tpu.memory_space<vmem>>, vector<1x16x64xbf16>
    %18 = vector.shape_cast %17 : vector<1x16x64xbf16> to vector<16x64xbf16>
    %19 = vector.shape_cast %16 : vector<16x64xbf16> to vector<1x16x64xbf16>
    tpu.vector_store %arg10[%c0_19, %c8_20, %c0_21], %19 {strides = array<i32>} : memref<18x32x64xbf16, #tpu.memory_space<vmem>>, vector<1x16x64xbf16>,
    %cst_22 = arith.constant 0.000000e+00 : bf16
    %20 = vector.broadcast %cst_22 : bf16 to vector<16x64xbf16>
    %c17 = arith.constant 17 : index
    %c8_23 = arith.constant 8 : index
    %c0_24 = arith.constant 0 : index
    %21 = vector.load %arg10[%c17, %c8_23, %c0_24] : memref<18x32x64xbf16, #tpu.memory_space<vmem>>, vector<1x16x64xbf16>
    %22 = vector.shape_cast %21 : vector<1x16x64xbf16> to vector<16x64xbf16>
    %23 = vector.shape_cast %20 : vector<16x64xbf16> to vector<1x16x64xbf16>
    tpu.vector_store %arg10[%c17, %c8_23, %c0_24], %23 {strides = array<i32>} : memref<18x32x64xbf16, #tpu.memory_space<vmem>>, vector<1x16x64xbf16>,
    %c0_25 = arith.constant 0 : index
    %c0_26 = arith.constant 0 : index
    %24 = vector.load %arg2[%c0_25, %c0_26] : memref<32x32xbf16, #tpu.memory_space<vmem>>, vector<32x32xbf16>
    %c0_27 = arith.constant 0 : index
    %c0_28 = arith.constant 0 : index
    %25 = vector.load %arg3[%c0_27, %c0_28] : memref<1x32xf32, #tpu.memory_space<vmem>>, vector<1x32xf32>
    %26 = tpu.iota {dimensions = array<i32: 0>} : vector<32x64xi32>
    %27 = tpu.iota {dimensions = array<i32: 1>} : vector<32x64xi32>
    %c2_i32 = arith.constant 2 : i32
    %28 = vector.broadcast %c2_i32 : i32 to vector<32x64xi32>
    %29 = arith.muli %28, %26 : vector<32x64xi32>
    %30 = arith.cmpi eq, %27, %29 : vector<32x64xi32>
    %31 = arith.extui %30 : vector<32x64xi1> to vector<32x64xi32>
    %32 = arith.sitofp %31 : vector<32x64xi32> to vector<32x64xf32>
    %33 = arith.truncf %32 : vector<32x64xf32> to vector<32x64xbf16>
    %c0_i32 = arith.constant 0 : i32
    %c8_i32 = arith.constant 8 : i32
    %34 = arith.addi %c0_i32, %c8_i32 : i32
    %c1_i32 = arith.constant 1 : i32
    scf.for %arg11 = %c0_i32 to %34 step %c1_i32  : i32 {
      %c512_i32 = arith.constant 512 : i32
      %61 = arith.muli %arg11, %c512_i32 : i32
      %62 = tpu.assume_multiple %61, 512 : i32
      %c0_52 = arith.constant 0 : index
      %63 = arith.index_cast %62 : i32 to index
      %c0_53 = arith.constant 0 : index
      %64 = vector.load %arg1[%c0_52, %63, %c0_53] : memref<1x4096x32xbf16, #tpu.memory_space<vmem>>, vector<1x512x32xbf16>
      %65 = vector.shape_cast %64 : vector<1x512x32xbf16> to vector<512x32xbf16>
      %cst_54 = arith.constant dense<0.000000e+00> : vector<512x32xf32>
      %66 = tpu.matmul %65, %24, %cst_54 {dimension_numbers = #tpu.dot_dimension_numbers<[1], [0], [0], [1], [0, 0, 1, 1], [], []>} : vector<512x32xbf16>, vector<32x32xbf16>, vector<512x32xf32> -> vector<512x32xf32>
      %67 = vector.broadcast %25 : vector<1x32xf32> to vector<512x32xf32>
      %68 = arith.addf %66, %67 : vector<512x32xf32>
      %cst_55 = arith.constant 0.000000e+00 : f32
      %69 = vector.broadcast %cst_55 : f32 to vector<512x32xf32>
      %70 = arith.maximumf %68, %69 : vector<512x32xf32>
      %71 = vector.extract_strided_slice %70 {offsets = [0, 0], sizes = [128, 32], strides = [1, 1]} : vector<512x32xf32> to vector<128x32xf32>
      %72 = vector.extract_strided_slice %71 {offsets = [0, 0], sizes = [64, 32], strides = [1, 1]} : vector<128x32xf32> to vector<64x32xf32>
      %73 = vector.extract_strided_slice %71 {offsets = [64, 0], sizes = [64, 32], strides = [1, 1]} : vector<128x32xf32> to vector<64x32xf32>
      %74 = arith.maximumf %72, %73 : vector<64x32xf32>
      %c63_i32 = arith.constant 63 : i32
      %75 = tpu.dynamic_rotate %74 by %c63_i32 dim 0 : vector<64x32xf32>, i32 -> vector<64x32xf32>
      %76 = arith.maximumf %74, %75 : vector<64x32xf32>
      %77 = arith.truncf %76 : vector<64x32xf32> to vector<64x32xbf16>
      %cst_56 = arith.constant dense<0.000000e+00> : vector<32x32xf32>
      %78 = tpu.matmul %33, %77, %cst_56 {dimension_numbers = #tpu.dot_dimension_numbers<[1], [0], [0], [1], [0, 0, 1, 1], [], []>} : vector<32x64xbf16>, vector<64x32xbf16>, vector<32x32xf32> -> vector<32x32xf32>
      %79 = arith.truncf %78 : vector<32x32xf32> to vector<32x32xbf16>
      %c4_i32_57 = arith.constant 4 : i32
      %80 = arith.muli %c4_i32_57, %arg11 : i32
      %c1_i32_58 = arith.constant 1 : i32
      %81 = arith.addi %c1_i32_58, %80 : i32
      %c0_i32_59 = arith.constant 0 : i32
      %82 = arith.addi %81, %c0_i32_59 : i32
      %83 = arith.index_cast %82 : i32 to index
      %c8_60 = arith.constant 8 : index
      %c0_61 = arith.constant 0 : index
      %84 = vector.load %arg9[%83, %c8_60, %c0_61] : memref<34x48x32xbf16, #tpu.memory_space<vmem>>, vector<1x32x32xbf16>
      %85 = vector.shape_cast %84 : vector<1x32x32xbf16> to vector<32x32xbf16>
      %86 = vector.shape_cast %79 : vector<32x32xbf16> to vector<1x32x32xbf16>
      tpu.vector_store %arg9[%83, %c8_60, %c0_61], %86 {strides = array<i32>} : memref<34x48x32xbf16, #tpu.memory_space<vmem>>, vector<1x32x32xbf16>,
      %87 = vector.extract_strided_slice %70 {offsets = [128, 0], sizes = [128, 32], strides = [1, 1]} : vector<512x32xf32> to vector<128x32xf32>
      %88 = vector.extract_strided_slice %87 {offsets = [0, 0], sizes = [64, 32], strides = [1, 1]} : vector<128x32xf32> to vector<64x32xf32>
      %89 = vector.extract_strided_slice %87 {offsets = [64, 0], sizes = [64, 32], strides = [1, 1]} : vector<128x32xf32> to vector<64x32xf32>
      %90 = arith.maximumf %88, %89 : vector<64x32xf32>
      %c63_i32_62 = arith.constant 63 : i32
      %91 = tpu.dynamic_rotate %90 by %c63_i32_62 dim 0 : vector<64x32xf32>, i32 -> vector<64x32xf32>
      %92 = arith.maximumf %90, %91 : vector<64x32xf32>
      %93 = arith.truncf %92 : vector<64x32xf32> to vector<64x32xbf16>
      %cst_63 = arith.constant dense<0.000000e+00> : vector<32x32xf32>
      %94 = tpu.matmul %33, %93, %cst_63 {dimension_numbers = #tpu.dot_dimension_numbers<[1], [0], [0], [1], [0, 0, 1, 1], [], []>} : vector<32x64xbf16>, vector<64x32xbf16>, vector<32x32xf32> -> vector<32x32xf32>
      %95 = arith.truncf %94 : vector<32x32xf32> to vector<32x32xbf16>
      %c4_i32_64 = arith.constant 4 : i32
      %96 = arith.muli %c4_i32_64, %arg11 : i32
      %c1_i32_65 = arith.constant 1 : i32
      %97 = arith.addi %c1_i32_65, %96 : i32
      %c1_i32_66 = arith.constant 1 : i32
      %98 = arith.addi %97, %c1_i32_66 : i32
      %99 = arith.index_cast %98 : i32 to index
      %c8_67 = arith.constant 8 : index
      %c0_68 = arith.constant 0 : index
      %100 = vector.load %arg9[%99, %c8_67, %c0_68] : memref<34x48x32xbf16, #tpu.memory_space<vmem>>, vector<1x32x32xbf16>
      %101 = vector.shape_cast %100 : vector<1x32x32xbf16> to vector<32x32xbf16>
      %102 = vector.shape_cast %95 : vector<32x32xbf16> to vector<1x32x32xbf16>
      tpu.vector_store %arg9[%99, %c8_67, %c0_68], %102 {strides = array<i32>} : memref<34x48x32xbf16, #tpu.memory_space<vmem>>, vector<1x32x32xbf16>,
      %103 = vector.extract_strided_slice %70 {offsets = [256, 0], sizes = [128, 32], strides = [1, 1]} : vector<512x32xf32> to vector<128x32xf32>
      %104 = vector.extract_strided_slice %103 {offsets = [0, 0], sizes = [64, 32], strides = [1, 1]} : vector<128x32xf32> to vector<64x32xf32>
      %105 = vector.extract_strided_slice %103 {offsets = [64, 0], sizes = [64, 32], strides = [1, 1]} : vector<128x32xf32> to vector<64x32xf32>
      %106 = arith.maximumf %104, %105 : vector<64x32xf32>
      %c63_i32_69 = arith.constant 63 : i32
      %107 = tpu.dynamic_rotate %106 by %c63_i32_69 dim 0 : vector<64x32xf32>, i32 -> vector<64x32xf32>
      %108 = arith.maximumf %106, %107 : vector<64x32xf32>
      %109 = arith.truncf %108 : vector<64x32xf32> to vector<64x32xbf16>
      %cst_70 = arith.constant dense<0.000000e+00> : vector<32x32xf32>
      %110 = tpu.matmul %33, %109, %cst_70 {dimension_numbers = #tpu.dot_dimension_numbers<[1], [0], [0], [1], [0, 0, 1, 1], [], []>} : vector<32x64xbf16>, vector<64x32xbf16>, vector<32x32xf32> -> vector<32x32xf32>
      %111 = arith.truncf %110 : vector<32x32xf32> to vector<32x32xbf16>
      %c4_i32_71 = arith.constant 4 : i32
      %112 = arith.muli %c4_i32_71, %arg11 : i32
      %c1_i32_72 = arith.constant 1 : i32
      %113 = arith.addi %c1_i32_72, %112 : i32
      %c2_i32_73 = arith.constant 2 : i32
      %114 = arith.addi %113, %c2_i32_73 : i32
      %115 = arith.index_cast %114 : i32 to index
      %c8_74 = arith.constant 8 : index
      %c0_75 = arith.constant 0 : index
      %116 = vector.load %arg9[%115, %c8_74, %c0_75] : memref<34x48x32xbf16, #tpu.memory_space<vmem>>, vector<1x32x32xbf16>
      %117 = vector.shape_cast %116 : vector<1x32x32xbf16> to vector<32x32xbf16>
      %118 = vector.shape_cast %111 : vector<32x32xbf16> to vector<1x32x32xbf16>
      tpu.vector_store %arg9[%115, %c8_74, %c0_75], %118 {strides = array<i32>} : memref<34x48x32xbf16, #tpu.memory_space<vmem>>, vector<1x32x32xbf16>,
      %119 = vector.extract_strided_slice %70 {offsets = [384, 0], sizes = [128, 32], strides = [1, 1]} : vector<512x32xf32> to vector<128x32xf32>
      %120 = vector.extract_strided_slice %119 {offsets = [0, 0], sizes = [64, 32], strides = [1, 1]} : vector<128x32xf32> to vector<64x32xf32>
      %121 = vector.extract_strided_slice %119 {offsets = [64, 0], sizes = [64, 32], strides = [1, 1]} : vector<128x32xf32> to vector<64x32xf32>
      %122 = arith.maximumf %120, %121 : vector<64x32xf32>
      %c63_i32_76 = arith.constant 63 : i32
      %123 = tpu.dynamic_rotate %122 by %c63_i32_76 dim 0 : vector<64x32xf32>, i32 -> vector<64x32xf32>
      %124 = arith.maximumf %122, %123 : vector<64x32xf32>
      %125 = arith.truncf %124 : vector<64x32xf32> to vector<64x32xbf16>
      %cst_77 = arith.constant dense<0.000000e+00> : vector<32x32xf32>
      %126 = tpu.matmul %33, %125, %cst_77 {dimension_numbers = #tpu.dot_dimension_numbers<[1], [0], [0], [1], [0, 0, 1, 1], [], []>} : vector<32x64xbf16>, vector<64x32xbf16>, vector<32x32xf32> -> vector<32x32xf32>
      %127 = arith.truncf %126 : vector<32x32xf32> to vector<32x32xbf16>
      %c4_i32_78 = arith.constant 4 : i32
      %128 = arith.muli %c4_i32_78, %arg11 : i32
      %c1_i32_79 = arith.constant 1 : i32
      %129 = arith.addi %c1_i32_79, %128 : i32
      %c3_i32 = arith.constant 3 : i32
      %130 = arith.addi %129, %c3_i32 : i32
      %131 = arith.index_cast %130 : i32 to index
      %c8_80 = arith.constant 8 : index
      %c0_81 = arith.constant 0 : index
      %132 = vector.load %arg9[%131, %c8_80, %c0_81] : memref<34x48x32xbf16, #tpu.memory_space<vmem>>, vector<1x32x32xbf16>
      %133 = vector.shape_cast %132 : vector<1x32x32xbf16> to vector<32x32xbf16>
      %134 = vector.shape_cast %127 : vector<32x32xbf16> to vector<1x32x32xbf16>
      tpu.vector_store %arg9[%131, %c8_80, %c0_81], %134 {strides = array<i32>} : memref<34x48x32xbf16, #tpu.memory_space<vmem>>, vector<1x32x32xbf16>,
    }
    %c8_i32_29 = arith.constant 8 : i32
    %35 = tpu.iota {dimensions = array<i32: 0>} : vector<16x32xi32>
    %36 = tpu.iota {dimensions = array<i32: 1>} : vector<16x32xi32>
    %c2_i32_30 = arith.constant 2 : i32
    %37 = vector.broadcast %c2_i32_30 : i32 to vector<16x32xi32>
    %38 = arith.muli %37, %35 : vector<16x32xi32>
    %39 = arith.cmpi eq, %36, %38 : vector<16x32xi32>
    %40 = arith.extui %39 : vector<16x32xi1> to vector<16x32xi32>
    %41 = arith.sitofp %40 : vector<16x32xi32> to vector<16x32xf32>
    %42 = arith.truncf %41 : vector<16x32xf32> to vector<16x32xbf16>
    %c0_31 = arith.constant 0 : index
    %c0_32 = arith.constant 0 : index
    %43 = vector.load %arg5[%c0_31, %c0_32] : memref<1x64xf32, #tpu.memory_space<vmem>>, vector<1x64xf32>
    %c0_33 = arith.constant 0 : index
    %c0_34 = arith.constant 0 : index
    %44 = vector.load %arg4[%c0_33, %c0_34] : memref<288x64xbf16, #tpu.memory_space<vmem>>, vector<96x64xbf16>
    %c96 = arith.constant 96 : index
    %c0_35 = arith.constant 0 : index
    %45 = vector.load %arg4[%c96, %c0_35] : memref<288x64xbf16, #tpu.memory_space<vmem>>, vector<96x64xbf16>
    %c192 = arith.constant 192 : index
    %c0_36 = arith.constant 0 : index
    %46 = vector.load %arg4[%c192, %c0_36] : memref<288x64xbf16, #tpu.memory_space<vmem>>, vector<96x64xbf16>
    %c0_i32_37 = arith.constant 0 : i32
    %c8_i32_38 = arith.constant 8 : i32
    %47 = arith.addi %c0_i32_37, %c8_i32_38 : i32
    %c1_i32_39 = arith.constant 1 : i32
    scf.for %arg11 = %c0_i32_37 to %47 step %c1_i32_39  : i32 {
      %c4_i32_52 = arith.constant 4 : i32
      %61 = arith.muli %c4_i32_52, %arg11 : i32
      %c0_i32_53 = arith.constant 0 : i32
      %62 = arith.addi %61, %c0_i32_53 : i32
      %63 = arith.index_cast %62 : i32 to index
      %c0_54 = arith.constant 0 : index
      %c0_55 = arith.constant 0 : index
      %64 = vector.load %arg9[%63, %c0_54, %c0_55] : memref<34x48x32xbf16, #tpu.memory_space<vmem>>, vector<1x48x32xbf16>
      %65 = vector.shape_cast %64 : vector<1x48x32xbf16> to vector<48x32xbf16>
      %c1_i32_56 = arith.constant 1 : i32
      %66 = arith.addi %61, %c1_i32_56 : i32
      %67 = arith.index_cast %66 : i32 to index
      %c0_57 = arith.constant 0 : index
      %c0_58 = arith.constant 0 : index
      %68 = vector.load %arg9[%67, %c0_57, %c0_58] : memref<34x48x32xbf16, #tpu.memory_space<vmem>>, vector<1x48x32xbf16>
      %69 = vector.shape_cast %68 : vector<1x48x32xbf16> to vector<48x32xbf16>
      %c2_i32_59 = arith.constant 2 : i32
      %70 = arith.addi %61, %c2_i32_59 : i32
      %71 = arith.index_cast %70 : i32 to index
      %c0_60 = arith.constant 0 : index
      %c0_61 = arith.constant 0 : index
      %72 = vector.load %arg9[%71, %c0_60, %c0_61] : memref<34x48x32xbf16, #tpu.memory_space<vmem>>, vector<1x48x32xbf16>
      %73 = vector.shape_cast %72 : vector<1x48x32xbf16> to vector<48x32xbf16>
      %c3_i32 = arith.constant 3 : i32
      %74 = arith.addi %61, %c3_i32 : i32
      %75 = arith.index_cast %74 : i32 to index
      %c0_62 = arith.constant 0 : index
      %c0_63 = arith.constant 0 : index
      %76 = vector.load %arg9[%75, %c0_62, %c0_63] : memref<34x48x32xbf16, #tpu.memory_space<vmem>>, vector<1x48x32xbf16>
      %77 = vector.shape_cast %76 : vector<1x48x32xbf16> to vector<48x32xbf16>
      %c4_i32_64 = arith.constant 4 : i32
      %78 = arith.addi %61, %c4_i32_64 : i32
      %79 = arith.index_cast %78 : i32 to index
      %c0_65 = arith.constant 0 : index
      %c0_66 = arith.constant 0 : index
      %80 = vector.load %arg9[%79, %c0_65, %c0_66] : memref<34x48x32xbf16, #tpu.memory_space<vmem>>, vector<1x48x32xbf16>
      %81 = vector.shape_cast %80 : vector<1x48x32xbf16> to vector<48x32xbf16>
      %c5_i32 = arith.constant 5 : i32
      %82 = arith.addi %61, %c5_i32 : i32
      %83 = arith.index_cast %82 : i32 to index
      %c0_67 = arith.constant 0 : index
      %c0_68 = arith.constant 0 : index
      %84 = vector.load %arg9[%83, %c0_67, %c0_68] : memref<34x48x32xbf16, #tpu.memory_space<vmem>>, vector<1x48x32xbf16>
      %85 = vector.shape_cast %84 : vector<1x48x32xbf16> to vector<48x32xbf16>
      %86 = vector.extract_strided_slice %65 {offsets = [7, 0], sizes = [32, 32], strides = [1, 1]} : vector<48x32xbf16> to vector<32x32xbf16>
      %87 = vector.extract_strided_slice %65 {offsets = [8, 0], sizes = [32, 32], strides = [1, 1]} : vector<48x32xbf16> to vector<32x32xbf16>
      %88 = vector.extract_strided_slice %65 {offsets = [9, 0], sizes = [32, 32], strides = [1, 1]} : vector<48x32xbf16> to vector<32x32xbf16>
      %89 = tpu.concatenate %86, %87, %88 in 1 : vector<32x32xbf16>, vector<32x32xbf16>, vector<32x32xbf16> -> vector<32x96xbf16>
      %90 = vector.extract_strided_slice %69 {offsets = [7, 0], sizes = [32, 32], strides = [1, 1]} : vector<48x32xbf16> to vector<32x32xbf16>
      %91 = vector.extract_strided_slice %69 {offsets = [8, 0], sizes = [32, 32], strides = [1, 1]} : vector<48x32xbf16> to vector<32x32xbf16>
      %92 = vector.extract_strided_slice %69 {offsets = [9, 0], sizes = [32, 32], strides = [1, 1]} : vector<48x32xbf16> to vector<32x32xbf16>
      %93 = tpu.concatenate %90, %91, %92 in 1 : vector<32x32xbf16>, vector<32x32xbf16>, vector<32x32xbf16> -> vector<32x96xbf16>
      %94 = vector.extract_strided_slice %73 {offsets = [7, 0], sizes = [32, 32], strides = [1, 1]} : vector<48x32xbf16> to vector<32x32xbf16>
      %95 = vector.extract_strided_slice %73 {offsets = [8, 0], sizes = [32, 32], strides = [1, 1]} : vector<48x32xbf16> to vector<32x32xbf16>
      %96 = vector.extract_strided_slice %73 {offsets = [9, 0], sizes = [32, 32], strides = [1, 1]} : vector<48x32xbf16> to vector<32x32xbf16>
      %97 = tpu.concatenate %94, %95, %96 in 1 : vector<32x32xbf16>, vector<32x32xbf16>, vector<32x32xbf16> -> vector<32x96xbf16>
      %98 = vector.extract_strided_slice %77 {offsets = [7, 0], sizes = [32, 32], strides = [1, 1]} : vector<48x32xbf16> to vector<32x32xbf16>
      %99 = vector.extract_strided_slice %77 {offsets = [8, 0], sizes = [32, 32], strides = [1, 1]} : vector<48x32xbf16> to vector<32x32xbf16>
      %100 = vector.extract_strided_slice %77 {offsets = [9, 0], sizes = [32, 32], strides = [1, 1]} : vector<48x32xbf16> to vector<32x32xbf16>
      %101 = tpu.concatenate %98, %99, %100 in 1 : vector<32x32xbf16>, vector<32x32xbf16>, vector<32x32xbf16> -> vector<32x96xbf16>
      %102 = vector.extract_strided_slice %81 {offsets = [7, 0], sizes = [32, 32], strides = [1, 1]} : vector<48x32xbf16> to vector<32x32xbf16>
      %103 = vector.extract_strided_slice %81 {offsets = [8, 0], sizes = [32, 32], strides = [1, 1]} : vector<48x32xbf16> to vector<32x32xbf16>
      %104 = vector.extract_strided_slice %81 {offsets = [9, 0], sizes = [32, 32], strides = [1, 1]} : vector<48x32xbf16> to vector<32x32xbf16>
      %105 = tpu.concatenate %102, %103, %104 in 1 : vector<32x32xbf16>, vector<32x32xbf16>, vector<32x32xbf16> -> vector<32x96xbf16>
      %106 = vector.extract_strided_slice %85 {offsets = [7, 0], sizes = [32, 32], strides = [1, 1]} : vector<48x32xbf16> to vector<32x32xbf16>
      %107 = vector.extract_strided_slice %85 {offsets = [8, 0], sizes = [32, 32], strides = [1, 1]} : vector<48x32xbf16> to vector<32x32xbf16>
      %108 = vector.extract_strided_slice %85 {offsets = [9, 0], sizes = [32, 32], strides = [1, 1]} : vector<48x32xbf16> to vector<32x32xbf16>
      %109 = tpu.concatenate %106, %107, %108 in 1 : vector<32x32xbf16>, vector<32x32xbf16>, vector<32x32xbf16> -> vector<32x96xbf16>
      %cst_69 = arith.constant 0.000000e+00 : f32
      %110 = vector.broadcast %cst_69 : f32 to vector<128x64xf32>
      %111 = tpu.concatenate %89, %93, %97, %101 in 0 : vector<32x96xbf16>, vector<32x96xbf16>, vector<32x96xbf16>, vector<32x96xbf16> -> vector<128x96xbf16>
      %cst_70 = arith.constant dense<0.000000e+00> : vector<128x64xf32>
      %112 = tpu.matmul %111, %44, %cst_70 {dimension_numbers = #tpu.dot_dimension_numbers<[1], [0], [0], [1], [0, 0, 1, 1], [], []>} : vector<128x96xbf16>, vector<96x64xbf16>, vector<128x64xf32> -> vector<128x64xf32>
      %113 = arith.addf %110, %112 : vector<128x64xf32>
      %114 = tpu.concatenate %93, %97, %101, %105 in 0 : vector<32x96xbf16>, vector<32x96xbf16>, vector<32x96xbf16>, vector<32x96xbf16> -> vector<128x96xbf16>
      %cst_71 = arith.constant dense<0.000000e+00> : vector<128x64xf32>
      %115 = tpu.matmul %114, %45, %cst_71 {dimension_numbers = #tpu.dot_dimension_numbers<[1], [0], [0], [1], [0, 0, 1, 1], [], []>} : vector<128x96xbf16>, vector<96x64xbf16>, vector<128x64xf32> -> vector<128x64xf32>
      %116 = arith.addf %113, %115 : vector<128x64xf32>
      %117 = tpu.concatenate %97, %101, %105, %109 in 0 : vector<32x96xbf16>, vector<32x96xbf16>, vector<32x96xbf16>, vector<32x96xbf16> -> vector<128x96xbf16>
      %cst_72 = arith.constant dense<0.000000e+00> : vector<128x64xf32>
      %118 = tpu.matmul %117, %46, %cst_72 {dimension_numbers = #tpu.dot_dimension_numbers<[1], [0], [0], [1], [0, 0, 1, 1], [], []>} : vector<128x96xbf16>, vector<96x64xbf16>, vector<128x64xf32> -> vector<128x64xf32>
      %119 = arith.addf %116, %118 : vector<128x64xf32>
      %120 = vector.broadcast %43 : vector<1x64xf32> to vector<128x64xf32>
      %121 = arith.addf %119, %120 : vector<128x64xf32>
      %cst_73 = arith.constant 0.000000e+00 : f32
      %122 = vector.broadcast %cst_73 : f32 to vector<128x64xf32>
      %123 = arith.maximumf %121, %122 : vector<128x64xf32>
      %124 = vector.extract_strided_slice %123 {offsets = [0, 0], sizes = [64, 64], strides = [1, 1]} : vector<128x64xf32> to vector<64x64xf32>
      %125 = vector.extract_strided_slice %124 {offsets = [0, 0], sizes = [32, 64], strides = [1, 1]} : vector<64x64xf32> to vector<32x64xf32>
      %126 = vector.extract_strided_slice %124 {offsets = [32, 0], sizes = [32, 64], strides = [1, 1]} : vector<64x64xf32> to vector<32x64xf32>
      %127 = arith.maximumf %125, %126 : vector<32x64xf32>
      %c31_i32 = arith.constant 31 : i32
      %128 = tpu.dynamic_rotate %127 by %c31_i32 dim 0 : vector<32x64xf32>, i32 -> vector<32x64xf32>
      %129 = arith.maximumf %127, %128 : vector<32x64xf32>
      %130 = arith.truncf %129 : vector<32x64xf32> to vector<32x64xbf16>
      %cst_74 = arith.constant dense<0.000000e+00> : vector<16x64xf32>
      %131 = tpu.matmul %42, %130, %cst_74 {dimension_numbers = #tpu.dot_dimension_numbers<[1], [0], [0], [1], [0, 0, 1, 1], [], []>} : vector<16x32xbf16>, vector<32x64xbf16>, vector<16x64xf32> -> vector<16x64xf32>
      %c2_i32_75 = arith.constant 2 : i32
      %132 = arith.muli %c2_i32_75, %arg11 : i32
      %c0_i32_76 = arith.constant 0 : i32
      %133 = arith.addi %132, %c0_i32_76 : i32
      %134 = arith.truncf %131 : vector<16x64xf32> to vector<16x64xbf16>
      %c1_i32_77 = arith.constant 1 : i32
      %135 = arith.addi %c1_i32_77, %133 : i32
      %136 = arith.index_cast %135 : i32 to index
      %c8_78 = arith.constant 8 : index
      %c0_79 = arith.constant 0 : index
      %137 = vector.load %arg10[%136, %c8_78, %c0_79] : memref<18x32x64xbf16, #tpu.memory_space<vmem>>, vector<1x16x64xbf16>
      %138 = vector.shape_cast %137 : vector<1x16x64xbf16> to vector<16x64xbf16>
      %139 = vector.shape_cast %134 : vector<16x64xbf16> to vector<1x16x64xbf16>
      tpu.vector_store %arg10[%136, %c8_78, %c0_79], %139 {strides = array<i32>} : memref<18x32x64xbf16, #tpu.memory_space<vmem>>, vector<1x16x64xbf16>,
      %140 = vector.extract_strided_slice %123 {offsets = [64, 0], sizes = [64, 64], strides = [1, 1]} : vector<128x64xf32> to vector<64x64xf32>
      %141 = vector.extract_strided_slice %140 {offsets = [0, 0], sizes = [32, 64], strides = [1, 1]} : vector<64x64xf32> to vector<32x64xf32>
      %142 = vector.extract_strided_slice %140 {offsets = [32, 0], sizes = [32, 64], strides = [1, 1]} : vector<64x64xf32> to vector<32x64xf32>
      %143 = arith.maximumf %141, %142 : vector<32x64xf32>
      %c31_i32_80 = arith.constant 31 : i32
      %144 = tpu.dynamic_rotate %143 by %c31_i32_80 dim 0 : vector<32x64xf32>, i32 -> vector<32x64xf32>
      %145 = arith.maximumf %143, %144 : vector<32x64xf32>
      %146 = arith.truncf %145 : vector<32x64xf32> to vector<32x64xbf16>
      %cst_81 = arith.constant dense<0.000000e+00> : vector<16x64xf32>
      %147 = tpu.matmul %42, %146, %cst_81 {dimension_numbers = #tpu.dot_dimension_numbers<[1], [0], [0], [1], [0, 0, 1, 1], [], []>} : vector<16x32xbf16>, vector<32x64xbf16>, vector<16x64xf32> -> vector<16x64xf32>
      %c2_i32_82 = arith.constant 2 : i32
      %148 = arith.muli %c2_i32_82, %arg11 : i32
      %c1_i32_83 = arith.constant 1 : i32
      %149 = arith.addi %148, %c1_i32_83 : i32
      %150 = arith.truncf %147 : vector<16x64xf32> to vector<16x64xbf16>
      %c1_i32_84 = arith.constant 1 : i32
      %151 = arith.addi %c1_i32_84, %149 : i32
      %152 = arith.index_cast %151 : i32 to index
      %c8_85 = arith.constant 8 : index
      %c0_86 = arith.constant 0 : index
      %153 = vector.load %arg10[%152, %c8_85, %c0_86] : memref<18x32x64xbf16, #tpu.memory_space<vmem>>, vector<1x16x64xbf16>
      %154 = vector.shape_cast %153 : vector<1x16x64xbf16> to vector<16x64xbf16>
      %155 = vector.shape_cast %150 : vector<16x64xbf16> to vector<1x16x64xbf16>
      tpu.vector_store %arg10[%152, %c8_85, %c0_86], %155 {strides = array<i32>} : memref<18x32x64xbf16, #tpu.memory_space<vmem>>, vector<1x16x64xbf16>,
    }
    %c8_i32_40 = arith.constant 8 : i32
    %48 = tpu.iota {dimensions = array<i32: 0>} : vector<8x16xi32>
    %49 = tpu.iota {dimensions = array<i32: 1>} : vector<8x16xi32>
    %c2_i32_41 = arith.constant 2 : i32
    %50 = vector.broadcast %c2_i32_41 : i32 to vector<8x16xi32>
    %51 = arith.muli %50, %48 : vector<8x16xi32>
    %52 = arith.cmpi eq, %49, %51 : vector<8x16xi32>
    %53 = arith.extui %52 : vector<8x16xi1> to vector<8x16xi32>
    %54 = arith.sitofp %53 : vector<8x16xi32> to vector<8x16xf32>
    %55 = arith.truncf %54 : vector<8x16xf32> to vector<8x16xbf16>
    %c0_42 = arith.constant 0 : index
    %c0_43 = arith.constant 0 : index
    %56 = vector.load %arg7[%c0_42, %c0_43] : memref<1x128xf32, #tpu.memory_space<vmem>>, vector<1x128xf32>
    %c0_44 = arith.constant 0 : index
    %c0_45 = arith.constant 0 : index
    %57 = vector.load %arg6[%c0_44, %c0_45] : memref<576x128xbf16, #tpu.memory_space<vmem>>, vector<192x128xbf16>
    %c192_46 = arith.constant 192 : index
    %c0_47 = arith.constant 0 : index
    %58 = vector.load %arg6[%c192_46, %c0_47] : memref<576x128xbf16, #tpu.memory_space<vmem>>, vector<192x128xbf16>
    %c384 = arith.constant 384 : index
    %c0_48 = arith.constant 0 : index
    %59 = vector.load %arg6[%c384, %c0_48] : memref<576x128xbf16, #tpu.memory_space<vmem>>, vector<192x128xbf16>
    %c0_i32_49 = arith.constant 0 : i32
    %c4_i32 = arith.constant 4 : i32
    %60 = arith.addi %c0_i32_49, %c4_i32 : i32
    %c1_i32_50 = arith.constant 1 : i32
    scf.for %arg11 = %c0_i32_49 to %60 step %c1_i32_50  : i32 {
      %c4_i32_52 = arith.constant 4 : i32
      %61 = arith.muli %c4_i32_52, %arg11 : i32
      %c0_i32_53 = arith.constant 0 : i32
      %62 = arith.addi %61, %c0_i32_53 : i32
      %63 = arith.index_cast %62 : i32 to index
      %c0_54 = arith.constant 0 : index
      %c0_55 = arith.constant 0 : index
      %64 = vector.load %arg10[%63, %c0_54, %c0_55] : memref<18x32x64xbf16, #tpu.memory_space<vmem>>, vector<1x32x64xbf16>
      %65 = vector.shape_cast %64 : vector<1x32x64xbf16> to vector<32x64xbf16>
      %c1_i32_56 = arith.constant 1 : i32
      %66 = arith.addi %61, %c1_i32_56 : i32
      %67 = arith.index_cast %66 : i32 to index
      %c0_57 = arith.constant 0 : index
      %c0_58 = arith.constant 0 : index
      %68 = vector.load %arg10[%67, %c0_57, %c0_58] : memref<18x32x64xbf16, #tpu.memory_space<vmem>>, vector<1x32x64xbf16>
      %69 = vector.shape_cast %68 : vector<1x32x64xbf16> to vector<32x64xbf16>
      %c2_i32_59 = arith.constant 2 : i32
      %70 = arith.addi %61, %c2_i32_59 : i32
      %71 = arith.index_cast %70 : i32 to index
      %c0_60 = arith.constant 0 : index
      %c0_61 = arith.constant 0 : index
      %72 = vector.load %arg10[%71, %c0_60, %c0_61] : memref<18x32x64xbf16, #tpu.memory_space<vmem>>, vector<1x32x64xbf16>
      %73 = vector.shape_cast %72 : vector<1x32x64xbf16> to vector<32x64xbf16>
      %c3_i32 = arith.constant 3 : i32
      %74 = arith.addi %61, %c3_i32 : i32
      %75 = arith.index_cast %74 : i32 to index
      %c0_62 = arith.constant 0 : index
      %c0_63 = arith.constant 0 : index
      %76 = vector.load %arg10[%75, %c0_62, %c0_63] : memref<18x32x64xbf16, #tpu.memory_space<vmem>>, vector<1x32x64xbf16>
      %77 = vector.shape_cast %76 : vector<1x32x64xbf16> to vector<32x64xbf16>
      %c4_i32_64 = arith.constant 4 : i32
      %78 = arith.addi %61, %c4_i32_64 : i32
      %79 = arith.index_cast %78 : i32 to index
      %c0_65 = arith.constant 0 : index
      %c0_66 = arith.constant 0 : index
      %80 = vector.load %arg10[%79, %c0_65, %c0_66] : memref<18x32x64xbf16, #tpu.memory_space<vmem>>, vector<1x32x64xbf16>
      %81 = vector.shape_cast %80 : vector<1x32x64xbf16> to vector<32x64xbf16>
      %c5_i32 = arith.constant 5 : i32
      %82 = arith.addi %61, %c5_i32 : i32
      %83 = arith.index_cast %82 : i32 to index
      %c0_67 = arith.constant 0 : index
      %c0_68 = arith.constant 0 : index
      %84 = vector.load %arg10[%83, %c0_67, %c0_68] : memref<18x32x64xbf16, #tpu.memory_space<vmem>>, vector<1x32x64xbf16>
      %85 = vector.shape_cast %84 : vector<1x32x64xbf16> to vector<32x64xbf16>
      %86 = vector.extract_strided_slice %65 {offsets = [7, 0], sizes = [16, 64], strides = [1, 1]} : vector<32x64xbf16> to vector<16x64xbf16>
      %87 = vector.extract_strided_slice %65 {offsets = [8, 0], sizes = [16, 64], strides = [1, 1]} : vector<32x64xbf16> to vector<16x64xbf16>
      %88 = vector.extract_strided_slice %65 {offsets = [9, 0], sizes = [16, 64], strides = [1, 1]} : vector<32x64xbf16> to vector<16x64xbf16>
      %89 = tpu.concatenate %86, %87, %88 in 1 : vector<16x64xbf16>, vector<16x64xbf16>, vector<16x64xbf16> -> vector<16x192xbf16>
      %90 = vector.extract_strided_slice %69 {offsets = [7, 0], sizes = [16, 64], strides = [1, 1]} : vector<32x64xbf16> to vector<16x64xbf16>
      %91 = vector.extract_strided_slice %69 {offsets = [8, 0], sizes = [16, 64], strides = [1, 1]} : vector<32x64xbf16> to vector<16x64xbf16>
      %92 = vector.extract_strided_slice %69 {offsets = [9, 0], sizes = [16, 64], strides = [1, 1]} : vector<32x64xbf16> to vector<16x64xbf16>
      %93 = tpu.concatenate %90, %91, %92 in 1 : vector<16x64xbf16>, vector<16x64xbf16>, vector<16x64xbf16> -> vector<16x192xbf16>
      %94 = vector.extract_strided_slice %73 {offsets = [7, 0], sizes = [16, 64], strides = [1, 1]} : vector<32x64xbf16> to vector<16x64xbf16>
      %95 = vector.extract_strided_slice %73 {offsets = [8, 0], sizes = [16, 64], strides = [1, 1]} : vector<32x64xbf16> to vector<16x64xbf16>
      %96 = vector.extract_strided_slice %73 {offsets = [9, 0], sizes = [16, 64], strides = [1, 1]} : vector<32x64xbf16> to vector<16x64xbf16>
      %97 = tpu.concatenate %94, %95, %96 in 1 : vector<16x64xbf16>, vector<16x64xbf16>, vector<16x64xbf16> -> vector<16x192xbf16>
      %98 = vector.extract_strided_slice %77 {offsets = [7, 0], sizes = [16, 64], strides = [1, 1]} : vector<32x64xbf16> to vector<16x64xbf16>
      %99 = vector.extract_strided_slice %77 {offsets = [8, 0], sizes = [16, 64], strides = [1, 1]} : vector<32x64xbf16> to vector<16x64xbf16>
      %100 = vector.extract_strided_slice %77 {offsets = [9, 0], sizes = [16, 64], strides = [1, 1]} : vector<32x64xbf16> to vector<16x64xbf16>
      %101 = tpu.concatenate %98, %99, %100 in 1 : vector<16x64xbf16>, vector<16x64xbf16>, vector<16x64xbf16> -> vector<16x192xbf16>
      %102 = vector.extract_strided_slice %81 {offsets = [7, 0], sizes = [16, 64], strides = [1, 1]} : vector<32x64xbf16> to vector<16x64xbf16>
      %103 = vector.extract_strided_slice %81 {offsets = [8, 0], sizes = [16, 64], strides = [1, 1]} : vector<32x64xbf16> to vector<16x64xbf16>
      %104 = vector.extract_strided_slice %81 {offsets = [9, 0], sizes = [16, 64], strides = [1, 1]} : vector<32x64xbf16> to vector<16x64xbf16>
      %105 = tpu.concatenate %102, %103, %104 in 1 : vector<16x64xbf16>, vector<16x64xbf16>, vector<16x64xbf16> -> vector<16x192xbf16>
      %106 = vector.extract_strided_slice %85 {offsets = [7, 0], sizes = [16, 64], strides = [1, 1]} : vector<32x64xbf16> to vector<16x64xbf16>
      %107 = vector.extract_strided_slice %85 {offsets = [8, 0], sizes = [16, 64], strides = [1, 1]} : vector<32x64xbf16> to vector<16x64xbf16>
      %108 = vector.extract_strided_slice %85 {offsets = [9, 0], sizes = [16, 64], strides = [1, 1]} : vector<32x64xbf16> to vector<16x64xbf16>
      %109 = tpu.concatenate %106, %107, %108 in 1 : vector<16x64xbf16>, vector<16x64xbf16>, vector<16x64xbf16> -> vector<16x192xbf16>
      %cst_69 = arith.constant 0.000000e+00 : f32
      %110 = vector.broadcast %cst_69 : f32 to vector<64x128xf32>
      %111 = tpu.concatenate %89, %93, %97, %101 in 0 : vector<16x192xbf16>, vector<16x192xbf16>, vector<16x192xbf16>, vector<16x192xbf16> -> vector<64x192xbf16>
      %cst_70 = arith.constant dense<0.000000e+00> : vector<64x128xf32>
      %112 = tpu.matmul %111, %57, %cst_70 {dimension_numbers = #tpu.dot_dimension_numbers<[1], [0], [0], [1], [0, 0, 1, 1], [], []>} : vector<64x192xbf16>, vector<192x128xbf16>, vector<64x128xf32> -> vector<64x128xf32>
      %113 = arith.addf %110, %112 : vector<64x128xf32>
      %114 = tpu.concatenate %93, %97, %101, %105 in 0 : vector<16x192xbf16>, vector<16x192xbf16>, vector<16x192xbf16>, vector<16x192xbf16> -> vector<64x192xbf16>
      %cst_71 = arith.constant dense<0.000000e+00> : vector<64x128xf32>
      %115 = tpu.matmul %114, %58, %cst_71 {dimension_numbers = #tpu.dot_dimension_numbers<[1], [0], [0], [1], [0, 0, 1, 1], [], []>} : vector<64x192xbf16>, vector<192x128xbf16>, vector<64x128xf32> -> vector<64x128xf32>
      %116 = arith.addf %113, %115 : vector<64x128xf32>
      %117 = tpu.concatenate %97, %101, %105, %109 in 0 : vector<16x192xbf16>, vector<16x192xbf16>, vector<16x192xbf16>, vector<16x192xbf16> -> vector<64x192xbf16>
      %cst_72 = arith.constant dense<0.000000e+00> : vector<64x128xf32>
      %118 = tpu.matmul %117, %59, %cst_72 {dimension_numbers = #tpu.dot_dimension_numbers<[1], [0], [0], [1], [0, 0, 1, 1], [], []>} : vector<64x192xbf16>, vector<192x128xbf16>, vector<64x128xf32> -> vector<64x128xf32>
      %119 = arith.addf %116, %118 : vector<64x128xf32>
      %120 = vector.broadcast %56 : vector<1x128xf32> to vector<64x128xf32>
      %121 = arith.addf %119, %120 : vector<64x128xf32>
      %cst_73 = arith.constant 0.000000e+00 : f32
      %122 = vector.broadcast %cst_73 : f32 to vector<64x128xf32>
      %123 = arith.maximumf %121, %122 : vector<64x128xf32>
      %124 = vector.extract_strided_slice %123 {offsets = [0, 0], sizes = [32, 128], strides = [1, 1]} : vector<64x128xf32> to vector<32x128xf32>
      %125 = vector.extract_strided_slice %124 {offsets = [0, 0], sizes = [16, 128], strides = [1, 1]} : vector<32x128xf32> to vector<16x128xf32>
      %126 = vector.extract_strided_slice %124 {offsets = [16, 0], sizes = [16, 128], strides = [1, 1]} : vector<32x128xf32> to vector<16x128xf32>
      %127 = arith.maximumf %125, %126 : vector<16x128xf32>
      %c15_i32 = arith.constant 15 : i32
      %128 = tpu.dynamic_rotate %127 by %c15_i32 dim 0 : vector<16x128xf32>, i32 -> vector<16x128xf32>
      %129 = arith.maximumf %127, %128 : vector<16x128xf32>
      %130 = arith.truncf %129 : vector<16x128xf32> to vector<16x128xbf16>
      %cst_74 = arith.constant dense<0.000000e+00> : vector<8x128xf32>
      %131 = tpu.matmul %55, %130, %cst_74 {dimension_numbers = #tpu.dot_dimension_numbers<[1], [0], [0], [1], [0, 0, 1, 1], [], []>} : vector<8x16xbf16>, vector<16x128xbf16>, vector<8x128xf32> -> vector<8x128xf32>
      %c2_i32_75 = arith.constant 2 : i32
      %132 = arith.muli %c2_i32_75, %arg11 : i32
      %c0_i32_76 = arith.constant 0 : i32
      %133 = arith.addi %132, %c0_i32_76 : i32
      %134 = arith.truncf %131 : vector<8x128xf32> to vector<8x128xbf16>
      %c8_i32_77 = arith.constant 8 : i32
      %135 = arith.muli %133, %c8_i32_77 : i32
      %136 = tpu.assume_multiple %135, 8 : i32
      %c0_78 = arith.constant 0 : index
      %137 = arith.index_cast %136 : i32 to index
      %c0_79 = arith.constant 0 : index
      %138 = vector.load %arg8[%c0_78, %137, %c0_79] : memref<1x64x128xbf16, #tpu.memory_space<vmem>>, vector<1x8x128xbf16>
      %139 = vector.shape_cast %138 : vector<1x8x128xbf16> to vector<8x128xbf16>
      %140 = vector.shape_cast %134 : vector<8x128xbf16> to vector<1x8x128xbf16>
      tpu.vector_store %arg8[%c0_78, %137, %c0_79], %140 {strides = array<i32>} : memref<1x64x128xbf16, #tpu.memory_space<vmem>>, vector<1x8x128xbf16>,
      %141 = vector.extract_strided_slice %123 {offsets = [32, 0], sizes = [32, 128], strides = [1, 1]} : vector<64x128xf32> to vector<32x128xf32>
      %142 = vector.extract_strided_slice %141 {offsets = [0, 0], sizes = [16, 128], strides = [1, 1]} : vector<32x128xf32> to vector<16x128xf32>
      %143 = vector.extract_strided_slice %141 {offsets = [16, 0], sizes = [16, 128], strides = [1, 1]} : vector<32x128xf32> to vector<16x128xf32>
      %144 = arith.maximumf %142, %143 : vector<16x128xf32>
      %c15_i32_80 = arith.constant 15 : i32
      %145 = tpu.dynamic_rotate %144 by %c15_i32_80 dim 0 : vector<16x128xf32>, i32 -> vector<16x128xf32>
      %146 = arith.maximumf %144, %145 : vector<16x128xf32>
      %147 = arith.truncf %146 : vector<16x128xf32> to vector<16x128xbf16>
      %cst_81 = arith.constant dense<0.000000e+00> : vector<8x128xf32>
      %148 = tpu.matmul %55, %147, %cst_81 {dimension_numbers = #tpu.dot_dimension_numbers<[1], [0], [0], [1], [0, 0, 1, 1], [], []>} : vector<8x16xbf16>, vector<16x128xbf16>, vector<8x128xf32> -> vector<8x128xf32>
      %c2_i32_82 = arith.constant 2 : i32
      %149 = arith.muli %c2_i32_82, %arg11 : i32
      %c1_i32_83 = arith.constant 1 : i32
      %150 = arith.addi %149, %c1_i32_83 : i32
      %151 = arith.truncf %148 : vector<8x128xf32> to vector<8x128xbf16>
      %c8_i32_84 = arith.constant 8 : i32
      %152 = arith.muli %150, %c8_i32_84 : i32
      %153 = tpu.assume_multiple %152, 8 : i32
      %c0_85 = arith.constant 0 : index
      %154 = arith.index_cast %153 : i32 to index
      %c0_86 = arith.constant 0 : index
      %155 = vector.load %arg8[%c0_85, %154, %c0_86] : memref<1x64x128xbf16, #tpu.memory_space<vmem>>, vector<1x8x128xbf16>
      %156 = vector.shape_cast %155 : vector<1x8x128xbf16> to vector<8x128xbf16>
      %157 = vector.shape_cast %151 : vector<8x128xbf16> to vector<1x8x128xbf16>
      tpu.vector_store %arg8[%c0_85, %154, %c0_86], %157 {strides = array<i32>} : memref<1x64x128xbf16, #tpu.memory_space<vmem>>, vector<1x8x128xbf16>,
    }
    %c4_i32_51 = arith.constant 4 : i32
    return
  }
  func.func @transform_0(%arg0: i32) -> (i32, i32, i32) {
    %c0_i32 = arith.constant 0 : i32
    %c0_i32_0 = arith.constant 0 : i32
    %c0_i32_1 = arith.constant 0 : i32
    return %arg0, %c0_i32, %c0_i32_0 : i32, i32, i32
  }
  func.func @transform_1(%arg0: i32) -> (i32, i32) {
    %c0_i32 = arith.constant 0 : i32
    %c0_i32_0 = arith.constant 0 : i32
    %c0_i32_1 = arith.constant 0 : i32
    return %c0_i32, %c0_i32_0 : i32, i32
  }
  func.func @transform_2(%arg0: i32) -> (i32, i32) {
    %c0_i32 = arith.constant 0 : i32
    %c0_i32_0 = arith.constant 0 : i32
    %c0_i32_1 = arith.constant 0 : i32
    return %c0_i32, %c0_i32_0 : i32, i32
  }
  func.func @transform_3(%arg0: i32) -> (i32, i32) {
    %c0_i32 = arith.constant 0 : i32
    %c0_i32_0 = arith.constant 0 : i32
    %c0_i32_1 = arith.constant 0 : i32
    return %c0_i32, %c0_i32_0 : i32, i32
  }
  func.func @transform_4(%arg0: i32) -> (i32, i32) {
    %c0_i32 = arith.constant 0 : i32
    %c0_i32_0 = arith.constant 0 : i32
    %c0_i32_1 = arith.constant 0 : i32
    return %c0_i32, %c0_i32_0 : i32, i32
  }
  func.func @transform_5(%arg0: i32) -> (i32, i32) {
    %c0_i32 = arith.constant 0 : i32
    %c0_i32_0 = arith.constant 0 : i32
    %c0_i32_1 = arith.constant 0 : i32
    return %c0_i32, %c0_i32_0 : i32, i32
  }
  func.func @transform_6(%arg0: i32) -> (i32, i32) {
    %c0_i32 = arith.constant 0 : i32
    %c0_i32_0 = arith.constant 0 : i32
    %c0_i32_1 = arith.constant 0 : i32
    return %c0_i32, %c0_i32_0 : i32, i32
  }
  func.func @transform_7(%arg0: i32) -> (i32, i32, i32) {
    %c0_i32 = arith.constant 0 : i32
    %c0_i32_0 = arith.constant 0 : i32
    %c0_i32_1 = arith.constant 0 : i32
    return %arg0, %c0_i32, %c0_i32_0 : i32, i32, i32
  }
}

module attributes {stable_mosaic.version = 11 : i64} {
  func.func @_mlp_kernel(%arg0: i32, %arg1: memref<2x2048xbf16, #tpu.memory_space<vmem>>, %arg2: memref<2048x256xbf16, #tpu.memory_space<vmem>>, %arg3: memref<1x256xf32, #tpu.memory_space<vmem>>, %arg4: memref<256x2xf32, #tpu.memory_space<vmem>>, %arg5: memref<1x2xf32, #tpu.memory_space<vmem>>, %arg6: memref<2x2xf32, #tpu.memory_space<vmem>>, %arg7: memref<2x256xf32, #tpu.memory_space<vmem>>) attributes {dimension_semantics = [#tpu.dimension_semantics<arbitrary>], iteration_bounds = array<i64: 4>, scalar_prefetch = 0 : i64, scratch_operands = 1 : i64, tpu.core_type = #tpu.core_type<tc>, window_params = [{transform_indices = @transform_0, window_bounds = array<i64: 2, 2048>}, {transform_indices = @transform_1, window_bounds = array<i64: 2048, 256>}, {pipeline_mode = #tpu.pipeline_mode<synchronous>, transform_indices = @transform_2, window_bounds = array<i64: 1, 256>}, {pipeline_mode = #tpu.pipeline_mode<synchronous>, transform_indices = @transform_3, window_bounds = array<i64: 256, 2>}, {pipeline_mode = #tpu.pipeline_mode<synchronous>, transform_indices = @transform_4, window_bounds = array<i64: 1, 2>}, {pipeline_mode = #tpu.pipeline_mode<synchronous>, transform_indices = @transform_5, window_bounds = array<i64: 2, 2>}]} {
    %c0_i32 = arith.constant 0 : i32
    %0 = arith.cmpi eq, %arg0, %c0_i32 : i32
    %1 = arith.extui %0 : i1 to i32
    %c0_i32_0 = arith.constant 0 : i32
    %2 = arith.cmpi ne, %1, %c0_i32_0 : i32
    scf.if %2 {
      %cst_9 = arith.constant 0.000000e+00 : f32
      %12 = vector.broadcast %cst_9 : f32 to vector<2x256xf32>
      %c0_10 = arith.constant 0 : index
      %c0_11 = arith.constant 0 : index
      %13 = vector.load %arg7[%c0_10, %c0_11] : memref<2x256xf32, #tpu.memory_space<vmem>>, vector<2x256xf32>
      tpu.vector_store %arg7[%c0_10, %c0_11], %12 {strides = array<i32>} : memref<2x256xf32, #tpu.memory_space<vmem>>, vector<2x256xf32>,
    } else {
    }
    %c0 = arith.constant 0 : index
    %c0_1 = arith.constant 0 : index
    %3 = vector.load %arg7[%c0, %c0_1] : memref<2x256xf32, #tpu.memory_space<vmem>>, vector<2x256xf32>
    %c0_2 = arith.constant 0 : index
    %c0_3 = arith.constant 0 : index
    %4 = vector.load %arg1[%c0_2, %c0_3] : memref<2x2048xbf16, #tpu.memory_space<vmem>>, vector<2x2048xbf16>
    %c0_4 = arith.constant 0 : index
    %c0_5 = arith.constant 0 : index
    %5 = vector.load %arg2[%c0_4, %c0_5] : memref<2048x256xbf16, #tpu.memory_space<vmem>>, vector<2048x256xbf16>
    %cst = arith.constant dense<0.000000e+00> : vector<2x256xf32>
    %6 = tpu.matmul %4, %5, %cst {dimension_numbers = #tpu.dot_dimension_numbers<[1], [0], [0], [1], [0, 0, 1, 1], [], []>} : vector<2x2048xbf16>, vector<2048x256xbf16>, vector<2x256xf32> -> vector<2x256xf32>
    %7 = arith.addf %3, %6 : vector<2x256xf32>
    %c0_6 = arith.constant 0 : index
    %c0_7 = arith.constant 0 : index
    %8 = vector.load %arg7[%c0_6, %c0_7] : memref<2x256xf32, #tpu.memory_space<vmem>>, vector<2x256xf32>
    tpu.vector_store %arg7[%c0_6, %c0_7], %7 {strides = array<i32>} : memref<2x256xf32, #tpu.memory_space<vmem>>, vector<2x256xf32>,
    %c3_i32 = arith.constant 3 : i32
    %9 = arith.cmpi eq, %arg0, %c3_i32 : i32
    %10 = arith.extui %9 : i1 to i32
    %c0_i32_8 = arith.constant 0 : i32
    %11 = arith.cmpi ne, %10, %c0_i32_8 : i32
    scf.if %11 {
      %c0_9 = arith.constant 0 : index
      %c0_10 = arith.constant 0 : index
      %12 = vector.load %arg7[%c0_9, %c0_10] : memref<2x256xf32, #tpu.memory_space<vmem>>, vector<2x256xf32>
      %c0_11 = arith.constant 0 : index
      %c0_12 = arith.constant 0 : index
      %13 = vector.load %arg3[%c0_11, %c0_12] : memref<1x256xf32, #tpu.memory_space<vmem>>, vector<1x256xf32>
      %14 = vector.broadcast %13 : vector<1x256xf32> to vector<2x256xf32>
      %15 = arith.addf %12, %14 : vector<2x256xf32>
      %cst_13 = arith.constant 0.000000e+00 : f32
      %16 = vector.broadcast %cst_13 : f32 to vector<2x256xf32>
      %17 = arith.maximumf %15, %16 : vector<2x256xf32>
      %c0_14 = arith.constant 0 : index
      %c0_15 = arith.constant 0 : index
      %18 = vector.load %arg4[%c0_14, %c0_15] : memref<256x2xf32, #tpu.memory_space<vmem>>, vector<256x2xf32>
      %cst_16 = arith.constant dense<0.000000e+00> : vector<2x2xf32>
      %19 = tpu.matmul %17, %18, %cst_16 {dimension_numbers = #tpu.dot_dimension_numbers<[1], [0], [0], [1], [0, 0, 1, 1], [], []>} : vector<2x256xf32>, vector<256x2xf32>, vector<2x2xf32> -> vector<2x2xf32>
      %c0_17 = arith.constant 0 : index
      %c0_18 = arith.constant 0 : index
      %20 = vector.load %arg5[%c0_17, %c0_18] : memref<1x2xf32, #tpu.memory_space<vmem>>, vector<1x2xf32>
      %21 = vector.broadcast %20 : vector<1x2xf32> to vector<2x2xf32>
      %22 = arith.addf %19, %21 : vector<2x2xf32>
      %c0_19 = arith.constant 0 : index
      %c0_20 = arith.constant 0 : index
      %23 = vector.load %arg6[%c0_19, %c0_20] : memref<2x2xf32, #tpu.memory_space<vmem>>, vector<2x2xf32>
      tpu.vector_store %arg6[%c0_19, %c0_20], %22 {strides = array<i32>} : memref<2x2xf32, #tpu.memory_space<vmem>>, vector<2x2xf32>,
    } else {
    }
    return
  }
  func.func @transform_0(%arg0: i32) -> (i32, i32) {
    %c0_i32 = arith.constant 0 : i32
    %c0_i32_0 = arith.constant 0 : i32
    return %c0_i32, %arg0 : i32, i32
  }
  func.func @transform_1(%arg0: i32) -> (i32, i32) {
    %c0_i32 = arith.constant 0 : i32
    %c0_i32_0 = arith.constant 0 : i32
    return %arg0, %c0_i32 : i32, i32
  }
  func.func @transform_2(%arg0: i32) -> (i32, i32) {
    %c0_i32 = arith.constant 0 : i32
    %c0_i32_0 = arith.constant 0 : i32
    %c0_i32_1 = arith.constant 0 : i32
    return %c0_i32, %c0_i32_0 : i32, i32
  }
  func.func @transform_3(%arg0: i32) -> (i32, i32) {
    %c0_i32 = arith.constant 0 : i32
    %c0_i32_0 = arith.constant 0 : i32
    %c0_i32_1 = arith.constant 0 : i32
    return %c0_i32, %c0_i32_0 : i32, i32
  }
  func.func @transform_4(%arg0: i32) -> (i32, i32) {
    %c0_i32 = arith.constant 0 : i32
    %c0_i32_0 = arith.constant 0 : i32
    %c0_i32_1 = arith.constant 0 : i32
    return %c0_i32, %c0_i32_0 : i32, i32
  }
  func.func @transform_5(%arg0: i32) -> (i32, i32) {
    %c0_i32 = arith.constant 0 : i32
    %c0_i32_0 = arith.constant 0 : i32
    %c0_i32_1 = arith.constant 0 : i32
    return %c0_i32, %c0_i32_0 : i32, i32
  }
}

</mosaic_0001>

<bundles_post_ra>
// kernel: icon_cnn_forward.2
= control target key start
LH: loop header
LB: loop body
LE: loop exit
PB: predicated region body
PF: predicated region fallthrough
CT: control target
= control target key end

     0   :  { %s4802_s24 = smov 0   ;;  %s6772_s0 = inlined_call_operand.vmem [shape: bf16[2,4096,32], index: 0, kind: input, shape index: {}]   ;;  %s6773_s1 = inlined_call_operand.vmem [shape: bf16[32,32], index: 1, kind: input, shape index: {}]   ;;  %s6774_s2 = inlined_call_operand.vmem [shape: f32[1,32], index: 2, kind: input, shape index: {}]   ;;  %s6775_s3 = inlined_call_operand.vmem [shape: bf16[288,64], index: 3, kind: input, shape index: {}]   ;;  %s6776_s4 = inlined_call_operand.vmem [shape: f32[1,64], index: 4, kind: input, shape index: {}]   ;;  %s6777_s5 = inlined_call_operand.vmem [shape: bf16[576,128], index: 5, kind: input, shape index: {}]   ;;  %s6778_s6 = inlined_call_operand.vmem [shape: f32[1,128], index: 6, kind: input, shape index: {}]   ;;  %s6779_s7 = inlined_call_operand.vmem [shape: bf16[2,64,128], index: 7, kind: output, shape index: {}]  }
   0x1 LB: > { %s3949_s25 = sadd.s32 4294967295, %s4738_s24   ;;  %p3953_p0 = scmp.ge.s32.totalorder %s4738_s24, 1  ;;  %s4738_s24 = sphi %s4802_s24, %s17_s24  }
   0x2   : > { %p237_p1 = scmp.lt.s32.totalorder %s4738_s24, 3 }
   0x4   : > { %p238_p2 = pnand %p3953_p0, %p237_p1 }
   0x6   : > { %241 = sbr.rel (%p238_p2) target bundleno = 1958 (0x7a6), region = 48 }
   0xd   : > { %p4812_p3 = scmp.lt.s32.totalorder %s3949_s25, 1  ;;  %vm280_vm0 = vcmask 257024   ;;  %v4819_v0 = vld [vmem:[%s6773_s1] sm:$0xf]  ;;  %v406_v1 = vlaneseq  ;;  %v4752_v2 = vmov 0   ;;  %vm315_vm1 = vcmask 261124  }
   0xe   : > { %281 = vst.msk [vmem:[#allocation2] sm:$0xf] %vm280_vm0, %v4752_v2  ;;  %282 = vst.msk [vmem:[#allocation2 + $0x18] sm:$0xf] %vm280_vm0, %v4752_v2  ;;  %v4896_v3 = vld [vmem:[%s6773_s1 + $0x4] sm:$0xf] }
   0xf   : > { %283 = vst.msk [vmem:[#allocation2 + $0x30] sm:$0xf] %vm280_vm0, %v4752_v2  ;;  %284 = vst.msk [vmem:[#allocation2 + $0x48] sm:$0xf] %vm280_vm0, %v4752_v2  ;;  %v4901_v4 = vld [vmem:[%s6773_s1 + $0x8] sm:$0xf] }
  0x10   : > { %285 = vst.msk [vmem:[#allocation2 + $0x60] sm:$0xf] %vm280_vm0, %v4752_v2  ;;  %286 = vst.msk [vmem:[#allocation2 + $0x78] sm:$0xf] %vm280_vm0, %v4752_v2  ;;  %v4906_v5 = vld [vmem:[%s6773_s1 + $0xc] sm:$0xf] }
  0x11   : > { %287 = vst.msk [vmem:[#allocation2 + $0x90] sm:$0xf] %vm280_vm0, %v4752_v2  ;;  %288 = vst.msk [vmem:[#allocation2 + $0xa8] sm:$0xf] %vm280_vm0, %v4752_v2  ;;  %s6945_s25 = smov (!%p4812_p3, %s3949_s25), 1  ;;  %v4919_v7 = vshrl.u32 %v406_v1, 7 }
  0x12   : > { %289 = vst.msk [vmem:[#allocation2 + $0xc0] sm:$0xf] %vm280_vm0, %v4752_v2  ;;  %290 = vst.msk [vmem:[#allocation2 + $0xd8] sm:$0xf] %vm280_vm0, %v4752_v2  ;;  %v4917_v6 = vld [vmem:[%s6774_s2] ss:$0 sm:$0xff] }
  0x13   : > { %291 = vst.msk [vmem:[#allocation2 + $0xf0] sm:$0xf] %vm280_vm0, %v4752_v2  ;;  %292 = vst.msk [vmem:[#allocation2 + $0x108] sm:$0xf] %vm280_vm0, %v4752_v2  ;;  %v4921_v8 = vand.u32 127, %v406_v1  ;;  %vm351_vm2 = vcmask 261120  }
  0x14   : > { %293 = vst.msk [vmem:[#allocation2 + $0x120] sm:$0xf] %vm280_vm0, %v4752_v2  ;;  %294 = vst.msk [vmem:[#allocation2 + $0x138] sm:$0xf] %vm280_vm0, %v4752_v2  ;;  %vm358_vm3 = vcmask 519168   ;;  %vm377_vm4 = vcmask 523268  }
  0x15   : > { %295 = vst.msk [vmem:[#allocation2 + $0x150] sm:$0xf] %vm280_vm0, %v4752_v2  ;;  %296 = vst.msk [vmem:[#allocation2 + $0x168] sm:$0xf] %vm280_vm0, %v4752_v2  ;;  %s4221_s14 = sshll.u32 %s6945_s25, 11  ;;  %s4222_s15 = sshll.u32 %s6945_s25, 5 }
  0x16   : > { %297 = vst.msk [vmem:[#allocation2 + $0x180] sm:$0xf] %vm280_vm0, %v4752_v2  ;;  %298 = vst.msk [vmem:[#allocation2 + $0x198] sm:$0xf] %vm280_vm0, %v4752_v2  ;;  %v408_v9 = vadd.s32 8, %v4919_v7  ;;  %v409_v10 = vadd.s32 16, %v4919_v7  ;;  %s5090_s18 = scalar_lea.vmem %s6772_s0, %s4221_s14  ;;  %s5097_s21 = scalar_lea.vmem %s6779_s7, %s4222_s15 }
  0x17   : > { %299 = vst.msk [vmem:[#allocation2 + $0x1b0] sm:$0xf] %vm280_vm0, %v4752_v2  ;;  %300 = vst.msk [vmem:[#allocation2 + $0x1c8] sm:$0xf] %vm280_vm0, %v4752_v2  ;;  %v410_v11 = vadd.s32 24, %v4919_v7  ;;  %v413_v12 = vmul.u32 2, %v4919_v7 }
  0x18   : > { %301 = vst.msk [vmem:[#allocation2 + $0x1e0] sm:$0xf] %vm280_vm0, %v4752_v2  ;;  %302 = vst.msk [vmem:[#allocation2 + $0x1f8] sm:$0xf] %vm280_vm0, %v4752_v2  ;;  %v414_v13 = vmul.u32 2, %v408_v9  ;;  %v415_v14 = vmul.u32 2, %v409_v10 }
  0x19   : > { %303 = vst.msk [vmem:[#allocation2 + $0x210] sm:$0xf] %vm280_vm0, %v4752_v2  ;;  %304 = vst.msk [vmem:[#allocation2 + $0x228] sm:$0xf] %vm280_vm0, %v4752_v2  ;;  %vm417_vm5 = vcmp.eq.s32.totalorder %v4921_v8, %v413_v12  ;;  %v416_v15 = vmul.u32 2, %v410_v11  ;;  %v4753_v16 = vmov 0.0  }
  0x1a   : > { %305 = vst.msk [vmem:[#allocation2 + $0x240] sm:$0xf] %vm280_vm0, %v4752_v2  ;;  %306 = vst.msk [vmem:[#allocation2 + $0x258] sm:$0xf] %vm280_vm0, %v4752_v2  ;;  %v5100_v17 = vsel %vm417_vm5, 1.0, %v4753_v16  ;;  %vm418_vm6 = vcmp.eq.s32.totalorder %v4921_v8, %v414_v13  ;;  %vm419_vm7 = vcmp.eq.s32.totalorder %v4921_v8, %v415_v14  ;;  %s5110_s22 = smov 0  }
  0x1b   : > { %307 = vst.msk [vmem:[#allocation2 + $0x270] sm:$0xf] %vm280_vm0, %v4752_v2  ;;  %308 = vst.msk [vmem:[#allocation2 + $0x288] sm:$0xf] %vm280_vm0, %v4752_v2  ;;  %vm420_vm8 = vcmp.eq.s32.totalorder %v4921_v8, %v416_v15  ;;  %v3959_v18 = vsel %vm418_vm6, 1.0, %v4753_v16  ;;  %v3960_v19 = vsel %vm419_vm7, 1.0, %v4753_v16 }
  0x1c   : > { %309 = vst.msk [vmem:[#allocation2 + $0x2a0] sm:$0xf] %vm280_vm0, %v4752_v2  ;;  %310 = vst.msk [vmem:[#allocation2 + $0x2b8] sm:$0xf] %vm280_vm0, %v4752_v2  ;;  %v3961_v20 = vsel %vm420_vm8, 1.0, %v4753_v16  ;;  %v5106_v21 = vpack.c.bf16 %v3959_v18, %v5100_v17 }
  0x1d   : > { %311 = vst.msk [vmem:[#allocation2 + $0x2d0] sm:$0xf] %vm280_vm0, %v4752_v2  ;;  %312 = vst.msk [vmem:[#allocation2 + $0x2e8] sm:$0xf] %vm280_vm0, %v4752_v2  ;;  %v5108_v22 = vpack.c.bf16 %v3961_v20, %v3960_v19 }
  0x1e   : > { %313 = vst.msk [vmem:[#allocation2 + $0x300] sm:$0xf] %vm280_vm0, %v4752_v2  ;;  %314 = vst.msk [vmem:[#allocation2 + $0x318] sm:$0xf] %vm280_vm0, %v4752_v2 }
  0x1f   : > { %353 = vst.msk [vmem:[#allocation2 + $0x10] sm:$0xf] %vm280_vm0, %v4752_v2  ;;  %357 = vst.msk [vmem:[#allocation2 + $0x328] sm:$0xf] %vm280_vm0, %v4752_v2 }
  0x20   : > { %6787 = vst [vmem:[#allocation4_spill] sm:$0xff] %v4919_v7  ;;  %316 = vst.msk [vmem:[#allocation2 + $0x10] sm:$0xf0] %vm315_vm1, %v4752_v2 }
  0x21   : > { %317 = vst.msk [vmem:[#allocation2 + $0x28] sm:$0xf0] %vm315_vm1, %v4752_v2  ;;  %318 = vst.msk [vmem:[#allocation2 + $0x40] sm:$0xf0] %vm315_vm1, %v4752_v2 }
  0x22   : > { %319 = vst.msk [vmem:[#allocation2 + $0x58] sm:$0xf0] %vm315_vm1, %v4752_v2  ;;  %320 = vst.msk [vmem:[#allocation2 + $0x70] sm:$0xf0] %vm315_vm1, %v4752_v2 }
  0x23   : > { %321 = vst.msk [vmem:[#allocation2 + $0x88] sm:$0xf0] %vm315_vm1, %v4752_v2  ;;  %322 = vst.msk [vmem:[#allocation2 + $0xa0] sm:$0xf0] %vm315_vm1, %v4752_v2 }
  0x24   : > { %323 = vst.msk [vmem:[#allocation2 + $0xb8] sm:$0xf0] %vm315_vm1, %v4752_v2  ;;  %324 = vst.msk [vmem:[#allocation2 + $0xd0] sm:$0xf0] %vm315_vm1, %v4752_v2 }
  0x25   : > { %325 = vst.msk [vmem:[#allocation2 + $0xe8] sm:$0xf0] %vm315_vm1, %v4752_v2  ;;  %326 = vst.msk [vmem:[#allocation2 + $0x100] sm:$0xf0] %vm315_vm1, %v4752_v2 }
  0x26   : > { %327 = vst.msk [vmem:[#allocation2 + $0x118] sm:$0xf0] %vm315_vm1, %v4752_v2  ;;  %328 = vst.msk [vmem:[#allocation2 + $0x130] sm:$0xf0] %vm315_vm1, %v4752_v2 }
  0x27   : > { %329 = vst.msk [vmem:[#allocation2 + $0x148] sm:$0xf0] %vm315_vm1, %v4752_v2  ;;  %330 = vst.msk [vmem:[#allocation2 + $0x160] sm:$0xf0] %vm315_vm1, %v4752_v2 }
  0x28   : > { %331 = vst.msk [vmem:[#allocation2 + $0x178] sm:$0xf0] %vm315_vm1, %v4752_v2  ;;  %332 = vst.msk [vmem:[#allocation2 + $0x190] sm:$0xf0] %vm315_vm1, %v4752_v2 }
  0x29   : > { %333 = vst.msk [vmem:[#allocation2 + $0x1a8] sm:$0xf0] %vm315_vm1, %v4752_v2  ;;  %334 = vst.msk [vmem:[#allocation2 + $0x1c0] sm:$0xf0] %vm315_vm1, %v4752_v2 }
  0x2a   : > { %335 = vst.msk [vmem:[#allocation2 + $0x1d8] sm:$0xf0] %vm315_vm1, %v4752_v2  ;;  %336 = vst.msk [vmem:[#allocation2 + $0x1f0] sm:$0xf0] %vm315_vm1, %v4752_v2 }
  0x2b   : > { %337 = vst.msk [vmem:[#allocation2 + $0x208] sm:$0xf0] %vm315_vm1, %v4752_v2  ;;  %338 = vst.msk [vmem:[#allocation2 + $0x220] sm:$0xf0] %vm315_vm1, %v4752_v2 }
  0x2c   : > { %339 = vst.msk [vmem:[#allocation2 + $0x238] sm:$0xf0] %vm315_vm1, %v4752_v2  ;;  %340 = vst.msk [vmem:[#allocation2 + $0x250] sm:$0xf0] %vm315_vm1, %v4752_v2 }
  0x2d   : > { %341 = vst.msk [vmem:[#allocation2 + $0x268] sm:$0xf0] %vm315_vm1, %v4752_v2  ;;  %342 = vst.msk [vmem:[#allocation2 + $0x280] sm:$0xf0] %vm315_vm1, %v4752_v2 }
  0x2e   : > { %343 = vst.msk [vmem:[#allocation2 + $0x298] sm:$0xf0] %vm315_vm1, %v4752_v2  ;;  %344 = vst.msk [vmem:[#allocation2 + $0x2b0] sm:$0xf0] %vm315_vm1, %v4752_v2 }
  0x2f   : > { %345 = vst.msk [vmem:[#allocation2 + $0x2c8] sm:$0xf0] %vm315_vm1, %v4752_v2  ;;  %346 = vst.msk [vmem:[#allocation2 + $0x2e0] sm:$0xf0] %vm315_vm1, %v4752_v2 }
  0x30   : > { %347 = vst.msk [vmem:[#allocation2 + $0x2f8] sm:$0xf0] %vm315_vm1, %v4752_v2  ;;  %348 = vst.msk [vmem:[#allocation2 + $0x310] sm:$0xf0] %vm315_vm1, %v4752_v2 }
  0x31   : > { %349 = vst.msk [vmem:[#allocation2 + $0x328] sm:$0xf0] %vm315_vm1, %v4752_v2  ;;  %350 = vst.msk [vmem:[#allocation2] sm:$0xf0] %vm315_vm1, %v4752_v2 }
  0x32   : > { %355 = vst.msk [vmem:[#allocation2 + $0x318] sm:$0xf0] %vm315_vm1, %v4752_v2 }
  0x33   : > { %352 = vst.msk [vmem:[#allocation2 + $0x8] sm:$0xff] %vm351_vm2, %v4752_v2  ;;  %356 = vst.msk [vmem:[#allocation2 + $0x320] sm:$0xff] %vm351_vm2, %v4752_v2 }
  0x34   : > { %359 = vst.msk [vmem:[#allocation3] sm:$0xf] %vm358_vm3, %v4752_v2  ;;  %360 = vst.msk [vmem:[#allocation3 + $0x10] sm:$0xf] %vm358_vm3, %v4752_v2 }
  0x35   : > { %361 = vst.msk [vmem:[#allocation3 + $0x20] sm:$0xf] %vm358_vm3, %v4752_v2  ;;  %362 = vst.msk [vmem:[#allocation3 + $0x30] sm:$0xf] %vm358_vm3, %v4752_v2 }
  0x36   : > { %363 = vst.msk [vmem:[#allocation3 + $0x40] sm:$0xf] %vm358_vm3, %v4752_v2  ;;  %364 = vst.msk [vmem:[#allocation3 + $0x50] sm:$0xf] %vm358_vm3, %v4752_v2 }
  0x37   : > { %365 = vst.msk [vmem:[#allocation3 + $0x60] sm:$0xf] %vm358_vm3, %v4752_v2  ;;  %366 = vst.msk [vmem:[#allocation3 + $0x70] sm:$0xf] %vm358_vm3, %v4752_v2 }
  0x38   : > { %367 = vst.msk [vmem:[#allocation3 + $0x80] sm:$0xf] %vm358_vm3, %v4752_v2  ;;  %368 = vst.msk [vmem:[#allocation3 + $0x90] sm:$0xf] %vm358_vm3, %v4752_v2 }
  0x39   : > { %369 = vst.msk [vmem:[#allocation3 + $0xa0] sm:$0xf] %vm358_vm3, %v4752_v2  ;;  %370 = vst.msk [vmem:[#allocation3 + $0xb0] sm:$0xf] %vm358_vm3, %v4752_v2 }
  0x3a   : > { %371 = vst.msk [vmem:[#allocation3 + $0xc0] sm:$0xf] %vm358_vm3, %v4752_v2  ;;  %372 = vst.msk [vmem:[#allocation3 + $0xd0] sm:$0xf] %vm358_vm3, %v4752_v2 }
  0x3b   : > { %373 = vst.msk [vmem:[#allocation3 + $0xe0] sm:$0xf] %vm358_vm3, %v4752_v2  ;;  %374 = vst.msk [vmem:[#allocation3 + $0xf0] sm:$0xf] %vm358_vm3, %v4752_v2 }
  0x3c   : > { %375 = vst.msk [vmem:[#allocation3 + $0x100] sm:$0xf] %vm358_vm3, %v4752_v2  ;;  %376 = vst.msk [vmem:[#allocation3 + $0x110] sm:$0xf] %vm358_vm3, %v4752_v2 }
  0x3d   : > { %397 = vst.msk [vmem:[#allocation3 + $0x8] sm:$0xf] %vm358_vm3, %v4752_v2  ;;  %400 = vst.msk [vmem:[#allocation3 + $0x118] sm:$0xf] %vm358_vm3, %v4752_v2 }
  0x3e   : > { %378 = vst.msk [vmem:[#allocation3 + $0x8] sm:$0xf0] %vm377_vm4, %v4752_v2  ;;  %379 = vst.msk [vmem:[#allocation3 + $0x18] sm:$0xf0] %vm377_vm4, %v4752_v2 }
  0x3f   : > { %380 = vst.msk [vmem:[#allocation3 + $0x28] sm:$0xf0] %vm377_vm4, %v4752_v2  ;;  %381 = vst.msk [vmem:[#allocation3 + $0x38] sm:$0xf0] %vm377_vm4, %v4752_v2 }
  0x40   : > { %382 = vst.msk [vmem:[#allocation3 + $0x48] sm:$0xf0] %vm377_vm4, %v4752_v2  ;;  %383 = vst.msk [vmem:[#allocation3 + $0x58] sm:$0xf0] %vm377_vm4, %v4752_v2 }
  0x41   : > { %384 = vst.msk [vmem:[#allocation3 + $0x68] sm:$0xf0] %vm377_vm4, %v4752_v2  ;;  %385 = vst.msk [vmem:[#allocation3 + $0x78] sm:$0xf0] %vm377_vm4, %v4752_v2 }
  0x42   : > { %386 = vst.msk [vmem:[#allocation3 + $0x88] sm:$0xf0] %vm377_vm4, %v4752_v2  ;;  %387 = vst.msk [vmem:[#allocation3 + $0x98] sm:$0xf0] %vm377_vm4, %v4752_v2 }
  0x43   : > { %388 = vst.msk [vmem:[#allocation3 + $0xa8] sm:$0xf0] %vm377_vm4, %v4752_v2  ;;  %389 = vst.msk [vmem:[#allocation3 + $0xb8] sm:$0xf0] %vm377_vm4, %v4752_v2 }
  0x44   : > { %390 = vst.msk [vmem:[#allocation3 + $0xc8] sm:$0xf0] %vm377_vm4, %v4752_v2  ;;  %391 = vst.msk [vmem:[#allocation3 + $0xd8] sm:$0xf0] %vm377_vm4, %v4752_v2 }
  0x45   : > { %392 = vst.msk [vmem:[#allocation3 + $0xe8] sm:$0xf0] %vm377_vm4, %v4752_v2  ;;  %393 = vst.msk [vmem:[#allocation3 + $0xf8] sm:$0xf0] %vm377_vm4, %v4752_v2 }
  0x46   : > { %394 = vst.msk [vmem:[#allocation3 + $0x108] sm:$0xf0] %vm377_vm4, %v4752_v2  ;;  %395 = vst.msk [vmem:[#allocation3 + $0x118] sm:$0xf0] %vm377_vm4, %v4752_v2 }
  0x47   : > { %396 = vst.msk [vmem:[#allocation3] sm:$0xf0] %vm377_vm4, %v4752_v2  ;;  %399 = vst.msk [vmem:[#allocation3 + $0x110] sm:$0xf0] %vm377_vm4, %v4752_v2 }
  0x48 LB: >> { %v3997_v23 = vcombine.low %v4819_v0, %v4896_v3  ;;  %v3998_v24 = vcombine.low %v4901_v4, %v4906_v5  ;;  %s3962_s23 = sshll.u32 %s4742_s22, 9  ;;  %vm1170_vm9 = vcmask 523264   ;;  %vm1149_vm10 = vcmp.lt.s32.totalorder %v4919_v7, 7  ;;  %s4034_s28 = smul.u32 96, %s4742_s22  ;;  %s4742_s22 = sphi %s5110_s22, %s436_s22  }
  0x49   : >> { %s438_s25 = sshra.s32 %s3962_s23, 3  ;;  %vm1232_vm11 = vcmask 1043456   ;;  %s436_s22 = sadd.s32 1, %s4742_s22  }
  0x4a   : >> { %4346 = vmatprep.subr.bf16.mxu0 %v3997_v23  ;;  %4574 = vmatprep.subr.bf16.mxu1 %v3997_v23  ;;  %s3963_s26 = sshll.u32 %s438_s25, 2  ;;  %s5426_s29 = scalar_lea.vmem [#allocation2], %s4034_s28 }
  0x4b   : >> { %4347 = vmatpush3.bf16.msra.mxu0 %v3997_v23  ;;  %4576 = vmatpush3.bf16.msra.mxu1 %v3997_v23  ;;  %s5121_s27 = scalar_lea.vmem %s5090_s18, %s3963_s26  ;;  %p433_p4 = scmp.ge.s32.totalorder %s436_s22, 8  }
  0x4c   : >> { %4348 = vmatprep.subr.bf16.mxu0 %v3998_v24  ;;  %4575 = vmatprep.subr.bf16.mxu1 %v3998_v24  ;;  %v4688_v25 = vld [vmem:[%s5121_s27] sm:$0xff]   ;;  %v4689_v26 = vld [vmem:[%s5121_s27 + $0x8] sm:$0xff]   ;;  %v4690_v27 = vld [vmem:[%s5121_s27 + $0x10] sm:$0xff]   ;;  %s5644_s18 = smov (%p433_p4), 0  }
  0x4d   : >> { %4350 = vmatprep.mubr.msk.bf16.mxu0 %vm351_vm2, %v4688_v25  ;;  %v4691_v28 = vld [vmem:[%s5121_s27 + $0x18] sm:$0xff]   ;;  %v4692_v29 = vld [vmem:[%s5121_s27 + $0x20] sm:$0xff]   ;;  %v4703_v31 = vld [vmem:[%s5121_s27 + $0xc8] sm:$0xff]  }
  0x4e   : >> { %v4702_v30 = vld [vmem:[%s5121_s27 + $0xc0] sm:$0xff]   ;;  %v4693_v32 = vld [vmem:[%s5121_s27 + $0x28] sm:$0xff]   ;;  %v4694_v33 = vld [vmem:[%s5121_s27 + $0x30] sm:$0xff]  }
  0x4f   : >> { %4349 = vmatpush3.bf16.msra.mxu0 %v3998_v24  ;;  %4577 = vmatpush3.bf16.msra.mxu1 %v3998_v24  ;;  %v4706_v34 = vld [vmem:[%s5121_s27 + $0xd0] sm:$0xff]   ;;  %v4707_v35 = vld [vmem:[%s5121_s27 + $0xd8] sm:$0xff]   ;;  %v4710_v36 = vld [vmem:[%s5121_s27 + $0xe0] sm:$0xff]  }
  0x50   : >> { %4398 = vmatprep.mubr.msk.bf16.mxu1 %vm351_vm2, %v4702_v30  ;;  %v4695_v37 = vld [vmem:[%s5121_s27 + $0x38] sm:$0xff]   ;;  %v4696_v38 = vld [vmem:[%s5121_s27 + $0x40] sm:$0xff]   ;;  %v4711_v39 = vld [vmem:[%s5121_s27 + $0xe8] sm:$0xff]  }
  0x51   : >> { %v4714_v40 = vld [vmem:[%s5121_s27 + $0xf0] sm:$0xff]   ;;  %v4697_v41 = vld [vmem:[%s5121_s27 + $0x48] sm:$0xff]   ;;  %v4715_v43 = vld [vmem:[%s5121_s27 + $0xf8] sm:$0xff]  }
  0x52   : >> { %4351 = vmatmul.mubr.msk.bf16.vlgmr.msra.gmra.mrb[0].mxu0 %vm351_vm2, %v4689_v26  ;;  %4399 = vmatmul.mubr.msk.bf16.vlgmr.msra.gmra.mrb[0].mxu1 %vm351_vm2, %v4703_v31  ;;  %v4698_v42 = vld [vmem:[%s5121_s27 + $0x50] sm:$0xff]   ;;  %v4699_v44 = vld [vmem:[%s5121_s27 + $0x58] sm:$0xff]   ;;  %v4700_v45 = vld [vmem:[%s5121_s27 + $0x60] sm:$0xff]  }
  0x53   : >> { %4354 = vmatprep.mubr.msk.bf16.mxu0 %vm351_vm2, %v4690_v27  ;;  %4402 = vmatprep.mubr.msk.bf16.mxu1 %vm351_vm2, %v4706_v34  ;;  %v4701_v46 = vld [vmem:[%s5121_s27 + $0x68] sm:$0xff]   ;;  %v4704_v47 = vld [vmem:[%s5121_s27 + $0x70] sm:$0xff]   ;;  %v4705_v48 = vld [vmem:[%s5121_s27 + $0x78] sm:$0xff]  }
  0x54   : >> { %v4708_v49 = vld [vmem:[%s5121_s27 + $0x80] sm:$0xff]   ;;  %v4709_v50 = vld [vmem:[%s5121_s27 + $0x88] sm:$0xff]   ;;  %v4712_v51 = vld [vmem:[%s5121_s27 + $0x90] sm:$0xff]  }
  0x55   : >> { %v4713_v52 = vld [vmem:[%s5121_s27 + $0x98] sm:$0xff]   ;;  %v4716_v53 = vld [vmem:[%s5121_s27 + $0xa0] sm:$0xff]   ;;  %v4717_v54 = vld [vmem:[%s5121_s27 + $0xa8] sm:$0xff]  }
  0x56   : >> { %v4718_v55 = vld [vmem:[%s5121_s27 + $0xb0] sm:$0xff]   ;;  %v4719_v56 = vld [vmem:[%s5121_s27 + $0xb8] sm:$0xff]   ;;  %v5482_v0 = vld [vmem:[%s6775_s3 + $0xc] sm:$0xf] (%p433_p4) }
  0x57   : > { %6790 = vst [vmem:[#allocation7_spill] sm:$0xff] (%p433_p4), %v5482_v0  ;;  %v5487_v3 = vld [vmem:[%s6775_s3 + $0x10] sm:$0xf] (%p433_p4)  ;;  %v5492_v4 = vld [vmem:[%s6775_s3 + $0x14] sm:$0xf] (%p433_p4) }
  0x58   : > { %6791 = vst [vmem:[#allocation8_spill] sm:$0xff] (%p433_p4), %v5487_v3  ;;  %6792 = vst [vmem:[#allocation9_spill] sm:$0xff] (%p433_p4), %v5492_v4  ;;  %v5497_v5 = vld [vmem:[%s6775_s3 + $0x18] sm:$0xf] (%p433_p4) }
  0x59   : > { %6793 = vst [vmem:[#allocation10_spill] sm:$0xff] (%p433_p4), %v5497_v5 }
  0x5a   : >> { %4355 = vmatmul.mubr.msk.bf16.gmra.mrb[4].mxu0 %vm351_vm2, %v4691_v28  ;;  %4403 = vmatmul.mubr.msk.bf16.gmra.mrb[4].mxu1 %vm351_vm2, %v4707_v35 }
  0x5b   : >> { %4358 = vmatprep.mubr.msk.bf16.mxu0 %vm351_vm2, %v4692_v29  ;;  %4406 = vmatprep.mubr.msk.bf16.mxu1 %vm351_vm2, %v4710_v36 }
  0x62   : >> { %4359 = vmatmul.mubr.msk.bf16.gmra.mrb[8].mxu0 %vm351_vm2, %v4693_v32  ;;  %4407 = vmatmul.mubr.msk.bf16.gmra.mrb[8].mxu1 %vm351_vm2, %v4711_v39 }
  0x63   : >> { %4362 = vmatprep.mubr.msk.bf16.mxu0 %vm351_vm2, %v4694_v33  ;;  %4410 = vmatprep.mubr.msk.bf16.mxu1 %vm351_vm2, %v4714_v40 }
  0x6a   : >> { %4363 = vmatmul.mubr.msk.bf16.gmra.mrb[12].mxu0 %vm351_vm2, %v4695_v37  ;;  %4411 = vmatmul.mubr.msk.bf16.gmra.mrb[12].mxu1 %vm351_vm2, %v4715_v43 }
  0x6b   : >> { %4366 = vmatprep.mubr.msk.bf16.mxu0 %vm351_vm2, %v4696_v38  ;;  %4422 = vmatprep.mubr.msk.bf16.mxu1 %vm1170_vm9, %v5106_v21 }
  0x72   : >> { %4367 = vmatmul.mubr.msk.bf16.gmra.mrb[16].mxu0 %vm351_vm2, %v4697_v41 }
  0x73   : >> { %4370 = vmatprep.mubr.msk.bf16.mxu0 %vm351_vm2, %v4698_v42 }
  0x7a   : >> { %4371 = vmatmul.mubr.msk.bf16.gmra.mrb[20].mxu0 %vm351_vm2, %v4699_v44 }
  0x7b   : >> { %4374 = vmatprep.mubr.msk.bf16.mxu0 %vm351_vm2, %v4700_v45 }
  0x82   : >> { %4375 = vmatmul.mubr.msk.bf16.gmra.mrb[24].mxu0 %vm351_vm2, %v4701_v46 }
  0x83   : >> { %4378 = vmatprep.mubr.msk.bf16.mxu0 %vm351_vm2, %v4704_v47 }
  0x8a   : >> { %4379 = vmatmul.mubr.msk.bf16.gmra.mrb[28].mxu0 %vm351_vm2, %v4705_v48 }
  0x8b   : >> { %4382 = vmatprep.mubr.msk.bf16.mxu0 %vm351_vm2, %v4708_v49 }
  0x92   : >> { %4383 = vmatmul.mubr.msk.bf16.gmra.mrb[32].mxu0 %vm351_vm2, %v4709_v50 }
  0x93   : >> { %4386 = vmatprep.mubr.msk.bf16.mxu0 %vm351_vm2, %v4712_v51 }
  0x9a   : >> { %4387 = vmatmul.mubr.msk.bf16.gmra.mrb[36].mxu0 %vm351_vm2, %v4713_v52 }
  0x9b   : >> { %4390 = vmatprep.mubr.msk.bf16.mxu0 %vm351_vm2, %v4716_v53 }
  0xa2   : >> { %4391 = vmatmul.mubr.msk.bf16.gmra.mrb[40].mxu0 %vm351_vm2, %v4717_v54 }
  0xa3   : >> { %4394 = vmatprep.mubr.msk.bf16.mxu0 %vm351_vm2, %v4718_v55 }
  0xaa   : >> { %4395 = vmatmul.mubr.msk.bf16.gmra.mrb[44].mxu0 %vm351_vm2, %v4719_v56 }
 0x125   : >> { %v4352_v57 = vpop.f32.mrb[0].mxu0  ;;  %v4400_v9 = vpop.f32.mrb[0].mxu1 }
 0x126   : >> { %v814_v58 = vpop.f32.mrb[1].mxu0  ;;  %v823_v2 = vadd.f32 %v4352_v57, %v4917_v6  ;;  %v1006_v10 = vpop.f32.mrb[1].mxu1  ;;  %v5205_v34 = vadd.f32 %v4400_v9, %v4917_v6 }
 0x127   : >> { %v4353_v59 = vpop.f32.mrb[2].mxu0  ;;  %v815_v8 = vadd.f32 %v4917_v6, %v814_v58  ;;  %v4401_v11 = vpop.f32.mrb[2].mxu1  ;;  %v5208_v35 = vadd.f32 %v4917_v6, %v1006_v10 }
 0x128   : >> { %v817_v60 = vpop.f32.mrb[3].mxu0  ;;  %v1009_v13 = vpop.f32.mrb[3].mxu1  ;;  %v1071_v14 = vmax.f32 %v823_v2, 0.0  ;;  %v826_v16 = vadd.f32 %v4353_v59, %v4917_v6  ;;  %v5213_v39 = vadd.f32 %v4401_v11, %v4917_v6  ;;  %v1119_v53 = vmax.f32 %v5205_v34, 0.0 }
 0x129   : >> { %v1069_v15 = vmax.f32 %v815_v8, 0.0  ;;  %v818_v20 = vadd.f32 %v4917_v6, %v817_v60  ;;  %v1117_v54 = vmax.f32 %v5208_v35, 0.0  ;;  %v5223_v55 = vadd.f32 %v4917_v6, %v1009_v13 }
 0x12a   : >> { %v1072_v36 = vmax.f32 %v826_v16, 0.0 }
 0x12b   : >> { %v1070_v41 = vmax.f32 %v818_v20, 0.0 }
 0x12d   : >> { %v4356_v61 = vpop.f32.mrb[4].mxu0  ;;  %v4404_v40 = vpop.f32.mrb[4].mxu1 }
 0x12e   : >> { %v830_v62 = vpop.f32.mrb[5].mxu0  ;;  %v839_v23 = vadd.f32 %v4356_v61, %v4917_v6  ;;  %v1022_v45 = vpop.f32.mrb[5].mxu1  ;;  %v1120_v61 = vmax.f32 %v5213_v39, 0.0  ;;  %v5232_v8 = vadd.f32 %v4404_v40, %v4917_v6 }
 0x12f   : >> { %v4357_v63 = vpop.f32.mrb[6].mxu0  ;;  %v831_v24 = vadd.f32 %v4917_v6, %v830_v62  ;;  %v4405_v50 = vpop.f32.mrb[6].mxu1  ;;  %v5238_v13 = vadd.f32 %v4917_v6, %v1022_v45 }
 0x130   : >> { %v833_v1 = vpop.f32.mrb[7].mxu0  ;;  %v842_v27 = vadd.f32 %v4357_v63, %v4917_v6  ;;  %v1075_v42 = vmax.f32 %v839_v23, 0.0  ;;  %v1025_v56 = vpop.f32.mrb[7].mxu1 }
 0x131   : >> { %v5200_v28 = vadd.f32 %v4917_v6, %v833_v1  ;;  %v1073_v46 = vmax.f32 %v831_v24, 0.0 }
 0x132   : >> { %v1076_v47 = vmax.f32 %v842_v27, 0.0 }
 0x133   : >> { %v1074_v48 = vmax.f32 %v5200_v28, 0.0 }
 0x135   : >> { %v4360_v12 = vpop.f32.mrb[8].mxu0 }
 0x136   : >> { %v855_v18 = vadd.f32 %v4360_v12, %v4917_v6  ;;  %v846_v19 = vpop.f32.mrb[9].mxu0 }
 0x137   : >> { %v847_v25 = vadd.f32 %v4917_v6, %v846_v19  ;;  %v4361_v26 = vpop.f32.mrb[10].mxu0 }
 0x138   : >> { %v1079_v29 = vmax.f32 %v855_v18, 0.0  ;;  %v858_v30 = vadd.f32 %v4361_v26, %v4917_v6  ;;  %v849_v31 = vpop.f32.mrb[11].mxu0 }
 0x139   : >> { %v1077_v32 = vmax.f32 %v847_v25, 0.0  ;;  %v850_v33 = vadd.f32 %v4917_v6, %v849_v31  ;;  %v4408_v25 = vpop.f32.mrb[8].mxu1 }
 0x13a   : >> { %v5210_v37 = vmax.f32 %v1071_v14, %v1079_v29  ;;  %v1080_v38 = vmax.f32 %v858_v30, 0.0  ;;  %v1047_v29 = vadd.f32 %v4408_v25, %v4917_v6  ;;  %v1038_v30 = vpop.f32.mrb[9].mxu1 }
 0x13b   : >> { %v5215_v43 = vmax.f32 %v1069_v15, %v1077_v32  ;;  %v1078_v44 = vmax.f32 %v850_v33, 0.0  ;;  %v1118_v33 = vmax.f32 %v5223_v55, 0.0  ;;  %v1039_v34 = vadd.f32 %v4917_v6, %v1038_v30 }
 0x13c   : >> { %v5218_v49 = vmax.f32 %v1072_v36, %v1080_v38  ;;  %v1143_v57 = vrot.slane %v5210_v37, 1  ;;  %v4409_v36 = vpop.f32.mrb[10].mxu1 }
 0x13d   : >> { %v1134_v51 = vmax.f32 %v1070_v41, %v1078_v44  ;;  %v4364_v52 = vpop.f32.mrb[12].mxu0  ;;  %v1141_v62 = vrot.slane %v5215_v43, 1  ;;  %v1041_v44 = vpop.f32.mrb[11].mxu1 }
 0x13e   : >> { %v1144_v58 = vrot.slane %v5218_v49, 1  ;;  %v871_v59 = vadd.f32 %v4364_v52, %v4917_v6  ;;  %v862_v60 = vpop.f32.mrb[13].mxu0 }
 0x13f   : >> { %v1142_v63 = vrot.slane %v1134_v51, 1  ;;  %v863_v1 = vadd.f32 %v4917_v6, %v862_v60  ;;  %v4365_v2 = vpop.f32.mrb[14].mxu0 }
 0x140   : >> { %v1083_v9 = vmax.f32 %v871_v59, 0.0  ;;  %v874_v10 = vadd.f32 %v4365_v2, %v4917_v6  ;;  %v865_v11 = vpop.f32.mrb[15].mxu0  ;;  %v1154_v12 = vsel %vm1149_vm10, %v1143_v57, %v1144_v58  ;;  %v1042_v2 = vadd.f32 %v4917_v6, %v1041_v44 }
 0x141   : >> { %v1155_v14 = vsel %vm1149_vm10, %v1142_v63, %v1143_v57  ;;  %v1081_v15 = vmax.f32 %v863_v1, 0.0  ;;  %v866_v16 = vadd.f32 %v4917_v6, %v865_v11  ;;  %v1156_v18 = vsel %vm1149_vm10, %v1141_v62, %v1142_v63 }
 0x142   : >> { %v1159_v19 = vmax.f32 %v1134_v51, %v1155_v14  ;;  %v5245_v20 = vmax.f32 %v1075_v42, %v1083_v9  ;;  %v1084_v23 = vmax.f32 %v874_v10, 0.0  ;;  %v1158_v24 = vmax.f32 %v5215_v43, %v1156_v18 }
 0x143   : >> { %v1137_v26 = vmax.f32 %v1073_v46, %v1081_v15  ;;  %v1082_v27 = vmax.f32 %v866_v16, 0.0  ;;  %v1160_v28 = vmax.f32 %v5210_v37, %v1154_v12  ;;  %v5253_v42 = vadd.f32 %v4405_v50, %v4917_v6  ;;  %v4412_v12 = vpop.f32.mrb[12].mxu1 }
 0x144   : >> { %v1140_v31 = vmax.f32 %v1076_v47, %v1084_v23  ;;  %v1166_v32 = vpack.c.bf16 %v1159_v19, %v1158_v24  ;;  %v1127_v43 = vmax.f32 %v1047_v29, 0.0  ;;  %v1147_v37 = vrot.slane %v5245_v20, 1  ;;  %v1054_v16 = vpop.f32.mrb[13].mxu1 }
 0x145   : >> { %v1145_v38 = vrot.slane %v1137_v26, 1  ;;  %v1138_v40 = vmax.f32 %v1074_v48, %v1082_v27  ;;  %v4368_v41 = vpop.f32.mrb[16].mxu0  ;;  %v1123_v47 = vmax.f32 %v5232_v8, 0.0  ;;  %v1121_v51 = vmax.f32 %v5238_v13, 0.0  ;;  %v4413_v25 = vpop.f32.mrb[14].mxu1 }
 0x146   : >> { %v1148_v45 = vrot.slane %v1140_v31, 1  ;;  %v878_v46 = vpop.f32.mrb[17].mxu0  ;;  %4414 = vmatprep.subr.bf16.mxu1 %v1166_v32  ;;  %v5260_v57 = vmax.f32 %v1119_v53, %v1127_v43  ;;  %v1050_v50 = vadd.f32 %v4409_v36, %v4917_v6  ;;  %v1125_v1 = vmax.f32 %v1039_v34, 0.0 }
 0x147   : >> { %v1146_v52 = vrot.slane %v1138_v40, 1  ;;  %v4369_v55 = vpop.f32.mrb[18].mxu0  ;;  %4415 = vmatpush3.bf16.msra.mxu1 %v1166_v32  ;;  %v1153_v48 = vsel %vm1149_vm10, %v1144_v58, %v1145_v38  ;;  %v1124_v10 = vmax.f32 %v5253_v42, 0.0  ;;  %v5271_v53 = vadd.f32 %v4917_v6, %v1025_v56 }
 0x148   : >> { %v1157_v59 = vsel %vm1149_vm10, %v1148_v45, %v1141_v62  ;;  %v881_v60 = vpop.f32.mrb[19].mxu0  ;;  %v1161_v63 = vmax.f32 %v5218_v49, %v1153_v48  ;;  %v5274_v11 = vadd.f32 %v4368_v41, %v4917_v6  ;;  %v5279_v13 = vadd.f32 %v4917_v6, %v878_v46 }
 0x149   : >> { %v1165_v8 = vmax.f32 %v1140_v31, %v1157_v59  ;;  %v1151_v9 = vsel %vm1149_vm10, %v1146_v52, %v1147_v37  ;;  %v1152_v49 = vsel %vm1149_vm10, %v1145_v38, %v1146_v52  ;;  %v5282_v14 = vadd.f32 %v4369_v55, %v4917_v6  ;;  %v1057_v31 = vpop.f32.mrb[15].mxu1 }
 0x14a   : >> { %v1163_v58 = vmax.f32 %v1138_v40, %v1151_v9  ;;  %v1167_v62 = vpack.c.bf16 %v1161_v63, %v1160_v28  ;;  %v1162_v15 = vmax.f32 %v1137_v26, %v1152_v49  ;;  %v1150_v56 = vsel %vm1149_vm10, %v1147_v37, %v1148_v45 }
 0x14b   : >> { %v1164_v18 = vmax.f32 %v5245_v20, %v1150_v56  ;;  %v1449_v19 = vmax.f32 %v1117_v54, %v1125_v1  ;;  %v1128_v23 = vmax.f32 %v1050_v50, 0.0  ;;  %v1126_v24 = vmax.f32 %v1042_v2, 0.0 }
 0x14c   : >> { %4416 = vmatprep.subr.bf16.mxu1 %v1167_v62  ;;  %v1168_v28 = vpack.c.bf16 %v1163_v58, %v1162_v15  ;;  %v1063_v29 = vadd.f32 %v4412_v12, %v4917_v6  ;;  %v1055_v26 = vadd.f32 %v4917_v6, %v1054_v16  ;;  %v1066_v30 = vadd.f32 %v4413_v25, %v4917_v6 }
 0x14d   : >> { %v4372_v27 = vpop.f32.mrb[20].mxu0  ;;  %4417 = vmatpush3.bf16.msra.mxu1 %v1167_v62  ;;  %v5293_v32 = vadd.f32 %v4917_v6, %v881_v60  ;;  %v1169_v34 = vpack.c.bf16 %v1165_v8, %v1164_v18  ;;  %v1459_v35 = vrot.slane %v5260_v57, 1  ;;  %v1452_v54 = vmax.f32 %v1120_v61, %v1128_v23 }
 0x14e   : >> { %v894_v20 = vpop.f32.mrb[21].mxu0  ;;  %4418 = vmatprep.subr.bf16.mxu1 %v1168_v28  ;;  %v1457_v38 = vrot.slane %v1449_v19, 1  ;;  %v1450_v40 = vmax.f32 %v1118_v33, %v1126_v24  ;;  %v1131_v41 = vmax.f32 %v1063_v29, 0.0  ;;  %v1129_v42 = vmax.f32 %v1055_v26, 0.0 }
 0x14f   : >> { %v4373_v36 = vpop.f32.mrb[22].mxu0  ;;  %v1122_v44 = vmax.f32 %v5271_v53, 0.0  ;;  %v1132_v37 = vmax.f32 %v1066_v30, 0.0  ;;  %v1087_v45 = vmax.f32 %v5274_v11, 0.0  ;;  %v1460_v46 = vrot.slane %v1452_v54, 1 }
 0x150   : >> { %v5298_v43 = vpop.f32.mrb[23].mxu0  ;;  %v1458_v52 = vrot.slane %v1450_v40, 1  ;;  %v5302_v55 = vmax.f32 %v1123_v47, %v1131_v41  ;;  %v1085_v39 = vmax.f32 %v5279_v13, 0.0  ;;  %v1453_v61 = vmax.f32 %v1121_v51, %v1129_v42 }
 0x151   : >> { %4419 = vmatpush3.bf16.msra.mxu1 %v1168_v28  ;;  %v1456_v48 = vmax.f32 %v1124_v10, %v1132_v37  ;;  %v1058_v33 = vadd.f32 %v4917_v6, %v1057_v31  ;;  %v1088_v50 = vmax.f32 %v5282_v14, 0.0  ;;  %v1086_v59 = vmax.f32 %v5293_v32, 0.0 }
 0x152   : >> { %4420 = vmatprep.subr.bf16.mxu1 %v1169_v34  ;;  %v1470_v60 = vsel %vm1149_vm10, %v1458_v52, %v1459_v35  ;;  %v1471_v63 = vsel %vm1149_vm10, %v1457_v38, %v1458_v52  ;;  %v1461_v47 = vrot.slane %v1453_v61, 1  ;;  %v5313_v9 = vadd.f32 %v4372_v27, %v4917_v6 }
 0x153   : >> { %v1474_v1 = vmax.f32 %v1450_v40, %v1470_v60  ;;  %v1464_v2 = vrot.slane %v1456_v48, 1  ;;  %v1130_v8 = vmax.f32 %v1058_v33, 0.0  ;;  %v1463_v10 = vrot.slane %v5302_v55, 1 }
 0x154   : >> { %v1473_v53 = vmax.f32 %v1449_v19, %v1471_v63  ;;  %v1469_v58 = vsel %vm1149_vm10, %v1459_v35, %v1460_v46  ;;  %v1468_v13 = vsel %vm1149_vm10, %v1460_v46, %v1461_v47  ;;  %v895_v28 = vadd.f32 %v4917_v6, %v894_v20 }
 0x155   : >> { %v4376_v51 = vpop.f32.mrb[24].mxu0  ;;  %4421 = vmatpush3.bf16.msra.mxu1 %v1169_v34  ;;  %v1472_v49 = vsel %vm1149_vm10, %v1464_v2, %v1457_v38  ;;  %v1454_v12 = vmax.f32 %v1122_v44, %v1130_v8  ;;  %v1475_v18 = vmax.f32 %v5260_v57, %v1469_v58  ;;  %v1476_v27 = vmax.f32 %v1452_v54, %v1468_v13 }
 0x156   : >> { %v919_v11 = vadd.f32 %v4376_v51, %v4917_v6  ;;  %v910_v62 = vpop.f32.mrb[25].mxu0  ;;  %v1480_v56 = vmax.f32 %v1456_v48, %v1472_v49  ;;  %v5324_v16 = vpack.c.bf16 %v1474_v1, %v1473_v53  ;;  %v1465_v57 = vsel %vm1149_vm10, %v1463_v10, %v1464_v2 }
 0x157   : >> { %v911_v14 = vadd.f32 %v4917_v6, %v910_v62  ;;  %v4377_v15 = vpop.f32.mrb[26].mxu0  ;;  %v1462_v25 = vrot.slane %v1454_v12, 1  ;;  %v5340_v34 = vpack.c.bf16 %v1476_v27, %v1475_v18  ;;  %v906_v40 = vadd.f32 %v4373_v36, %v4917_v6 }
 0x158   : >> { %v1095_v19 = vmax.f32 %v919_v11, 0.0  ;;  %v922_v23 = vadd.f32 %v4377_v15, %v4917_v6  ;;  %v913_v24 = vpop.f32.mrb[27].mxu0  ;;  %4423 = vmatmul.mubr.msk.bf16.vlgmr.msra.gmra.mrb[16].mxu1 %vm1170_vm9, %v5108_v22  ;;  %v1479_v44 = vmax.f32 %v5302_v55, %v1465_v57  ;;  %v1091_v37 = vmax.f32 %v5313_v9, 0.0 }
 0x159   : >> { %v1093_v29 = vmax.f32 %v911_v14, 0.0  ;;  %v914_v26 = vadd.f32 %v4917_v6, %v913_v24  ;;  %4434 = vmatprep.mubr.msk.bf16.mxu1 %vm1170_vm9, %v5106_v21  ;;  %v1466_v32 = vsel %vm1149_vm10, %v1462_v25, %v1463_v10  ;;  %v1467_v38 = vsel %vm1149_vm10, %v1461_v47, %v1462_v25 }
 0x15a   : >> { %v5336_v30 = vmax.f32 %v1087_v45, %v1095_v19  ;;  %v1096_v31 = vmax.f32 %v922_v23, 0.0  ;;  %v1478_v20 = vmax.f32 %v1454_v12, %v1466_v32  ;;  %v1477_v42 = vmax.f32 %v1453_v61, %v1467_v38 }
 0x15b   : >> { %v1245_v35 = vmax.f32 %v1085_v39, %v1093_v29  ;;  %v1094_v54 = vmax.f32 %v914_v26, 0.0  ;;  %v1089_v45 = vmax.f32 %v895_v28, 0.0  ;;  %v5351_v1 = vpack.c.bf16 %v1480_v56, %v1479_v44 }
 0x15c   : >> { %v1248_v41 = vmax.f32 %v1088_v50, %v1096_v31  ;;  %v1255_v46 = vrot.slane %v5336_v30, 1  ;;  %v5349_v63 = vpack.c.bf16 %v1478_v20, %v1477_v42  ;;  %v898_v36 = vadd.f32 %v4917_v6, %v5298_v43 }
 0x15d   : >> { %v1246_v52 = vmax.f32 %v1086_v59, %v1094_v54  ;;  %v4380_v48 = vpop.f32.mrb[28].mxu0  ;;  %v1253_v61 = vrot.slane %v1245_v35, 1  ;;  %v1092_v2 = vmax.f32 %v906_v40, 0.0 }
 0x15e   : >> { %v1256_v33 = vrot.slane %v1248_v41, 1  ;;  %v935_v39 = vadd.f32 %v4380_v48, %v4917_v6  ;;  %v926_v60 = vpop.f32.mrb[29].mxu0  ;;  %v1090_v13 = vmax.f32 %v898_v36, 0.0 }
 0x15f   : >> { %v1254_v55 = vrot.slane %v1246_v52, 1  ;;  %v927_v50 = vadd.f32 %v4917_v6, %v926_v60  ;;  %v4381_v47 = vpop.f32.mrb[30].mxu0 }
 0x160   : >> { %v1099_v8 = vmax.f32 %v935_v39, 0.0  ;;  %v938_v59 = vadd.f32 %v4381_v47, %v4917_v6  ;;  %v929_v9 = vpop.f32.mrb[31].mxu0  ;;  %v1265_v51 = vsel %vm1149_vm10, %v1255_v46, %v1256_v33 }
 0x161   : >> { %v1266_v10 = vsel %vm1149_vm10, %v1254_v55, %v1255_v46  ;;  %v1097_v53 = vmax.f32 %v927_v50, 0.0  ;;  %v930_v58 = vadd.f32 %v4917_v6, %v929_v9  ;;  %v1267_v43 = vsel %vm1149_vm10, %v1253_v61, %v1254_v55 }
 0x162   : >> { %v1270_v11 = vmax.f32 %v1246_v52, %v1266_v10  ;;  %v1251_v62 = vmax.f32 %v1091_v37, %v1099_v8  ;;  %v1100_v49 = vmax.f32 %v938_v59, 0.0  ;;  %v1269_v12 = vmax.f32 %v1245_v35, %v1267_v43 }
 0x163   : >> { %v1249_v14 = vmax.f32 %v1089_v45, %v1097_v53  ;;  %v1098_v15 = vmax.f32 %v930_v58, 0.0  ;;  %v1271_v56 = vmax.f32 %v5336_v30, %v1265_v51 }
 0x164   : >> { %v1252_v18 = vmax.f32 %v1092_v2, %v1100_v49  ;;  %v1277_v19 = vpack.c.bf16 %v1270_v11, %v1269_v12  ;;  %v1259_v29 = vrot.slane %v1251_v62, 1 }
 0x165   : >> { %v1257_v23 = vrot.slane %v1249_v14, 1  ;;  %v1250_v24 = vmax.f32 %v1090_v13, %v1098_v15  ;;  %v4384_v25 = vpop.f32.mrb[32].mxu0 }
 0x166   : >> { %v1260_v27 = vrot.slane %v1252_v18, 1  ;;  %v942_v28 = vpop.f32.mrb[33].mxu0  ;;  %4426 = vmatprep.subr.bf16.mxu1 %v1277_v19  ;;  %v951_v60 = vadd.f32 %v4384_v25, %v4917_v6 }
 0x167   : >> { %v1258_v26 = vrot.slane %v1250_v24, 1  ;;  %v4385_v57 = vpop.f32.mrb[34].mxu0  ;;  %4427 = vmatpush3.bf16.msra.mxu1 %v1277_v19  ;;  %v1264_v31 = vsel %vm1149_vm10, %v1256_v33, %v1257_v23  ;;  %v943_v36 = vadd.f32 %v4917_v6, %v942_v28 }
 0x168   : >> { %v1268_v32 = vsel %vm1149_vm10, %v1260_v27, %v1253_v61  ;;  %v945_v35 = vpop.f32.mrb[35].mxu0  ;;  %v1272_v30 = vmax.f32 %v1248_v41, %v1264_v31  ;;  %v1261_v37 = vsel %vm1149_vm10, %v1259_v29, %v1260_v27  ;;  %v954_v55 = vadd.f32 %v4385_v57, %v4917_v6 }
 0x169   : >> { %v1276_v54 = vmax.f32 %v1252_v18, %v1268_v32  ;;  %v1262_v20 = vsel %vm1149_vm10, %v1258_v26, %v1259_v29  ;;  %v1263_v42 = vsel %vm1149_vm10, %v1257_v23, %v1258_v26  ;;  %v1275_v45 = vmax.f32 %v1251_v62, %v1261_v37 }
 0x16a   : >> { %v1274_v38 = vmax.f32 %v1250_v24, %v1262_v20  ;;  %v1278_v40 = vpack.c.bf16 %v1272_v30, %v1271_v56  ;;  %v1273_v44 = vmax.f32 %v1249_v14, %v1263_v42  ;;  %v946_v2 = vadd.f32 %v4917_v6, %v945_v35 }
 0x16b   : >> { %v1280_v41 = vpack.c.bf16 %v1276_v54, %v1275_v45  ;;  %v1103_v9 = vmax.f32 %v951_v60, 0.0  ;;  %v1101_v58 = vmax.f32 %v943_v36, 0.0  ;;  %v1104_v49 = vmax.f32 %v954_v55, 0.0 }
 0x16c   : >> { %4428 = vmatprep.subr.bf16.mxu1 %v1278_v40  ;;  %v1279_v52 = vpack.c.bf16 %v1274_v38, %v1273_v44  ;;  %v1102_v15 = vmax.f32 %v946_v2, 0.0 }
 0x16d   : >> { %v4388_v46 = vpop.f32.mrb[36].mxu0  ;;  %4429 = vmatpush3.bf16.msra.mxu1 %v1278_v40 }
 0x16e   : >> { %v958_v48 = vpop.f32.mrb[37].mxu0  ;;  %4430 = vmatprep.subr.bf16.mxu1 %v1279_v52  ;;  %v967_v43 = vadd.f32 %v4388_v46, %v4917_v6 }
 0x16f   : >> { %v4389_v33 = vpop.f32.mrb[38].mxu0  ;;  %v959_v12 = vadd.f32 %v4917_v6, %v958_v48 }
 0x170   : >> { %v961_v39 = vpop.f32.mrb[39].mxu0  ;;  %v970_v19 = vadd.f32 %v4389_v33, %v4917_v6  ;;  %v1107_v24 = vmax.f32 %v967_v43, 0.0 }
 0x171   : >> { %4431 = vmatpush3.bf16.msra.mxu1 %v1279_v52  ;;  %v1105_v28 = vmax.f32 %v959_v12, 0.0  ;;  %v962_v32 = vadd.f32 %v4917_v6, %v961_v39 }
 0x172   : >> { %4432 = vmatprep.subr.bf16.mxu1 %v1280_v41  ;;  %v1108_v38 = vmax.f32 %v970_v19, 0.0 }
 0x173   : >> { %v1106_v36 = vmax.f32 %v962_v32, 0.0 }
 0x175   : >> { %v4392_v61 = vpop.f32.mrb[40].mxu0  ;;  %4433 = vmatpush3.bf16.msra.mxu1 %v1280_v41 }
 0x176   : >> { %v983_v50 = vadd.f32 %v4392_v61, %v4917_v6  ;;  %v974_v47 = vpop.f32.mrb[41].mxu0 }
 0x177   : >> { %v975_v8 = vadd.f32 %v4917_v6, %v974_v47  ;;  %v4393_v59 = vpop.f32.mrb[42].mxu0 }
 0x178   : >> { %v1111_v51 = vmax.f32 %v983_v50, 0.0  ;;  %v986_v10 = vadd.f32 %v4393_v59, %v4917_v6  ;;  %v977_v53 = vpop.f32.mrb[43].mxu0  ;;  %4435 = vmatmul.mubr.msk.bf16.vlgmr.msra.gmra.mrb[20].mxu1 %vm1170_vm9, %v5108_v22 }
 0x179   : >> { %v1109_v11 = vmax.f32 %v975_v8, 0.0  ;;  %v978_v62 = vadd.f32 %v4917_v6, %v977_v53  ;;  %4446 = vmatprep.mubr.msk.bf16.mxu1 %vm1170_vm9, %v5106_v21 }
 0x17a   : >> { %v1349_v13 = vmax.f32 %v1103_v9, %v1111_v51  ;;  %v1112_v14 = vmax.f32 %v986_v10, 0.0 }
 0x17b   : >> { %v1347_v56 = vmax.f32 %v1101_v58, %v1109_v11  ;;  %v1110_v18 = vmax.f32 %v978_v62, 0.0 }
 0x17c   : >> { %v1350_v23 = vmax.f32 %v1104_v49, %v1112_v14  ;;  %v1357_v29 = vrot.slane %v1349_v13, 1 }
 0x17d   : >> { %v1348_v25 = vmax.f32 %v1102_v15, %v1110_v18  ;;  %v4396_v27 = vpop.f32.mrb[44].mxu0  ;;  %v1355_v35 = vrot.slane %v1347_v56, 1 }
 0x17e   : >> { %v1358_v26 = vrot.slane %v1350_v23, 1  ;;  %v999_v57 = vadd.f32 %v4396_v27, %v4917_v6  ;;  %v990_v31 = vpop.f32.mrb[45].mxu0 }
 0x17f   : >> { %v1356_v30 = vrot.slane %v1348_v25, 1  ;;  %v991_v54 = vadd.f32 %v4917_v6, %v990_v31  ;;  %v4397_v20 = vpop.f32.mrb[46].mxu0 }
 0x180   : >> { %v1115_v40 = vmax.f32 %v999_v57, 0.0  ;;  %v1002_v42 = vadd.f32 %v4397_v20, %v4917_v6  ;;  %v993_v44 = vpop.f32.mrb[47].mxu0  ;;  %v1367_v37 = vsel %vm1149_vm10, %v1357_v29, %v1358_v26 }
 0x181   : >> { %v1368_v45 = vsel %vm1149_vm10, %v1356_v30, %v1357_v29  ;;  %v1113_v46 = vmax.f32 %v991_v54, 0.0  ;;  %v994_v52 = vadd.f32 %v4917_v6, %v993_v44  ;;  %v1369_v48 = vsel %vm1149_vm10, %v1355_v35, %v1356_v30  ;;  %v5502_v6 = vld [vmem:[%s6775_s3 + $0x1c] sm:$0xf] (%p433_p4) }
 0x182   : >> { %v1372_v41 = vmax.f32 %v1348_v25, %v1368_v45  ;;  %v1353_v33 = vmax.f32 %v1107_v24, %v1115_v40  ;;  %v1116_v39 = vmax.f32 %v1002_v42, 0.0  ;;  %v1371_v60 = vmax.f32 %v1347_v56, %v1369_v48  ;;  %6794 = vst [vmem:[#allocation11_spill] sm:$0xff] (%p433_p4), %v5502_v6 }
 0x183   : >> { %v1351_v61 = vmax.f32 %v1105_v28, %v1113_v46  ;;  %v1114_v55 = vmax.f32 %v994_v52, 0.0  ;;  %v1373_v50 = vmax.f32 %v1349_v13, %v1367_v37 }
 0x184   : >> { %v1354_v47 = vmax.f32 %v1108_v38, %v1116_v39  ;;  %v1379_v2 = vpack.c.bf16 %v1372_v41, %v1371_v60  ;;  %v1361_v9 = vrot.slane %v1353_v33, 1 }
 0x185   : >> { %v1359_v8 = vrot.slane %v1351_v61, 1  ;;  %v1352_v59 = vmax.f32 %v1106_v36, %v1114_v55 }
 0x186   : >> { %v1362_v51 = vrot.slane %v1354_v47, 1  ;;  %4438 = vmatprep.subr.bf16.mxu1 %v1379_v2 }
 0x187   : >> { %v1360_v10 = vrot.slane %v1352_v59, 1  ;;  %4439 = vmatpush3.bf16.msra.mxu1 %v1379_v2  ;;  %v1366_v53 = vsel %vm1149_vm10, %v1358_v26, %v1359_v8  ;;  %v5462_v2 = vld [vmem:[%s6776_s4] ss:$0 sm:$0xff] (%p433_p4) }
 0x188   : >> { %v1370_v58 = vsel %vm1149_vm10, %v1362_v51, %v1355_v35  ;;  %v1374_v43 = vmax.f32 %v1350_v23, %v1366_v53  ;;  %v1363_v11 = vsel %vm1149_vm10, %v1361_v9, %v1362_v51  ;;  %v5512_v51 = vld [vmem:[%s6775_s3 + $0x24] sm:$0xf] (%p433_p4)  ;;  %v5522_v53 = vld [vmem:[%s6775_s3 + $0x2c] sm:$0xf] (%p433_p4) }
 0x189   : >> { %v1378_v62 = vmax.f32 %v1354_v47, %v1370_v58  ;;  %v1364_v49 = vsel %vm1149_vm10, %v1360_v10, %v1361_v9  ;;  %v1365_v12 = vsel %vm1149_vm10, %v1359_v8, %v1360_v10  ;;  %v1377_v13 = vmax.f32 %v1353_v33, %v1363_v11  ;;  %v5467_v8 = vld [vmem:[%s6775_s3] sm:$0xf] (%p433_p4)  ;;  %v5477_v9 = vld [vmem:[%s6775_s3 + $0x8] sm:$0xf] (%p433_p4)  ;;  %6796 = vst [vmem:[#allocation13_spill] sm:$0xff] (%p433_p4), %v5512_v51 }
 0x18a   : >> { %v1376_v14 = vmax.f32 %v1352_v59, %v1364_v49  ;;  %v1380_v15 = vpack.c.bf16 %v1374_v43, %v1373_v50  ;;  %v1375_v56 = vmax.f32 %v1351_v61, %v1365_v12  ;;  %6788 = vst [vmem:[#allocation5_spill] sm:$0xff] (%p433_p4), %v5467_v8  ;;  %v5472_v59 = vld [vmem:[%s6775_s3 + $0x4] sm:$0xf] (%p433_p4)  ;;  %6789 = vst [vmem:[#allocation6_spill] sm:$0xff] (%p433_p4), %v5477_v9  ;;  %v5517_v10 = vld [vmem:[%s6775_s3 + $0x28] sm:$0xf] (%p433_p4) }
 0x18b   : >> { %v1382_v18 = vpack.c.bf16 %v1378_v62, %v1377_v13  ;;  %6797 = vst [vmem:[#allocation14_spill] sm:$0xff] (%p433_p4), %v5517_v10  ;;  %v5527_v58 = vld [vmem:[%s6775_s3 + $0x30] sm:$0xf] (%p433_p4)  ;;  %v5532_v43 = vld [vmem:[%s6775_s3 + $0x34] sm:$0xf] (%p433_p4) }
 0x18c   : >> { %4440 = vmatprep.subr.bf16.mxu1 %v1380_v15  ;;  %v1381_v19 = vpack.c.bf16 %v1376_v14, %v1375_v56  ;;  %6798 = vst [vmem:[#allocation15_spill] sm:$0xff] (%p433_p4), %v5532_v43  ;;  %v5537_v11 = vld [vmem:[%s6775_s3 + $0x38] sm:$0xf] (%p433_p4)  ;;  %v5542_v62 = vld [vmem:[%s6775_s3 + $0x3c] sm:$0xf] (%p433_p4) }
 0x18d   : >> { %4441 = vmatpush3.bf16.msra.mxu1 %v1380_v15  ;;  %6799 = vst [vmem:[#allocation16_spill] sm:$0xff] (%p433_p4), %v5537_v11  ;;  %v5547_v49 = vld [vmem:[%s6775_s3 + $0x40] sm:$0xf] (%p433_p4)  ;;  %v5552_v12 = vld [vmem:[%s6775_s3 + $0x44] sm:$0xf] (%p433_p4) }
 0x18e   : >> { %4442 = vmatprep.subr.bf16.mxu1 %v1381_v19  ;;  %6800 = vst [vmem:[#allocation17_spill] sm:$0xff] (%p433_p4), %v5547_v49  ;;  %6801 = vst [vmem:[#allocation18_spill] sm:$0xff] (%p433_p4), %v5552_v12  ;;  %v5557_v13 = vld [vmem:[%s6775_s3 + $0x48] sm:$0xf] (%p433_p4)  ;;  %v5562_v14 = vld [vmem:[%s6775_s3 + $0x4c] sm:$0xf] (%p433_p4) }
 0x18f   : > { %6802 = vst [vmem:[#allocation19_spill] sm:$0xff] (%p433_p4), %v5557_v13  ;;  %6803 = vst [vmem:[#allocation20_spill] sm:$0xff] (%p433_p4), %v5562_v14  ;;  %v5567_v15 = vld [vmem:[%s6775_s3 + $0x50] sm:$0xf] (%p433_p4)  ;;  %v5572_v56 = vld [vmem:[%s6775_s3 + $0x54] sm:$0xf] (%p433_p4) }
 0x190   : > { %6804 = vst [vmem:[#allocation21_spill] sm:$0xff] (%p433_p4), %v5567_v15 }
 0x191   : >> { %4443 = vmatpush3.bf16.msra.mxu1 %v1381_v19  ;;  %v5582_v19 = vld [vmem:[%s6775_s3 + $0x5c] sm:$0xf] (%p433_p4) }
 0x192   : >> { %4444 = vmatprep.subr.bf16.mxu1 %v1382_v18  ;;  %6806 = vst [vmem:[#allocation23_spill] sm:$0xff] (%p433_p4), %v5582_v19 }
 0x195   : >> { %4445 = vmatpush3.bf16.msra.mxu1 %v1382_v18  ;;  %v5577_v18 = vld [vmem:[%s6775_s3 + $0x58] sm:$0xf] (%p433_p4) }
 0x196   : >> { %4450 = vmatprep.subr.bf16.mxu1 %v5324_v16  ;;  %6805 = vst [vmem:[#allocation22_spill] sm:$0xff] (%p433_p4), %v5577_v18 }
 0x198   : >> { %4447 = vmatmul.mubr.msk.bf16.vlgmr.msra.gmra.mrb[24].mxu1 %vm1170_vm9, %v5108_v22 }
 0x199   : >> { %4451 = vmatpush3.bf16.msra.mxu1 %v5324_v16  ;;  %4458 = vmatprep.mubr.msk.bf16.mxu1 %vm1170_vm9, %v5106_v21 }
 0x19a   : >> { %4452 = vmatprep.subr.bf16.mxu1 %v5340_v34 }
 0x19d   : >> { %4453 = vmatpush3.bf16.msra.mxu1 %v5340_v34 }
 0x19e   : >> { %4454 = vmatprep.subr.bf16.mxu1 %v5349_v63 }
 0x1a1   : >> { %4455 = vmatpush3.bf16.msra.mxu1 %v5349_v63 }
 0x1a2   : >> { %4456 = vmatprep.subr.bf16.mxu1 %v5351_v1 }
 0x1a5   : >> { %4457 = vmatpush3.bf16.msra.mxu1 %v5351_v1 }
 0x1a8   : >> { %4459 = vmatmul.mubr.msk.bf16.vlgmr.msra.gmra.mrb[28].mxu1 %vm1170_vm9, %v5108_v22  ;;  %v5507_v22 = vld [vmem:[%s6775_s3 + $0x20] sm:$0xf] (%p433_p4) }
 0x1a9   : > { %6795 = vst [vmem:[#allocation12_spill] sm:$0xff] (%p433_p4), %v5507_v22 }
 0x22b   : >> { %v4424_v23 = vpop.f32.mrb[16].mxu1 }
 0x22c   : >> { %v1211_v16 = vpop.f32.mrb[17].mxu1 }
 0x22d   : >> { %v4425_v24 = vpop.f32.mrb[18].mxu1 }
 0x22e   : >> { %v1227_v25 = vpack.c.bf16 %v4425_v24, %v4424_v23  ;;  %v1214_v27 = vpop.f32.mrb[19].mxu1  ;;  %v5587_v23 = vld [vmem:[%s6775_s3 + $0x60] sm:$0xf] (%p433_p4)  ;;  %v5597_v24 = vld [vmem:[%s6775_s3 + $0x68] sm:$0xf] (%p433_p4) }
 0x22f   : >> { %v1226_v28 = vpack.c.bf16 %v1214_v27, %v1211_v16  ;;  %6807 = vst [vmem:[#allocation24_spill] sm:$0xff] (%p433_p4), %v5587_v23  ;;  %v5592_v16 = vld [vmem:[%s6775_s3 + $0x64] sm:$0xf] (%p433_p4)  ;;  %v5607_v27 = vld [vmem:[%s6775_s3 + $0x70] sm:$0xf] (%p433_p4) }
 0x230   : >> { %v1234_v29 = vrot.slane %v1227_v25, 4  ;;  %6808 = vst [vmem:[#allocation25_spill] sm:$0xff] (%p433_p4), %v5592_v16  ;;  %v5602_v25 = vld [vmem:[%s6775_s3 + $0x6c] sm:$0xf] (%p433_p4) }
 0x231   : >> { %v1233_v34 = vrot.slane %v1226_v28, 4  ;;  %v5612_v28 = vld [vmem:[%s6775_s3 + $0x74] sm:$0xf] (%p433_p4) }
 0x232   : >> { %4037 = vst.msk [vmem:[%s5426_s29 + $0x28] sm:$0xf] %vm280_vm0, %v1234_v29 }
 0x233   : >> { %v1235_v63 = vsel %vm1232_vm11, %v1233_v34, %v1234_v29  ;;  %4035 = vst.msk [vmem:[%s5426_s29 + $0x18] sm:$0xf0] %vm315_vm1, %v1233_v34  ;;  %v5617_v29 = vld [vmem:[%s6775_s3 + $0x78] sm:$0xf] (%p433_p4)  ;;  %v5622_v34 = vld [vmem:[%s6775_s3 + $0x7c] sm:$0xf] (%p433_p4) }
 0x234   : >> { %4036 = vst.msk [vmem:[%s5426_s29 + $0x20] sm:$0xff] %vm351_vm2, %v1235_v63  ;;  %v5627_v63 = vld [vmem:[%s6775_s3 + $0x80] sm:$0xf] (%p433_p4) }
 0x24b   : >> { %v4436_v1 = vpop.f32.mrb[20].mxu1 }
 0x24c   : >> { %v1315_v26 = vpop.f32.mrb[21].mxu1 }
 0x24d   : >> { %v4437_v57 = vpop.f32.mrb[22].mxu1 }
 0x24e   : >> { %v1331_v31 = vpack.c.bf16 %v4437_v57, %v4436_v1  ;;  %v1318_v32 = vpop.f32.mrb[23].mxu1  ;;  %v5632_v1 = vld [vmem:[%s6775_s3 + $0x84] sm:$0xf] (%p433_p4)  ;;  %v5642_v57 = vld [vmem:[%s6775_s3 + $0x8c] sm:$0xf] (%p433_p4) }
 0x24f   : >> { %v1330_v35 = vpack.c.bf16 %v1318_v32, %v1315_v26  ;;  %v5637_v26 = vld [vmem:[%s6775_s3 + $0x88] sm:$0xf] (%p433_p4) }
 0x250   : >> { %v1336_v30 = vrot.slane %v1331_v31, 4 }
 0x251   : >> { %v1335_v54 = vrot.slane %v1330_v35, 4 }
 0x252   : >> { %4044 = vst.msk [vmem:[%s5426_s29 + $0x40] sm:$0xf] %vm280_vm0, %v1336_v30 }
 0x253   : >> { %v1337_v20 = vsel %vm1232_vm11, %v1335_v54, %v1336_v30  ;;  %4042 = vst.msk [vmem:[%s5426_s29 + $0x30] sm:$0xf0] %vm315_vm1, %v1335_v54 }
 0x254   : >> { %4043 = vst.msk [vmem:[%s5426_s29 + $0x38] sm:$0xff] %vm351_vm2, %v1337_v20 }
 0x26b   : >> { %v4448_v38 = vpop.f32.mrb[24].mxu1 }
 0x26c   : >> { %v1417_v40 = vpop.f32.mrb[25].mxu1 }
 0x26d   : >> { %v4449_v42 = vpop.f32.mrb[26].mxu1 }
 0x26e   : >> { %v1433_v44 = vpack.c.bf16 %v4449_v42, %v4448_v38  ;;  %v1420_v37 = vpop.f32.mrb[27].mxu1 }
 0x26f   : >> { %v1432_v45 = vpack.c.bf16 %v1420_v37, %v1417_v40 }
 0x270   : >> { %v1438_v46 = vrot.slane %v1433_v44, 4 }
 0x271   : >> { %v1437_v52 = vrot.slane %v1432_v45, 4 }
 0x272   : >> { %4051 = vst.msk [vmem:[%s5426_s29 + $0x58] sm:$0xf] %vm280_vm0, %v1438_v46 }
 0x273   : >> { %v1439_v48 = vsel %vm1232_vm11, %v1437_v52, %v1438_v46  ;;  %4049 = vst.msk [vmem:[%s5426_s29 + $0x48] sm:$0xf0] %vm315_vm1, %v1437_v52 }
 0x274   : >> { %4050 = vst.msk [vmem:[%s5426_s29 + $0x50] sm:$0xff] %vm351_vm2, %v1439_v48 }
 0x27b   : >> { %v4460_v41 = vpop.f32.mrb[28].mxu1 }
 0x27c   : >> { %v1519_v33 = vpop.f32.mrb[29].mxu1 }
 0x27d   : >> { %v4461_v39 = vpop.f32.mrb[30].mxu1 }
 0x27e   : >> { %v1535_v60 = vpack.c.bf16 %v4461_v39, %v4460_v41  ;;  %v1522_v36 = vpop.f32.mrb[31].mxu1  ;;  %435 = sbr.rel (!%p433_p4) target bundleno = 72 (0x48), region = 122 }
 0x27f   : >> { %v1534_v61 = vpack.c.bf16 %v1522_v36, %v1519_v33 }
 0x280   : >> { %v1540_v55 = vrot.slane %v1535_v60, 4 }
 0x281   : >> { %v1539_v50 = vrot.slane %v1534_v61, 4 }
 0x282   : >> { %4058 = vst.msk [vmem:[%s5426_s29 + $0x70] sm:$0xf] %vm280_vm0, %v1540_v55 }
 0x283   : >> { %v1541_v47 = vsel %vm1232_vm11, %v1539_v50, %v1540_v55  ;;  %4056 = vst.msk [vmem:[%s5426_s29 + $0x60] sm:$0xf0] %vm315_vm1, %v1539_v50 }
 0x284   : >> { %4057 = vst.msk [vmem:[%s5426_s29 + $0x68] sm:$0xff] %vm351_vm2, %v1541_v47 }
 0x285 LB: >> { %v6809_v8 = vld [vmem:[#allocation5_spill] sm:$0xff]  ;;  %v6810_v0 = vld [vmem:[#allocation7_spill] sm:$0xff]  ;;  %v6811_v9 = vld [vmem:[#allocation6_spill] sm:$0xff]  ;;  %s4223_s19 = smul.u32 96, %s4746_s18  ;;  %vm1669_vm12 = vcmask 1046528   ;;  %s4754_s22 = smov 64   ;;  %s4746_s18 = sphi %s5644_s18, %s1593_s18  }
 0x286   : >> { %v5651_v31 = vcombine.low %v6809_v8, %v5472_v59  ;;  %v5655_v32 = vcombine.low %v6811_v9, %v6810_v0  ;;  %v6812_v43 = vld [vmem:[#allocation15_spill] sm:$0xff]  ;;  %v6813_v4 = vld [vmem:[#allocation9_spill] sm:$0xff]  ;;  %v6814_v3 = vld [vmem:[#allocation8_spill] sm:$0xff]  ;;  %vm1636_vm13 = vsmask.f32 7424  ;;  %s4755_s23 = smov 32  }
 0x287   : >> { %v4087_v35 = vcombine.low %v5527_v58, %v6812_v43  ;;  %v5665_v30 = vcombine.low %v6814_v3, %v6813_v4  ;;  %s5667_s20 = scalar_lea.vmem [#allocation2], %s4223_s19  ;;  %v6815_v6 = vld [vmem:[#allocation11_spill] sm:$0xff]  ;;  %v6816_v5 = vld [vmem:[#allocation10_spill] sm:$0xff]  ;;  %v6817_v11 = vld [vmem:[#allocation16_spill] sm:$0xff]  ;;  %vm1969_vm14 = vsmask.f32 4352 }
 0x288   : >> { %4490 = vmatprep.subr.bf16.mxu0 %v5651_v31  ;;  %v5680_v40 = vcombine.low %v6816_v5, %v6815_v6  ;;  %v4088_v42 = vcombine.low %v6817_v11, %v5542_v62  ;;  %v6818_v51 = vld [vmem:[#allocation13_spill] sm:$0xff]  ;;  %v6819_v22 = vld [vmem:[#allocation12_spill] sm:$0xff]  ;;  %v6820_v12 = vld [vmem:[#allocation18_spill] sm:$0xff]  ;;  %vm2121_vm15 = vcmask 785408   ;;  %vm4757_vm0 = vmmov 0   ;;  %s4224_s25 = sshll.u32 %s4746_s18, 5 }
 0x289   : >> { %4491 = vmatpush3.bf16.msra.mxu0 %v5651_v31  ;;  %4462 = vmatprep.subr.bf16.mxu1 %v4087_v35  ;;  %v6821_v49 = vld [vmem:[#allocation17_spill] sm:$0xff]  ;;  %v6822_v10 = vld [vmem:[#allocation14_spill] sm:$0xff]  ;;  %v6823_v14 = vld [vmem:[#allocation20_spill] sm:$0xff]  ;;  %s3878_s26 = scalar_lea.vmem [#allocation3], %s4224_s25  ;;  %s1593_s18 = sadd.s32 1, %s4746_s18  }
 0x28a   : >> { %4492 = vmatprep.subr.bf16.mxu0 %v5655_v32  ;;  %4463 = vmatpush3.bf16.msra.mxu1 %v4087_v35  ;;  %v4089_v11 = vcombine.low %v6821_v49, %v6820_v12  ;;  %v6824_v13 = vld [vmem:[#allocation19_spill] sm:$0xff]  ;;  %v6825_v16 = vld [vmem:[#allocation25_spill] sm:$0xff]  ;;  %v6826_v23 = vld [vmem:[#allocation24_spill] sm:$0xff]  ;;  %p1590_p5 = scmp.ge.s32.totalorder %s1593_s18, 8  }
 0x28b   : >> { %v5670_v54 = vld [vmem:[%s5667_s20 + $0x10] sm:$0xff]  ;;  %v5673_v20 = vld [vmem:[%s5667_s20 + $0x8] sm:$0xff]  ;;  %v5676_v38 = vld [vmem:[%s5667_s20] sm:$0xff]  ;;  %4464 = vmatprep.subr.bf16.mxu1 %v4088_v42  ;;  %v4090_v12 = vcombine.low %v6824_v13, %v6823_v14 }
 0x28c   : >> { %v1673_v44 = vrot.slane %v5670_v54, 1  ;;  %v1671_v37 = vrot.slane %v5673_v20, 1  ;;  %v1670_v45 = vrot.slane %v5676_v38, 1  ;;  %v1638_v46 = vshrl.u32 %v5676_v38, 16  ;;  %v5689_v52 = vld [vmem:[%s5667_s20 + $0x20] sm:$0xff]  ;;  %v5696_v60 = vld [vmem:[%s5667_s20 + $0x28] sm:$0xff] }
 0x28d   : >> { %v1640_v48 = vshll.u32 %v5676_v38, 16  ;;  %v1645_v41 = vshll.u32 %v5673_v20, 16  ;;  %v1653_v33 = vshll.u32 %v5670_v54, 16  ;;  %v1657_v39 = vshrl.u32 %v5670_v54, 16  ;;  %v5699_v36 = vld [vmem:[%s5667_s20 + $0x18] sm:$0xff]  ;;  %4493 = vmatpush3.bf16.msra.mxu0 %v5655_v32  ;;  %v6828_v19 = vld [vmem:[#allocation23_spill] sm:$0xff] }
 0x28e   : >> { %1679 = vrot.lane.b32.xlu1 %v1673_v44, %s4754_s22  ;;  %v1674_v61 = vsel %vm1669_vm12, %v1671_v37, %v1673_v44  ;;  %v1672_v55 = vsel %vm1669_vm12, %v1670_v45, %v1671_v37  ;;  %v1649_v50 = vshrl.u32 %v5673_v20, 16  ;;  %v1702_v47 = vshll.u32 %v5689_v52, 16  ;;  %4494 = vmatprep.subr.bf16.mxu0 %v5665_v30  ;;  %v6827_v15 = vld [vmem:[#allocation21_spill] sm:$0xff]  ;;  %v6829_v18 = vld [vmem:[#allocation22_spill] sm:$0xff]  ;;  %v6080_v59 = vld [vmem:[%s6777_s5 + $0x14] sm:$0xf] (%p1590_p5) }
 0x28f   : >> { %1677 = vrot.lane.b32.xlu0 %v1674_v61, %s4754_s22  ;;  %v1642_v35 = vrot.slane %v1640_v48, 1  ;;  %v1647_v0 = vrot.slane %v1645_v41, 1  ;;  %v1655_v3 = vrot.slane %v1653_v33, 1  ;;  %v1706_v4 = vshrl.u32 %v5689_v52, 16  ;;  %4465 = vmatpush3.bf16.msra.mxu1 %v4088_v42  ;;  %6837 = vst [vmem:[#allocation33_spill] sm:$0xff] (%p1590_p5), %v6080_v59 }
 0x290   : >> { %v1704_v5 = vrot.slane %v1702_v47, 1  ;;  %v1710_v44 = vshll.u32 %v5696_v60, 16  ;;  %v1697_v37 = vshll.u32 %v5699_v36, 16  ;;  %v1695_v8 = vshrl.u32 %v5699_v36, 16  ;;  %4466 = vmatprep.subr.bf16.mxu1 %v4089_v11  ;;  %v6090_v58 = vld [vmem:[%s6777_s5 + $0x1c] sm:$0xf] (%p1590_p5) }
 0x291   : >> { %v1643_v45 = vor.u32 %v1642_v35, %v1638_v46  ;;  %v1651_v6 = vor.u32 %v1649_v50, %v1647_v0  ;;  %4495 = vmatpush3.bf16.msra.mxu0 %v5665_v30  ;;  %v1659_v48 = vor.u32 %v1657_v39, %v1655_v3  ;;  %v5719_v46 = vld [vmem:[%s5667_s20 + $0x38] sm:$0xff]  ;;  %v5725_v39 = vld [vmem:[%s5667_s20 + $0x30] sm:$0xff]  ;;  %6839 = vst [vmem:[#allocation35_spill] sm:$0xff] (%p1590_p5), %v6090_v58  ;;  %v6095_v62 = vld [vmem:[%s6777_s5 + $0x20] sm:$0xf] (%p1590_p5) }
 0x292   : >> { %1675 = vrot.lane.b32.xlu1 %v1672_v55, %s4754_s22  ;;  %v1699_v41 = vrot.slane %v1697_v37, 1  ;;  %4496 = vmatprep.subr.bf16.mxu0 %v5680_v40  ;;  %v1708_v33 = vor.u32 %v1706_v4, %v1704_v5  ;;  %v1712_v61 = vrot.slane %v1710_v44, 1  ;;  %v1727_v4 = vrot.slane %v5689_v52, 1  ;;  %v6365_v7 = vld [vmem:[%s6777_s5 + $0xf8] sm:$0xf] (%p1590_p5) }
 0x293   : >> { %v1648_v42 = vsel %vm1636_vm13, %v1643_v45, %v1647_v0  ;;  %v1656_v50 = vsel %vm1636_vm13, %v1651_v6, %v1655_v3  ;;  %v1726_v0 = vrot.slane %v5699_v36, 1  ;;  %v1757_v35 = vshll.u32 %v5719_v46, 16  ;;  %v5734_v3 = vld [vmem:[%s5667_s20 + $0x40] sm:$0xff]  ;;  %4467 = vmatpush3.bf16.msra.mxu1 %v4089_v11  ;;  %6876 = vst [vmem:[#allocation72_spill] sm:$0xff] (%p1590_p5), %v6365_v7  ;;  %v6390_v7 = vld [vmem:[%s6777_s5 + $0x10c] sm:$0xf] (%p1590_p5) }
 0x294   : >> { %1660 = vrot.lane.b32.xlu0 %v1648_v42, %s4755_s23  ;;  %v1700_v47 = vor.u32 %v1699_v41, %v1695_v8  ;;  %v1713_v55 = vsel %vm1636_vm13, %v1708_v33, %v1712_v61  ;;  %v1714_v44 = vshrl.u32 %v5696_v60, 16  ;;  %v1752_v6 = vshll.u32 %v5725_v39, 16  ;;  %4468 = vmatprep.subr.bf16.mxu1 %v4090_v12  ;;  %v5802_v11 = vld [vmem:[%s5667_s20 + $0x60] sm:$0xff]  ;;  %6881 = vst [vmem:[#allocation77_spill] sm:$0xff] (%p1590_p5), %v6390_v7 }
 0x295   : >> { %4497 = vmatpush3.bf16.msra.mxu0 %v5680_v40  ;;  %v1728_v37 = vsel %vm1669_vm12, %v1726_v0, %v1727_v4  ;;  %v1759_v45 = vrot.slane %v1757_v35, 1  ;;  %v1765_v41 = vshll.u32 %v5734_v3, 16  ;;  %v1729_v33 = vrot.slane %v5696_v60, 1  ;;  %v5748_v0 = vld [vmem:[%s5667_s20 + $0x50] sm:$0xff] }
 0x296   : >> { %1664 = vrot.lane.b32.xlu1 %v1659_v48, %s4755_s23  ;;  %v1705_v8 = vsel %vm1636_vm13, %v1700_v47, %v1704_v5  ;;  %v1761_v48 = vshrl.u32 %v5719_v46, 16  ;;  %v1716_v42 = vor.u32 %v1714_v44, %v1712_v61  ;;  %v1750_v5 = vshrl.u32 %v5725_v39, 16 }
 0x297   : >> { %v1730_v35 = vsel %vm1669_vm12, %v1727_v4, %v1729_v33  ;;  %v1781_v61 = vrot.slane %v5725_v39, 1  ;;  %v1782_v44 = vrot.slane %v5719_v46, 1  ;;  %v1837_v13 = vrot.slane %v5748_v0, 1  ;;  %4469 = vmatpush3.bf16.msra.mxu1 %v4090_v12 }
 0x298   : >> { %1662 = vrot.lane.b32.xlu0 %v1656_v50, %s4755_s23  ;;  %v1754_v50 = vrot.slane %v1752_v6, 1  ;;  %v1763_v47 = vor.u32 %v1761_v48, %v1759_v45  ;;  %v1769_v48 = vshrl.u32 %v5734_v3, 16 }
 0x29a   : >> { %1719 = vrot.lane.b32.xlu1 %v1713_v55, %s4755_s23  ;;  %v1767_v55 = vrot.slane %v1765_v41, 1  ;;  %v1755_v9 = vor.u32 %v1754_v50, %v1750_v5  ;;  %v5762_v41 = vld [vmem:[%s5667_s20 + $0x58] sm:$0xff]  ;;  %v1816_v5 = vshrl.u32 %v5748_v0, 16 }
 0x29c   : >> { %1717 = vrot.lane.b32.xlu0 %v1705_v8, %s4755_s23  ;;  %v5755_v8 = vld [vmem:[%s5667_s20 + $0x48] sm:$0xff]  ;;  %v1768_v6 = vsel %vm1636_vm13, %v1763_v47, %v1767_v55  ;;  %v1760_v4 = vsel %vm1636_vm13, %v1755_v9, %v1759_v45  ;;  %v1820_v47 = vshll.u32 %v5762_v41, 16  ;;  %v1771_v9 = vor.u32 %v1769_v48, %v1767_v55 }
 0x29d   : >> { %v5779_v45 = vcombine.low %v6822_v10, %v5522_v53  ;;  %v6085_v53 = vld [vmem:[%s6777_s5 + $0x18] sm:$0xf] (%p1590_p5) }
 0x29e   : >> { %1731 = vrot.lane.b32.xlu1 %v1728_v37, %s4754_s22  ;;  %v1812_v37 = vshll.u32 %v5748_v0, 16  ;;  %v1822_v48 = vrot.slane %v1820_v47, 1  ;;  %6838 = vst [vmem:[#allocation34_spill] sm:$0xff] (%p1590_p5), %v6085_v53 }
 0x2a0   : >> { %1721 = vrot.lane.b32.xlu0 %v1716_v42, %s4755_s23  ;;  %v1807_v42 = vshll.u32 %v5755_v8, 16  ;;  %v1814_v50 = vrot.slane %v1812_v37, 1 }
 0x2a2   : >> { %1735 = vrot.lane.b32.xlu1 %v1729_v33, %s4754_s22  ;;  %v1783_v33 = vsel %vm1669_vm12, %v1781_v61, %v1782_v44  ;;  %v1784_v61 = vrot.slane %v5734_v3, 1  ;;  %v1809_v37 = vrot.slane %v1807_v42, 1  ;;  %v1818_v55 = vor.u32 %v1816_v5, %v1814_v50  ;;  %v5795_v42 = vld [vmem:[%s5667_s20 + $0x68] sm:$0xff] }
 0x2a3   : >> { %v1867_v14 = vshll.u32 %v5795_v42, 16 }
 0x2a4   : >> { %1733 = vrot.lane.b32.xlu0 %v1730_v35, %s4754_s22  ;;  %v5772_v35 = vcombine.low %v6819_v22, %v6818_v51  ;;  %v1785_v10 = vsel %vm1669_vm12, %v1782_v44, %v1784_v61  ;;  %v1823_v47 = vsel %vm1636_vm13, %v1818_v55, %v1822_v48  ;;  %v1824_v44 = vshrl.u32 %v5762_v41, 16 }
 0x2a5   : >> { %v1862_v55 = vshll.u32 %v5802_v11, 16 }
 0x2a6   : >> { %1774 = vrot.lane.b32.xlu1 %v1768_v6, %s4755_s23  ;;  %v1805_v6 = vshrl.u32 %v5755_v8, 16  ;;  %4498 = vmatprep.subr.bf16.mxu0 %v5772_v35  ;;  %v1826_v22 = vor.u32 %v1824_v44, %v1822_v48  ;;  %v5835_v44 = vld [vmem:[%s5667_s20 + $0x78] sm:$0xff] }
 0x2a7   : >> { %4499 = vmatpush3.bf16.msra.mxu0 %v5772_v35 }
 0x2a8   : >> { %1772 = vrot.lane.b32.xlu0 %v1760_v4, %s4755_s23  ;;  %4500 = vmatprep.subr.bf16.mxu0 %v5779_v45  ;;  %v5791_v4 = vcombine.low %v6826_v23, %v6825_v16  ;;  %v1810_v5 = vor.u32 %v1809_v37, %v1805_v6  ;;  %v4092_v6 = vcombine.low %v6829_v18, %v6828_v19  ;;  %v1864_v18 = vrot.slane %v1862_v55, 1 }
 0x2a9   : >> { %v1891_v55 = vrot.slane %v5802_v11, 1  ;;  %v1915_v23 = vshrl.u32 %v5835_v44, 16 }
 0x2aa   : >> { %1786 = vrot.lane.b32.xlu1 %v1783_v33, %s4754_s22  ;;  %v4091_v33 = vcombine.low %v6827_v15, %v5572_v56  ;;  %v1815_v37 = vsel %vm1636_vm13, %v1810_v5, %v1814_v50  ;;  %v1869_v15 = vrot.slane %v1867_v14, 1  ;;  %v1839_v50 = vrot.slane %v5762_v41, 1  ;;  %v6100_v56 = vld [vmem:[%s6777_s5 + $0x24] sm:$0xf] (%p1590_p5) }
 0x2ab   : >> { %4501 = vmatpush3.bf16.msra.mxu0 %v5779_v45  ;;  %v1860_v5 = vshrl.u32 %v5802_v11, 16  ;;  %6840 = vst [vmem:[#allocation36_spill] sm:$0xff] (%p1590_p5), %v6100_v56 }
 0x2ac   : >> { %1776 = vrot.lane.b32.xlu0 %v1771_v9, %s4755_s23  ;;  %v1836_v9 = vrot.slane %v5755_v8, 1  ;;  %4518 = vmatprep.subr.bf16.mxu0 %v5791_v4  ;;  %v1840_v48 = vsel %vm1669_vm12, %v1837_v13, %v1839_v50 }
 0x2ad   : >> { %4470 = vmatprep.subr.bf16.mxu1 %v4091_v33 }
 0x2ae   : >> { %1790 = vrot.lane.b32.xlu1 %v1784_v61, %s4754_s22  ;;  %v5813_v61 = vld [vmem:[%s5667_s20 + $0x70] sm:$0xff]  ;;  %v1838_v12 = vsel %vm1669_vm12, %v1836_v9, %v1837_v13  ;;  %4471 = vmatpush3.bf16.msra.mxu1 %v4091_v33  ;;  %v5829_v9 = vld [vmem:[%s5667_s20 + $0x80] sm:$0xff]  ;;  %v1865_v33 = vor.u32 %v1864_v18, %v1860_v5  ;;  %v1917_v18 = vshll.u32 %v5835_v44, 16 }
 0x2af   : >> { %v1875_v16 = vshll.u32 %v5813_v61, 16  ;;  %4472 = vmatprep.subr.bf16.mxu1 %v4092_v6  ;;  %v1926_v5 = vshrl.u32 %v5829_v9, 16  ;;  %v1894_v19 = vrot.slane %v5813_v61, 1 }
 0x2b0   : >> { %1788 = vrot.lane.b32.xlu0 %v1785_v10, %s4754_s22  ;;  %v1871_v10 = vshrl.u32 %v5795_v42, 16  ;;  %v1870_v13 = vsel %vm1636_vm13, %v1865_v33, %v1869_v15  ;;  %v1919_v43 = vrot.slane %v1917_v18, 1 }
 0x2b1   : >> { %v1877_v14 = vrot.slane %v1875_v16, 1  ;;  %v1892_v16 = vrot.slane %v5795_v42, 1 }
 0x2b2   : >> { %1829 = vrot.lane.b32.xlu1 %v1823_v47, %s4755_s23  ;;  %v1873_v47 = vor.u32 %v1871_v10, %v1869_v15  ;;  %4473 = vmatpush3.bf16.msra.mxu1 %v4092_v6  ;;  %v1922_v6 = vshll.u32 %v5829_v9, 16 }
 0x2b3   : >> { %4578 = vmatprep.subr.bf16.mxu1 %v5651_v31  ;;  %v1893_v10 = vsel %vm1669_vm12, %v1891_v55, %v1892_v16  ;;  %v1920_v55 = vor.u32 %v1919_v43, %v1915_v23 }
 0x2b4   : >> { %1827 = vrot.lane.b32.xlu0 %v1815_v37, %s4755_s23  ;;  %v1878_v37 = vsel %vm1636_vm13, %v1873_v47, %v1877_v14 }
 0x2b6   : >> { %1841 = vrot.lane.b32.xlu1 %v1838_v12, %s4754_s22  ;;  %v5844_v12 = vld [vmem:[%s5667_s20 + $0x88] sm:$0xff] }
 0x2b7   : >> { %v1930_v47 = vshll.u32 %v5844_v12, 16 }
 0x2b8   : >> { %1831 = vrot.lane.b32.xlu0 %v1826_v22, %s4755_s23  ;;  %v1879_v22 = vshrl.u32 %v5813_v61, 16 }
 0x2b9   : >> { %v1932_v33 = vrot.slane %v1930_v47, 1 }
 0x2ba   : >> { %1845 = vrot.lane.b32.xlu1 %v1839_v50, %s4754_s22  ;;  %v1924_v50 = vrot.slane %v1922_v6, 1 }
 0x2bc   : >> { %1843 = vrot.lane.b32.xlu0 %v1840_v48, %s4754_s22  ;;  %v1881_v48 = vor.u32 %v1879_v22, %v1877_v14  ;;  %v1928_v15 = vor.u32 %v1926_v5, %v1924_v50  ;;  %v1946_v14 = vrot.slane %v5835_v44, 1  ;;  %v1947_v22 = vrot.slane %v5829_v9, 1 }
 0x2bd   : >> { %v1925_v18 = vsel %vm1636_vm13, %v1920_v55, %v1924_v50 }
 0x2be   : >> { %1884 = vrot.lane.b32.xlu1 %v1878_v37, %s4755_s23  ;;  %v1895_v37 = vsel %vm1669_vm12, %v1892_v16, %v1894_v19  ;;  %v1933_v6 = vsel %vm1636_vm13, %v1928_v15, %v1932_v33 }
 0x2c0   : >> { %1882 = vrot.lane.b32.xlu0 %v1870_v13, %s4755_s23  ;;  %v1934_v13 = vshrl.u32 %v5844_v12, 16 }
 0x2c2   : >> { %1896 = vrot.lane.b32.xlu1 %v1893_v10, %s4754_s22  ;;  %v1948_v10 = vsel %vm1669_vm12, %v1946_v14, %v1947_v22  ;;  %v1936_v43 = vor.u32 %v1934_v13, %v1932_v33 }
 0x2c4   : >> { %1886 = vrot.lane.b32.xlu0 %v1881_v48, %s4755_s23 }
 0x2c6   : >> { %1900 = vrot.lane.b32.xlu1 %v1894_v19, %s4754_s22  ;;  %v1949_v19 = vrot.slane %v5844_v12, 1 }
 0x2c8   : >> { %1898 = vrot.lane.b32.xlu0 %v1895_v37, %s4754_s22  ;;  %v1950_v23 = vsel %vm1669_vm12, %v1947_v22, %v1949_v19 }
 0x2ca   : >> { %1939 = vrot.lane.b32.xlu1 %v1933_v6, %s4755_s23 }
 0x2cc   : >> { %1937 = vrot.lane.b32.xlu0 %v1925_v18, %s4755_s23 }
 0x2ce   : >> { %1951 = vrot.lane.b32.xlu1 %v1948_v10, %s4754_s22 }
 0x2d0   : >> { %1941 = vrot.lane.b32.xlu0 %v1936_v43, %s4755_s23 }
 0x2d2   : >> { %1955 = vrot.lane.b32.xlu1 %v1949_v19, %s4754_s22 }
 0x2d4   : >> { %1953 = vrot.lane.b32.xlu0 %v1950_v23, %s4754_s22 }
 0x300   : >> { %v1680_v16 = vpop.permute.xlu1 %1679 }
 0x301   : >> { %v1678_v50 = vpop.permute.xlu0 %1677 }
 0x304   : >> { %v1676_v5 = vpop.permute.xlu1 %1675 }
 0x306   : >> { %v1661_v47 = vpop.permute.xlu0 %1660 }
 0x307   : >> { %v1682_v48 = vsel %vm351_vm2, %v5676_v38, %v1661_v47 }
 0x308   : >> { %v1689_v15 = vsel %vm1170_vm9, %v1682_v48, %v1676_v5  ;;  %v1665_v33 = vpop.permute.xlu1 %1664 }
 0x309   : >> { %v1686_v37 = vsel %vm351_vm2, %v5670_v54, %v1665_v33  ;;  %v1970_v55 = vshrl.u32 %v1689_v15, 16  ;;  %v1973_v6 = vshll.u32 %v1689_v15, 16 }
 0x30a   : >> { %v1693_v14 = vsel %vm1170_vm9, %v1686_v37, %v1680_v16  ;;  %v1663_v22 = vpop.permute.xlu0 %1662 }
 0x30b   : >> { %v1985_v13 = vshrl.u32 %v1693_v14, 16  ;;  %v1988_v18 = vshll.u32 %v1693_v14, 16  ;;  %v1684_v10 = vsel %vm351_vm2, %v5673_v20, %v1663_v22  ;;  %v1972_v5 = vrot.slane %v1970_v55, 3 }
 0x30c   : >> { %v1720_v43 = vpop.permute.xlu1 %1719  ;;  %v1691_v38 = vsel %vm1170_vm9, %v1684_v10, %v1678_v50  ;;  %v1975_v47 = vrot.slane %v1973_v6, 4 }
 0x30d   : >> { %v1987_v19 = vrot.slane %v1985_v13, 3  ;;  %v1990_v23 = vrot.slane %v1988_v18, 4  ;;  %v1977_v48 = vshrl.u32 %v1691_v38, 16  ;;  %v1980_v49 = vshll.u32 %v1691_v38, 16 }
 0x30e   : >> { %v1718_v54 = vpop.permute.xlu0 %1717  ;;  %v1976_v22 = vor.u32 %v1975_v47, %v1972_v5 }
 0x30f   : >> { %v1991_v33 = vor.u32 %v1990_v23, %v1987_v19  ;;  %v1979_v15 = vrot.slane %v1977_v48, 3  ;;  %v1982_v51 = vrot.slane %v1980_v49, 4  ;;  %v1738_v16 = vsel %vm351_vm2, %v5699_v36, %v1718_v54 }
 0x310   : >> { %v1732_v37 = vpop.permute.xlu1 %1731  ;;  %v4116_v36 = vcombine.low %v5597_v24, %v5602_v25  ;;  %v4117_v54 = vcombine.low %v5607_v27, %v5612_v28  ;;  %v6105_v24 = vld [vmem:[%s6777_s5 + $0x28] sm:$0xf] (%p1590_p5)  ;;  %v6110_v25 = vld [vmem:[%s6777_s5 + $0x2c] sm:$0xf] (%p1590_p5)  ;;  %v6115_v27 = vld [vmem:[%s6777_s5 + $0x30] sm:$0xf] (%p1590_p5) }
 0x311   : >> { %v1744_v14 = vsel %vm1170_vm9, %v1738_v16, %v1732_v37  ;;  %v1983_v13 = vor.u32 %v1982_v51, %v1979_v15  ;;  %v1740_v51 = vsel %vm351_vm2, %v5689_v52, %v1720_v43  ;;  %6841 = vst [vmem:[#allocation37_spill] sm:$0xff] (%p1590_p5), %v6105_v24  ;;  %6842 = vst [vmem:[#allocation38_spill] sm:$0xff] (%p1590_p5), %v6110_v25  ;;  %v6120_v28 = vld [vmem:[%s6777_s5 + $0x34] sm:$0xf] (%p1590_p5) }
 0x312   : >> { %v1722_v20 = vpop.permute.xlu0 %1721  ;;  %v1993_v50 = vshrl.u32 %v1744_v14, 16  ;;  %v1996_v55 = vshll.u32 %v1744_v14, 16 }
 0x313   : >> { %v1742_v6 = vsel %vm351_vm2, %v5696_v60, %v1722_v20  ;;  %v1984_v18 = vsel %vm1969_vm14, %v1976_v22, %v1983_v13  ;;  %v1992_v49 = vsel %vm1969_vm14, %v1983_v13, %v1991_v33 }
 0x314   : >> { %v1736_v10 = vpop.permute.xlu1 %1735  ;;  %4502 = vmatprep.mubr.msk.bf16.mxu0 %vm2121_vm15, %v1984_v18  ;;  %v1995_v5 = vrot.slane %v1993_v50, 3  ;;  %v1998_v47 = vrot.slane %v1996_v55, 4 }
 0x315   : >> { %v1748_v19 = vsel %vm1170_vm9, %v1742_v6, %v1736_v10  ;;  %4503 = vmatmul.mubr.msk.bf16.vlgmr.msra.gmra.mrb[0].mxu0 %vm2121_vm15, %v1992_v49 }
 0x316   : >> { %v2008_v23 = vshrl.u32 %v1748_v19, 16  ;;  %v2011_v38 = vshll.u32 %v1748_v19, 16  ;;  %v1734_v60 = vpop.permute.xlu0 %1733  ;;  %4519 = vmatpush3.bf16.msra.mxu0 %v5791_v4  ;;  %v1999_v13 = vor.u32 %v1998_v47, %v1995_v5  ;;  %v4118_v19 = vcombine.low %v5617_v29, %v5622_v34  ;;  %v6125_v29 = vld [vmem:[%s6777_s5 + $0x38] sm:$0xf] (%p1590_p5)  ;;  %v6130_v34 = vld [vmem:[%s6777_s5 + $0x3c] sm:$0xf] (%p1590_p5) }
 0x317   : >> { %v1746_v48 = vsel %vm1170_vm9, %v1740_v51, %v1734_v60  ;;  %4520 = vmatprep.subr.bf16.mxu0 %v4116_v36 }
 0x318   : >> { %v2010_v33 = vrot.slane %v2008_v23, 3  ;;  %v2013_v15 = vrot.slane %v2011_v38, 4  ;;  %v2000_v16 = vshrl.u32 %v1746_v48, 16  ;;  %v2003_v37 = vshll.u32 %v1746_v48, 16  ;;  %v1775_v14 = vpop.permute.xlu1 %1774 }
 0x319   : >> { %v1795_v60 = vsel %vm351_vm2, %v5719_v46, %v1775_v14 }
 0x31a   : >> { %v2014_v52 = vor.u32 %v2013_v15, %v2010_v33  ;;  %v2002_v43 = vrot.slane %v2000_v16, 3  ;;  %v2005_v20 = vrot.slane %v2003_v37, 4  ;;  %v1773_v22 = vpop.permute.xlu0 %1772  ;;  %4521 = vmatpush3.bf16.msra.mxu0 %v4116_v36 }
 0x31b   : >> { %v1793_v55 = vsel %vm351_vm2, %v5725_v39, %v1773_v22  ;;  %4522 = vmatprep.subr.bf16.mxu0 %v4117_v54 }
 0x31c   : >> { %v2006_v50 = vor.u32 %v2005_v20, %v2002_v43  ;;  %v1787_v4 = vpop.permute.xlu1 %1786 }
 0x31d   : >> { %v1799_v6 = vsel %vm1170_vm9, %v1793_v55, %v1787_v4 }
 0x31e   : >> { %v1777_v18 = vpop.permute.xlu0 %1776  ;;  %v2007_v10 = vsel %vm1969_vm14, %v1999_v13, %v2006_v50  ;;  %v2015_v49 = vsel %vm1969_vm14, %v2006_v50, %v2014_v52  ;;  %v2016_v51 = vshrl.u32 %v1799_v6, 16  ;;  %v2019_v23 = vshll.u32 %v1799_v6, 16  ;;  %4523 = vmatpush3.bf16.msra.mxu0 %v4117_v54 }
 0x31f   : >> { %4474 = vmatprep.mubr.msk.bf16.mxu1 %vm2121_vm15, %v2007_v10  ;;  %4506 = vmatprep.mubr.msk.bf16.mxu0 %vm2121_vm15, %v2007_v10  ;;  %v1797_v39 = vsel %vm351_vm2, %v5734_v3, %v1777_v18  ;;  %v4119_v3 = vcombine.low %v5627_v63, %v5632_v1  ;;  %v4120_v13 = vcombine.low %v5637_v26, %v5642_v57  ;;  %v6135_v63 = vld [vmem:[%s6777_s5 + $0x40] sm:$0xf] (%p1590_p5)  ;;  %v6140_v1 = vld [vmem:[%s6777_s5 + $0x44] sm:$0xf] (%p1590_p5)  ;;  %v6145_v26 = vld [vmem:[%s6777_s5 + $0x48] sm:$0xf] (%p1590_p5) }
 0x320   : >> { %4475 = vmatmul.mubr.msk.bf16.vlgmr.msra.gmra.mrb[0].mxu1 %vm2121_vm15, %v2015_v49  ;;  %4507 = vmatmul.mubr.msk.bf16.gmra.mrb[4].mxu0 %vm2121_vm15, %v2015_v49  ;;  %v1791_v36 = vpop.permute.xlu1 %1790  ;;  %v2018_v33 = vrot.slane %v2016_v51, 3  ;;  %v2021_v15 = vrot.slane %v2019_v23, 4  ;;  %6843 = vst [vmem:[#allocation39_spill] sm:$0xff] (%p1590_p5), %v6140_v1  ;;  %v6150_v57 = vld [vmem:[%s6777_s5 + $0x4c] sm:$0xf] (%p1590_p5) }
 0x321   : >> { %v1803_v38 = vsel %vm1170_vm9, %v1797_v39, %v1791_v36  ;;  %4584 = vmatpush3.bf16.msra.mxu1 %v5651_v31  ;;  %4524 = vmatprep.subr.bf16.mxu0 %v4118_v19 }
 0x322   : >> { %v2031_v5 = vshrl.u32 %v1803_v38, 16  ;;  %v2034_v47 = vshll.u32 %v1803_v38, 16  ;;  %v1789_v48 = vpop.permute.xlu0 %1788  ;;  %4579 = vmatprep.subr.bf16.mxu1 %v5655_v32  ;;  %4525 = vmatpush3.bf16.msra.mxu0 %v4118_v19  ;;  %v2022_v50 = vor.u32 %v2021_v15, %v2018_v33 }
 0x323   : >> { %v1801_v16 = vsel %vm1170_vm9, %v1795_v60, %v1789_v48  ;;  %4526 = vmatprep.subr.bf16.mxu0 %v4119_v3 }
 0x324   : >> { %v2033_v37 = vrot.slane %v2031_v5, 3  ;;  %v2036_v54 = vrot.slane %v2034_v47, 4  ;;  %v2023_v52 = vshrl.u32 %v1801_v16, 16  ;;  %v2026_v31 = vshll.u32 %v1801_v16, 16  ;;  %v1830_v43 = vpop.permute.xlu1 %1829 }
 0x325   : >> { %4585 = vmatpush3.bf16.msra.mxu1 %v5655_v32  ;;  %v1850_v39 = vsel %vm351_vm2, %v5748_v0, %v1830_v43 }
 0x326   : >> { %v2037_v46 = vor.u32 %v2036_v54, %v2033_v37  ;;  %v2025_v14 = vrot.slane %v2023_v52, 3  ;;  %v2028_v20 = vrot.slane %v2026_v31, 4  ;;  %v1828_v22 = vpop.permute.xlu0 %1827  ;;  %4580 = vmatprep.subr.bf16.mxu1 %v5665_v30  ;;  %4527 = vmatpush3.bf16.msra.mxu0 %v4119_v3 }
 0x327   : >> { %v1848_v4 = vsel %vm351_vm2, %v5755_v8, %v1828_v22  ;;  %4528 = vmatprep.subr.bf16.mxu0 %v4120_v13 }
 0x328   : >> { %v2029_v55 = vor.u32 %v2028_v20, %v2025_v14  ;;  %v1842_v6 = vpop.permute.xlu1 %1841 }
 0x329   : >> { %v1854_v18 = vsel %vm1170_vm9, %v1848_v4, %v1842_v6  ;;  %4586 = vmatpush3.bf16.msra.mxu1 %v5665_v30 }
 0x32a   : >> { %v1832_v32 = vpop.permute.xlu0 %1831  ;;  %v2030_v10 = vsel %vm1969_vm14, %v2022_v50, %v2029_v55  ;;  %v2038_v49 = vsel %vm1969_vm14, %v2029_v55, %v2037_v46  ;;  %4581 = vmatprep.subr.bf16.mxu1 %v5680_v40  ;;  %v2039_v19 = vshrl.u32 %v1854_v18, 16  ;;  %v2042_v51 = vshll.u32 %v1854_v18, 16  ;;  %4529 = vmatpush3.bf16.msra.mxu0 %v4120_v13 }
 0x32b   : >> { %4478 = vmatprep.mubr.msk.bf16.mxu1 %vm2121_vm15, %v2030_v10  ;;  %4510 = vmatprep.mubr.msk.bf16.mxu0 %vm2121_vm15, %v2030_v10  ;;  %v1852_v8 = vsel %vm351_vm2, %v5762_v41, %v1832_v32 }
 0x32c   : >> { %4479 = vmatmul.mubr.msk.bf16.gmra.mrb[4].mxu1 %vm2121_vm15, %v2038_v49  ;;  %4511 = vmatmul.mubr.msk.bf16.gmra.mrb[8].mxu0 %vm2121_vm15, %v2038_v49  ;;  %v1846_v30 = vpop.permute.xlu1 %1845  ;;  %v2041_v5 = vrot.slane %v2039_v19, 3  ;;  %v2044_v41 = vrot.slane %v2042_v51, 4 }
 0x32d   : >> { %v1858_v23 = vsel %vm1170_vm9, %v1852_v8, %v1846_v30  ;;  %4530 = vmatprep.mubr.msk.bf16.mxu0 %vm2121_vm15, %v2030_v10  ;;  %4587 = vmatpush3.bf16.msra.mxu1 %v5680_v40 }
 0x32e   : >> { %v2054_v36 = vshrl.u32 %v1858_v23, 16  ;;  %v2057_v38 = vshll.u32 %v1858_v23, 16  ;;  %v1844_v60 = vpop.permute.xlu0 %1843  ;;  %4582 = vmatprep.subr.bf16.mxu1 %v5772_v35  ;;  %v2045_v40 = vor.u32 %v2044_v41, %v2041_v5 }
 0x32f   : >> { %v1856_v47 = vsel %vm1170_vm9, %v1850_v39, %v1844_v60 }
 0x330   : >> { %v2056_v48 = vrot.slane %v2054_v36, 3  ;;  %v2059_v3 = vrot.slane %v2057_v38, 4  ;;  %v2046_v33 = vshrl.u32 %v1856_v47, 16  ;;  %v2049_v15 = vshll.u32 %v1856_v47, 16  ;;  %v1885_v16 = vpop.permute.xlu1 %1884 }
 0x331   : >> { %4588 = vmatpush3.bf16.msra.mxu1 %v5772_v35  ;;  %v1905_v6 = vsel %vm351_vm2, %v5795_v42, %v1885_v16 }
 0x332   : >> { %v2060_v37 = vor.u32 %v2059_v3, %v2056_v48  ;;  %v2048_v54 = vrot.slane %v2046_v33, 3  ;;  %v2051_v52 = vrot.slane %v2049_v15, 4  ;;  %v1883_v0 = vpop.permute.xlu0 %1882  ;;  %4583 = vmatprep.subr.bf16.mxu1 %v5779_v45 }
 0x333   : >> { %v1903_v43 = vsel %vm351_vm2, %v5802_v11, %v1883_v0 }
 0x334   : >> { %v2052_v31 = vor.u32 %v2051_v52, %v2048_v54  ;;  %4531 = vmatmul.mubr.msk.bf16.vlgmr.msra.gmra.mrb[0].mxu0 %vm2121_vm15, %v2038_v49  ;;  %v1897_v46 = vpop.permute.xlu1 %1896 }
 0x335   : >> { %v1909_v14 = vsel %vm1170_vm9, %v1903_v43, %v1897_v46  ;;  %4589 = vmatpush3.bf16.msra.mxu1 %v5779_v45 }
 0x336   : >> { %v1887_v20 = vpop.permute.xlu0 %1886  ;;  %v2053_v22 = vsel %vm1969_vm14, %v2045_v40, %v2052_v31  ;;  %v5954_v13 = vsel %vm1969_vm14, %v2052_v31, %v2060_v37  ;;  %v2062_v35 = vshrl.u32 %v1909_v14, 16  ;;  %v2065_v50 = vshll.u32 %v1909_v14, 16 }
 0x337   : >> { %4482 = vmatprep.mubr.msk.bf16.mxu1 %vm2121_vm15, %v2053_v22  ;;  %4534 = vmatprep.mubr.msk.bf16.mxu0 %vm2121_vm15, %v2053_v22  ;;  %v1907_v11 = vsel %vm351_vm2, %v5813_v61, %v1887_v20 }
 0x338   : >> { %4483 = vmatmul.mubr.msk.bf16.gmra.mrb[8].mxu1 %vm2121_vm15, %v5954_v13  ;;  %v1901_v55 = vpop.permute.xlu1 %1900  ;;  %v2064_v10 = vrot.slane %v2062_v35, 3  ;;  %v2067_v49 = vrot.slane %v2065_v50, 4 }
 0x339   : >> { %v1913_v4 = vsel %vm1170_vm9, %v1907_v11, %v1901_v55 }
 0x33a   : >> { %v2077_v18 = vshrl.u32 %v1913_v4, 16  ;;  %v2080_v45 = vshll.u32 %v1913_v4, 16  ;;  %v1899_v32 = vpop.permute.xlu0 %1898  ;;  %v2068_v42 = vor.u32 %v2067_v49, %v2064_v10 }
 0x33b   : >> { %v1911_v19 = vsel %vm1170_vm9, %v1905_v6, %v1899_v32  ;;  %v4756_v32 = vmov 0.0  }
 0x33c   : >> { %v2079_v51 = vrot.slane %v2077_v18, 3  ;;  %v2082_v8 = vrot.slane %v2080_v45, 4  ;;  %v2069_v30 = vshrl.u32 %v1911_v19, 16  ;;  %v2072_v61 = vshll.u32 %v1911_v19, 16  ;;  %4535 = vmatmul.mubr.msk.bf16.gmra.mrb[4].mxu0 %vm2121_vm15, %v5954_v13  ;;  %v1940_v23 = vpop.permute.xlu1 %1939  ;;  %4546 = vmatprep.subr.bf16.mxu1 %v4756_v32 }
 0x33d   : >> { %v1960_v0 = vsel %vm351_vm2, %v5829_v9, %v1940_v23 }
 0x33e   : >> { %v2083_v39 = vor.u32 %v2082_v8, %v2079_v51  ;;  %v2071_v36 = vrot.slane %v2069_v30, 3  ;;  %v2074_v38 = vrot.slane %v2072_v61, 4  ;;  %v1938_v60 = vpop.permute.xlu0 %1937 }
 0x33f   : >> { %v1958_v41 = vsel %vm351_vm2, %v5835_v44, %v1938_v60 }
 0x340   : >> { %v2075_v5 = vor.u32 %v2074_v38, %v2071_v36  ;;  %v1952_v47 = vpop.permute.xlu1 %1951 }
 0x341   : >> { %v1964_v48 = vsel %vm1170_vm9, %v1958_v41, %v1952_v47 }
 0x342   : >> { %v1942_v3 = vpop.permute.xlu0 %1941  ;;  %v2076_v33 = vsel %vm1969_vm14, %v2068_v42, %v2075_v5  ;;  %v2084_v15 = vsel %vm1969_vm14, %v2075_v5, %v2083_v39  ;;  %v2382_v16 = vshrl.u32 %v1964_v48, 16  ;;  %v2385_v37 = vshll.u32 %v1964_v48, 16 }
 0x343   : >> { %4486 = vmatprep.mubr.msk.bf16.mxu1 %vm2121_vm15, %v2076_v33  ;;  %4538 = vmatprep.mubr.msk.bf16.mxu0 %vm2121_vm15, %v2076_v33  ;;  %v1962_v54 = vsel %vm351_vm2, %v5844_v12, %v1942_v3 }
 0x344   : >> { %4487 = vmatmul.mubr.msk.bf16.gmra.mrb[12].mxu1 %vm2121_vm15, %v2084_v15  ;;  %4539 = vmatmul.mubr.msk.bf16.gmra.mrb[8].mxu0 %vm2121_vm15, %v2084_v15  ;;  %v1956_v44 = vpop.permute.xlu1 %1955  ;;  %v2384_v46 = vrot.slane %v2382_v16, 3  ;;  %v2387_v14 = vrot.slane %v2385_v37, 4 }
 0x345   : >> { %v1968_v52 = vsel %vm1170_vm9, %v1962_v54, %v1956_v44  ;;  %4514 = vmatprep.mubr.msk.bf16.mxu1 %vm2121_vm15, %v2053_v22 }
 0x346   : >> { %v2397_v40 = vshrl.u32 %v1968_v52, 16  ;;  %v2400_v31 = vshll.u32 %v1968_v52, 16  ;;  %v1954_v43 = vpop.permute.xlu0 %1953  ;;  %v2388_v18 = vor.u32 %v2387_v14, %v2384_v46 }
 0x347   : >> { %v1966_v20 = vsel %vm1170_vm9, %v1960_v0, %v1954_v43 }
 0x348   : >> { %v2399_v12 = vrot.slane %v2397_v40, 3  ;;  %v2402_v35 = vrot.slane %v2400_v31, 4  ;;  %v2389_v50 = vshrl.u32 %v1966_v20, 16  ;;  %v2392_v11 = vshll.u32 %v1966_v20, 16 }
 0x34a   : >> { %v2403_v55 = vor.u32 %v2402_v35, %v2399_v12  ;;  %v2391_v4 = vrot.slane %v2389_v50, 3  ;;  %v2394_v6 = vrot.slane %v2392_v11, 4 }
 0x34c   : >> { %v2395_v45 = vor.u32 %v2394_v6, %v2391_v4 }
 0x34e   : >> { %v2396_v22 = vsel %vm1969_vm14, %v2388_v18, %v2395_v45  ;;  %v2404_v9 = vsel %vm1969_vm14, %v2395_v45, %v2403_v55 }
 0x34f   : >> { %4542 = vmatprep.mubr.msk.bf16.mxu0 %vm2121_vm15, %v2396_v22 }
 0x350   : >> { %4515 = vmatmul.mubr.msk.bf16.vlgmr.msra.gmra.mrb[12].mxu1 %vm2121_vm15, %v5954_v13  ;;  %4543 = vmatmul.mubr.msk.bf16.gmra.mrb[12].mxu0 %vm2121_vm15, %v2404_v9 }
 0x351   : >> { %4550 = vmatprep.mubr.msk.bf16.mxu1 %vm4757_vm0, %v4756_v32 }
 0x3f3   : >> { %v4476_v10 = vpop.f32.mrb[0].mxu1 }
 0x3f4   : >> { %v2180_v49 = vpop.f32.mrb[1].mxu1 }
 0x3f5   : >> { %v4477_v19 = vpop.f32.mrb[2].mxu1 }
 0x3f6   : >> { %v2183_v51 = vpop.f32.mrb[3].mxu1 }
 0x3ff   : >> { %v4480_v8 = vpop.f32.mrb[4].mxu1 }
 0x400   : >> { %v2196_v30 = vpop.f32.mrb[5].mxu1 }
 0x401   : >> { %v4481_v61 = vpop.f32.mrb[6].mxu1 }
 0x402   : >> { %v2199_v23 = vpop.f32.mrb[7].mxu1 }
 0x407   : >> { %v4532_v39 = vpop.f32.mrb[0].mxu0 }
 0x408   : >> { %v4590_v36 = vadd.f32 %v4532_v39, %v4476_v10  ;;  %v2481_v13 = vpop.f32.mrb[1].mxu0 }
 0x409   : >> { %v4591_v38 = vadd.f32 %v2481_v13, %v2180_v49  ;;  %v4533_v60 = vpop.f32.mrb[2].mxu0 }
 0x40a   : >> { %v4592_v42 = vadd.f32 %v4533_v60, %v4477_v19  ;;  %v2484_v5 = vpop.f32.mrb[3].mxu0  ;;  %v2568_v16 = vadd.f32 %v4590_v36, %v5462_v2 }
 0x40b   : >> { %v4593_v41 = vadd.f32 %v2484_v5, %v2183_v51  ;;  %v4484_v47 = vpop.f32.mrb[8].mxu1  ;;  %v2566_v44 = vadd.f32 %v4591_v38, %v5462_v2 }
 0x40c   : >> { %v2212_v48 = vpop.f32.mrb[9].mxu1  ;;  %v2569_v40 = vadd.f32 %v4592_v42, %v5462_v2  ;;  %v2584_v35 = vmax.f32 %v2568_v16, 0.0 }
 0x40d   : >> { %v4485_v3 = vpop.f32.mrb[10].mxu1  ;;  %v2567_v14 = vadd.f32 %v4593_v41, %v5462_v2  ;;  %v2582_v55 = vmax.f32 %v2566_v44, 0.0 }
 0x40e   : >> { %v2215_v33 = vpop.f32.mrb[11].mxu1  ;;  %v2585_v18 = vmax.f32 %v2569_v40, 0.0 }
 0x40f   : >> { %v4536_v15 = vpop.f32.mrb[4].mxu0  ;;  %v2583_v9 = vmax.f32 %v2567_v14, 0.0 }
 0x410   : >> { %v4594_v37 = vadd.f32 %v4536_v15, %v4480_v8  ;;  %v2497_v54 = vpop.f32.mrb[5].mxu0 }
 0x411   : >> { %v4595_v52 = vadd.f32 %v2497_v54, %v2196_v30  ;;  %v4537_v0 = vpop.f32.mrb[6].mxu0 }
 0x412   : >> { %v2572_v31 = vadd.f32 %v4594_v37, %v5462_v2  ;;  %v4596_v43 = vadd.f32 %v4537_v0, %v4481_v61  ;;  %v2500_v46 = vpop.f32.mrb[7].mxu0 }
 0x413   : >> { %v2570_v20 = vadd.f32 %v4595_v52, %v5462_v2  ;;  %v4597_v12 = vadd.f32 %v2500_v46, %v2199_v23 }
 0x414   : >> { %v2588_v50 = vmax.f32 %v2572_v31, 0.0  ;;  %v2573_v11 = vadd.f32 %v4596_v43, %v5462_v2 }
 0x415   : >> { %v2586_v4 = vmax.f32 %v2570_v20, 0.0  ;;  %v2571_v6 = vadd.f32 %v4597_v12, %v5462_v2 }
 0x416   : >> { %v2600_v45 = vmax.f32 %v2584_v35, %v2588_v50  ;;  %v2589_v22 = vmax.f32 %v2573_v11, 0.0 }
 0x417   : >> { %v2598_v10 = vmax.f32 %v2582_v55, %v2586_v4  ;;  %v2587_v49 = vmax.f32 %v2571_v6, 0.0  ;;  %v4540_v19 = vpop.f32.mrb[8].mxu0 }
 0x418   : >> { %v2601_v51 = vmax.f32 %v2585_v18, %v2589_v22  ;;  %v4598_v8 = vadd.f32 %v4540_v19, %v4484_v47  ;;  %v2513_v30 = vpop.f32.mrb[9].mxu0  ;;  %v2604_v13 = vrot.slane %v2600_v45, 1 }
 0x419   : >> { %v2602_v61 = vrot.slane %v2598_v10, 1  ;;  %v2599_v23 = vmax.f32 %v2583_v9, %v2587_v49  ;;  %v4599_v39 = vadd.f32 %v2513_v30, %v2212_v48  ;;  %v4541_v36 = vpop.f32.mrb[10].mxu0 }
 0x41a   : >> { %v2605_v38 = vrot.slane %v2601_v51, 1  ;;  %v4600_v60 = vadd.f32 %v4541_v36, %v4485_v3  ;;  %v2516_v42 = vpop.f32.mrb[11].mxu0  ;;  %v2576_v31 = vadd.f32 %v4598_v8, %v5462_v2 }
 0x41b   : >> { %v2603_v5 = vrot.slane %v2599_v23, 1  ;;  %v4601_v41 = vadd.f32 %v2516_v42, %v2215_v33  ;;  %v2574_v20 = vadd.f32 %v4599_v39, %v5462_v2 }
 0x41c   : >> { %v2607_v15 = vsel %vm1149_vm10, %v2604_v13, %v2605_v38  ;;  %v2610_v16 = vsel %vm1149_vm10, %v2605_v38, %v2602_v61  ;;  %v2577_v11 = vadd.f32 %v4600_v60, %v5462_v2 }
 0x41d   : >> { %v2613_v37 = vmax.f32 %v2600_v45, %v2607_v15  ;;  %v2614_v54 = vmax.f32 %v2601_v51, %v2610_v16  ;;  %v2608_v47 = vsel %vm1149_vm10, %v2603_v5, %v2604_v13  ;;  %v2609_v48 = vsel %vm1149_vm10, %v2602_v61, %v2603_v5 }
 0x41e   : >> { %v2611_v44 = vmax.f32 %v2598_v10, %v2609_v48  ;;  %v2612_v52 = vmax.f32 %v2599_v23, %v2608_v47  ;;  %v2575_v45 = vadd.f32 %v4601_v41, %v5462_v2  ;;  %v2592_v10 = vmax.f32 %v2576_v31, 0.0 }
 0x41f   : >> { %v2616_v3 = vpack.c.bf16 %v2614_v54, %v2613_v37  ;;  %v2590_v51 = vmax.f32 %v2574_v20, 0.0  ;;  %v2593_v61 = vmax.f32 %v2577_v11, 0.0 }
 0x420   : >> { %v2615_v0 = vpack.c.bf16 %v2612_v52, %v2611_v44  ;;  %v2591_v36 = vmax.f32 %v2575_v45, 0.0  ;;  %v6055_v45 = vld [vmem:[%s6777_s5] sm:$0xf] (%p1590_p5) }
 0x421   : > { %6832 = vst [vmem:[#allocation28_spill] sm:$0xff] (%p1590_p5), %v6055_v45 }
 0x422   : >> { %4547 = vmatpush3.bf16.msra.mxu1 %v2615_v0 }
 0x423   : >> { %v4516_v33 = vpop.f32.mrb[12].mxu1  ;;  %v4544_v40 = vpop.f32.mrb[12].mxu0  ;;  %4548 = vmatprep.subr.bf16.mxu1 %v4756_v32 }
 0x424   : >> { %v4602_v43 = vadd.f32 %v4544_v40, %v4516_v33  ;;  %v2367_v46 = vpop.f32.mrb[13].mxu1  ;;  %v2529_v14 = vpop.f32.mrb[13].mxu0 }
 0x425   : >> { %v4603_v12 = vadd.f32 %v2529_v14, %v2367_v46  ;;  %v4517_v35 = vpop.f32.mrb[14].mxu1  ;;  %v4545_v50 = vpop.f32.mrb[14].mxu0 }
 0x426   : >> { %v2580_v55 = vadd.f32 %v4602_v43, %v5462_v2  ;;  %v4604_v4 = vadd.f32 %v4545_v50, %v4517_v35  ;;  %v2370_v6 = vpop.f32.mrb[15].mxu1  ;;  %v2532_v18 = vpop.f32.mrb[15].mxu0  ;;  %4549 = vmatpush3.bf16.msra.mxu1 %v2616_v3 }
 0x427   : >> { %v2578_v22 = vadd.f32 %v4603_v12, %v5462_v2  ;;  %v4605_v9 = vadd.f32 %v2532_v18, %v2370_v6  ;;  %4554 = vmatprep.subr.bf16.mxu1 %v4756_v32  ;;  %v6045_v6 = vpack.c.bf16 (%p1590_p5), %v5100_v17, %v5100_v17  ;;  %v6050_v18 = vld [vmem:[%s6778_s6] ss:$0 sm:$0xff] (%p1590_p5)  ;;  %v6065_v17 = vld [vmem:[%s6777_s5 + $0x8] sm:$0xf] (%p1590_p5) }
 0x428   : >> { %v2596_v49 = vmax.f32 %v2580_v55, 0.0  ;;  %v2581_v19 = vadd.f32 %v4604_v4, %v5462_v2  ;;  %6831 = vst [vmem:[#allocation27_spill] sm:$0xff] (%p1590_p5), %v6050_v18  ;;  %6834 = vst [vmem:[#allocation30_spill] sm:$0xff] (%p1590_p5), %v6065_v17  ;;  %v6370_v18 = vld [vmem:[%s6777_s5 + $0xfc] sm:$0xf] (%p1590_p5) }
 0x429   : >> { %v2594_v8 = vmax.f32 %v2578_v22, 0.0  ;;  %v2579_v30 = vadd.f32 %v4605_v9, %v5462_v2  ;;  %4551 = vmatmul.mubr.msk.bf16.vlgmr.msra.gmra.mrb[16].mxu1 %vm351_vm2, %v5106_v21  ;;  %6830 = vst [vmem:[#allocation26_spill] sm:$0xff] (%p1590_p5), %v6045_v6  ;;  %v6060_v22 = vld [vmem:[%s6777_s5 + $0x4] sm:$0xf] (%p1590_p5)  ;;  %v6075_v2 = vld [vmem:[%s6777_s5 + $0x10] sm:$0xf] (%p1590_p5) }
 0x42a   : >> { %v2674_v23 = vmax.f32 %v2592_v10, %v2596_v49  ;;  %v2597_v39 = vmax.f32 %v2581_v19, 0.0  ;;  %4558 = vmatprep.mubr.msk.bf16.mxu1 %vm4757_vm0, %v4756_v32  ;;  %6833 = vst [vmem:[#allocation29_spill] sm:$0xff] (%p1590_p5), %v6060_v22  ;;  %6836 = vst [vmem:[#allocation32_spill] sm:$0xff] (%p1590_p5), %v6075_v2  ;;  %v6155_v9 = vld [vmem:[%s6777_s5 + $0x50] sm:$0xf] (%p1590_p5) }
 0x42b   : >> { %v2672_v13 = vmax.f32 %v2590_v51, %v2594_v8  ;;  %v2595_v38 = vmax.f32 %v2579_v30, 0.0  ;;  %6844 = vst [vmem:[#allocation40_spill] sm:$0xff] (%p1590_p5), %v6155_v9  ;;  %v6160_v10 = vld [vmem:[%s6777_s5 + $0x54] sm:$0xf] (%p1590_p5)  ;;  %v6165_v49 = vld [vmem:[%s6777_s5 + $0x58] sm:$0xf] (%p1590_p5) }
 0x42c   : >> { %v2675_v60 = vmax.f32 %v2593_v61, %v2597_v39  ;;  %v2678_v41 = vrot.slane %v2674_v23, 1  ;;  %6845 = vst [vmem:[#allocation41_spill] sm:$0xff] (%p1590_p5), %v6160_v10  ;;  %6846 = vst [vmem:[#allocation42_spill] sm:$0xff] (%p1590_p5), %v6165_v49  ;;  %v6170_v19 = vld [vmem:[%s6777_s5 + $0x5c] sm:$0xf] (%p1590_p5) }
 0x42d   : >> { %v2676_v42 = vrot.slane %v2672_v13, 1  ;;  %v2673_v5 = vmax.f32 %v2591_v36, %v2595_v38  ;;  %6847 = vst [vmem:[#allocation43_spill] sm:$0xff] (%p1590_p5), %v6170_v19  ;;  %v6175_v51 = vld [vmem:[%s6777_s5 + $0x60] sm:$0xf] (%p1590_p5)  ;;  %v6180_v8 = vld [vmem:[%s6777_s5 + $0x64] sm:$0xf] (%p1590_p5) }
 0x42e   : >> { %v2679_v15 = vrot.slane %v2675_v60, 1  ;;  %6848 = vst [vmem:[#allocation44_spill] sm:$0xff] (%p1590_p5), %v6175_v51  ;;  %6849 = vst [vmem:[#allocation45_spill] sm:$0xff] (%p1590_p5), %v6180_v8  ;;  %v6185_v30 = vld [vmem:[%s6777_s5 + $0x68] sm:$0xf] (%p1590_p5) }
 0x42f   : >> { %v2677_v16 = vrot.slane %v2673_v5, 1  ;;  %6850 = vst [vmem:[#allocation46_spill] sm:$0xff] (%p1590_p5), %v6185_v30  ;;  %v6190_v61 = vld [vmem:[%s6777_s5 + $0x6c] sm:$0xf] (%p1590_p5)  ;;  %v6200_v39 = vld [vmem:[%s6777_s5 + $0x74] sm:$0xf] (%p1590_p5) }
 0x430   : >> { %v2680_v37 = vsel %vm1149_vm10, %v2678_v41, %v2679_v15  ;;  %v2683_v54 = vsel %vm1149_vm10, %v2679_v15, %v2676_v42  ;;  %6851 = vst [vmem:[#allocation47_spill] sm:$0xff] (%p1590_p5), %v6190_v61  ;;  %6853 = vst [vmem:[#allocation49_spill] sm:$0xff] (%p1590_p5), %v6200_v39  ;;  %v6205_v36 = vld [vmem:[%s6777_s5 + $0x78] sm:$0xf] (%p1590_p5)  ;;  %v6215_v38 = vld [vmem:[%s6777_s5 + $0x80] sm:$0xf] (%p1590_p5) }
 0x431   : >> { %v2686_v47 = vmax.f32 %v2674_v23, %v2680_v37  ;;  %v2687_v48 = vmax.f32 %v2675_v60, %v2683_v54  ;;  %v2681_v44 = vsel %vm1149_vm10, %v2677_v16, %v2678_v41  ;;  %v2682_v52 = vsel %vm1149_vm10, %v2676_v42, %v2677_v16  ;;  %v6195_v23 = vld [vmem:[%s6777_s5 + $0x70] sm:$0xf] (%p1590_p5)  ;;  %6854 = vst [vmem:[#allocation50_spill] sm:$0xff] (%p1590_p5), %v6205_v36  ;;  %v6220_v60 = vld [vmem:[%s6777_s5 + $0x84] sm:$0xf] (%p1590_p5) }
 0x432   : >> { %v2684_v3 = vmax.f32 %v2672_v13, %v2682_v52  ;;  %v2685_v0 = vmax.f32 %v2673_v5, %v2681_v44  ;;  %6852 = vst [vmem:[#allocation48_spill] sm:$0xff] (%p1590_p5), %v6195_v23  ;;  %v6210_v13 = vld [vmem:[%s6777_s5 + $0x7c] sm:$0xf] (%p1590_p5)  ;;  %6856 = vst [vmem:[#allocation52_spill] sm:$0xff] (%p1590_p5), %v6215_v38  ;;  %v6225_v42 = vld [vmem:[%s6777_s5 + $0x88] sm:$0xf] (%p1590_p5) }
 0x433   : >> { %v2689_v33 = vpack.c.bf16 %v2687_v48, %v2686_v47  ;;  %6855 = vst [vmem:[#allocation51_spill] sm:$0xff] (%p1590_p5), %v6210_v13  ;;  %6857 = vst [vmem:[#allocation53_spill] sm:$0xff] (%p1590_p5), %v6220_v60  ;;  %v6230_v5 = vld [vmem:[%s6777_s5 + $0x8c] sm:$0xf] (%p1590_p5)  ;;  %v6235_v41 = vld [vmem:[%s6777_s5 + $0x90] sm:$0xf] (%p1590_p5) }
 0x434   : >> { %v2688_v40 = vpack.c.bf16 %v2685_v0, %v2684_v3  ;;  %6858 = vst [vmem:[#allocation54_spill] sm:$0xff] (%p1590_p5), %v6230_v5  ;;  %v6240_v15 = vld [vmem:[%s6777_s5 + $0x94] sm:$0xf] (%p1590_p5)  ;;  %v6245_v16 = vld [vmem:[%s6777_s5 + $0x98] sm:$0xf] (%p1590_p5)  ;;  %6877 = vst [vmem:[#allocation73_spill] sm:$0xff] (%p1590_p5), %v6370_v18 }
 0x435   : > { %6859 = vst [vmem:[#allocation55_spill] sm:$0xff] (%p1590_p5), %v6240_v15  ;;  %v6250_v37 = vld [vmem:[%s6777_s5 + $0x9c] sm:$0xf] (%p1590_p5)  ;;  %v6255_v54 = vld [vmem:[%s6777_s5 + $0xa0] sm:$0xf] (%p1590_p5) }
 0x436   : >> { %4555 = vmatpush3.bf16.msra.mxu1 %v2688_v40  ;;  %v6260_v47 = vld [vmem:[%s6777_s5 + $0xa4] sm:$0xf] (%p1590_p5)  ;;  %v6265_v48 = vld [vmem:[%s6777_s5 + $0xa8] sm:$0xf] (%p1590_p5)  ;;  %v6270_v44 = vld [vmem:[%s6777_s5 + $0xac] sm:$0xf] (%p1590_p5) }
 0x437   : >> { %4556 = vmatprep.subr.bf16.mxu1 %v4756_v32  ;;  %v6275_v52 = vld [vmem:[%s6777_s5 + $0xb0] sm:$0xf] (%p1590_p5)  ;;  %v6280_v3 = vld [vmem:[%s6777_s5 + $0xb4] sm:$0xf] (%p1590_p5)  ;;  %v6285_v0 = vld [vmem:[%s6777_s5 + $0xb8] sm:$0xf] (%p1590_p5) }
 0x438   : > { %6860 = vst [vmem:[#allocation56_spill] sm:$0xff] (%p1590_p5), %v6280_v3  ;;  %6861 = vst [vmem:[#allocation57_spill] sm:$0xff] (%p1590_p5), %v6285_v0  ;;  %v6295_v40 = vld [vmem:[%s6777_s5 + $0xc0] sm:$0xf] (%p1590_p5)  ;;  %v6360_v6 = vld [vmem:[%s6777_s5 + $0xf4] sm:$0xf] (%p1590_p5) }
 0x439   : > { %6862 = vst [vmem:[#allocation58_spill] sm:$0xff] (%p1590_p5), %v6295_v40  ;;  %6875 = vst [vmem:[#allocation71_spill] sm:$0xff] (%p1590_p5), %v6360_v6  ;;  %v6385_v6 = vld [vmem:[%s6777_s5 + $0x108] sm:$0xf] (%p1590_p5)  ;;  %v6395_v18 = vld [vmem:[%s6777_s5 + $0x110] sm:$0xf] (%p1590_p5) }
 0x43a   : >> { %4557 = vmatpush3.bf16.msra.mxu1 %v2689_v33  ;;  %v6290_v33 = vld [vmem:[%s6777_s5 + $0xbc] sm:$0xf] (%p1590_p5)  ;;  %6880 = vst [vmem:[#allocation76_spill] sm:$0xff] (%p1590_p5), %v6385_v6  ;;  %6882 = vst [vmem:[#allocation78_spill] sm:$0xff] (%p1590_p5), %v6395_v18 }
 0x43b   : > { %v6410_v6 = vld [vmem:[%s6777_s5 + $0x11c] sm:$0xf] (%p1590_p5) }
 0x43c   : > { %6885 = vst [vmem:[#allocation81_spill] sm:$0xff] (%p1590_p5), %v6410_v6 }
 0x43d   : >> { %4559 = vmatmul.mubr.msk.bf16.vlgmr.msra.gmra.mrb[20].mxu1 %vm351_vm2, %v5106_v21  ;;  %v6070_v21 = vld [vmem:[%s6777_s5 + $0xc] sm:$0xf] (%p1590_p5) }
 0x43e   : > { %6835 = vst [vmem:[#allocation31_spill] sm:$0xff] (%p1590_p5), %v6070_v21 }
 0x4fc   : >> { %v2654_v31 = vpop.f32.mrb[16].mxu1 }
 0x4fd   : >> { %v4552_v43 = vpop.f32.mrb[17].mxu1 }
 0x4fe   : >> { %v2657_v46 = vpop.f32.mrb[18].mxu1  ;;  %v6305_v43 = vld [vmem:[%s6777_s5 + $0xc8] sm:$0xf] (%p1590_p5) }
 0x4ff   : >> { %v2662_v14 = vpack.c.bf16 %v2657_v46, %v2654_v31  ;;  %v4553_v20 = vpop.f32.mrb[19].mxu1  ;;  %v6300_v31 = vld [vmem:[%s6777_s5 + $0xc4] sm:$0xf] (%p1590_p5)  ;;  %6864 = vst [vmem:[#allocation60_spill] sm:$0xff] (%p1590_p5), %v6305_v43  ;;  %v6310_v46 = vld [vmem:[%s6777_s5 + $0xcc] sm:$0xf] (%p1590_p5) }
 0x500   : > { %6863 = vst [vmem:[#allocation59_spill] sm:$0xff] (%p1590_p5), %v6300_v31  ;;  %6865 = vst [vmem:[#allocation61_spill] sm:$0xff] (%p1590_p5), %v6310_v46  ;;  %v6320_v20 = vld [vmem:[%s6777_s5 + $0xd4] sm:$0xf] (%p1590_p5) }
 0x501   : >> { %v2665_v12 = vrot.slane %v2662_v14, 4  ;;  %v6315_v14 = vld [vmem:[%s6777_s5 + $0xd0] sm:$0xf] (%p1590_p5)  ;;  %6867 = vst [vmem:[#allocation63_spill] sm:$0xff] (%p1590_p5), %v6320_v20 }
 0x502   : > { %6866 = vst [vmem:[#allocation62_spill] sm:$0xff] (%p1590_p5), %v6315_v14 }
 0x503   : >> { %4133 = vst.msk [vmem:[%s3878_s26 + $0x10] sm:$0xf0] %vm377_vm4, %v2665_v12 }
 0x504   : >> { %4134 = vst.msk [vmem:[%s3878_s26 + $0x18] sm:$0xf] %vm358_vm3, %v2665_v12  ;;  %v6325_v12 = vld [vmem:[%s6777_s5 + $0xd8] sm:$0xf] (%p1590_p5) }
 0x505   : > { %6868 = vst [vmem:[#allocation64_spill] sm:$0xff] (%p1590_p5), %v6325_v12 }
 0x510   : >> { %v2724_v35 = vpop.f32.mrb[20].mxu1 }
 0x511   : >> { %v4560_v50 = vpop.f32.mrb[21].mxu1 }
 0x512   : >> { %v2727_v11 = vpop.f32.mrb[22].mxu1  ;;  %1592 = sbr.rel (!%p1590_p5) target bundleno = 645 (0x285), region = 133  ;;  %v6335_v50 = vld [vmem:[%s6777_s5 + $0xe0] sm:$0xf] (%p1590_p5) }
 0x513   : >> { %v2731_v32 = vpack.c.bf16 %v2727_v11, %v2724_v35  ;;  %v4561_v55 = vpop.f32.mrb[23].mxu1  ;;  %v6330_v35 = vld [vmem:[%s6777_s5 + $0xdc] sm:$0xf] (%p1590_p5)  ;;  %6870 = vst [vmem:[#allocation66_spill] sm:$0xff] (%p1590_p5), %v6335_v50  ;;  %v6340_v11 = vld [vmem:[%s6777_s5 + $0xe4] sm:$0xf] (%p1590_p5) }
 0x514   : > { %6869 = vst [vmem:[#allocation65_spill] sm:$0xff] (%p1590_p5), %v6330_v35  ;;  %6871 = vst [vmem:[#allocation67_spill] sm:$0xff] (%p1590_p5), %v6340_v11  ;;  %v6350_v55 = vld [vmem:[%s6777_s5 + $0xec] sm:$0xf] (%p1590_p5) }
 0x515   : >> { %v2734_v4 = vrot.slane %v2731_v32, 4  ;;  %v6345_v32 = vld [vmem:[%s6777_s5 + $0xe8] sm:$0xf] (%p1590_p5)  ;;  %6873 = vst [vmem:[#allocation69_spill] sm:$0xff] (%p1590_p5), %v6350_v55 }
 0x516   : > { %6872 = vst [vmem:[#allocation68_spill] sm:$0xff] (%p1590_p5), %v6345_v32  ;;  %v6375_v32 = vld [vmem:[%s6777_s5 + $0x100] sm:$0xf] (%p1590_p5) }
 0x517   : >> { %4138 = vst.msk [vmem:[%s3878_s26 + $0x20] sm:$0xf0] %vm377_vm4, %v2734_v4  ;;  %6878 = vst [vmem:[#allocation74_spill] sm:$0xff] (%p1590_p5), %v6375_v32  ;;  %v6400_v32 = vld [vmem:[%s6777_s5 + $0x114] sm:$0xf] (%p1590_p5) }
 0x518   : >> { %4139 = vst.msk [vmem:[%s3878_s26 + $0x28] sm:$0xf] %vm358_vm3, %v2734_v4  ;;  %v6355_v4 = vld [vmem:[%s6777_s5 + $0xf0] sm:$0xf] (%p1590_p5)  ;;  %6883 = vst [vmem:[#allocation79_spill] sm:$0xff] (%p1590_p5), %v6400_v32  ;;  %s6412_s26 = smov (%p1590_p5), 0  }
 0x519   : > { %6874 = vst [vmem:[#allocation70_spill] sm:$0xff] %v6355_v4  ;;  %v6380_v4 = vld [vmem:[%s6777_s5 + $0x104] sm:$0xf] }
 0x51a   : > { %6879 = vst [vmem:[#allocation75_spill] sm:$0xff] %v6380_v4  ;;  %v6405_v4 = vld [vmem:[%s6777_s5 + $0x118] sm:$0xf] }
 0x51b   : > { %6884 = vst [vmem:[#allocation80_spill] sm:$0xff] %v6405_v4 }
 0x51c LB: >> { %v6886_v8 = vld [vmem:[#allocation45_spill] sm:$0xff]  ;;  %v6887_v51 = vld [vmem:[#allocation44_spill] sm:$0xff]  ;;  %v6784_v4 = vmov 0   ;;  %s4227_s27 = sshll.u32 %s4750_s26, 6  ;;  %v6890_v61 = vld [vmem:[#allocation47_spill] sm:$0xff]  ;;  %v6898_v20 = vmov 0   ;;  %s4750_s26 = sphi %s6412_s26, %s2820_s26  }
 0x51d   : >> { %v4163_v18 = vcombine.low %v6887_v51, %v6886_v8  ;;  %v6888_v22 = vld [vmem:[#allocation29_spill] sm:$0xff]  ;;  %v6889_v45 = vld [vmem:[#allocation28_spill] sm:$0xff]  ;;  %3278 = vmatprep.subr.bf16.mxu0 %v6784_v4  ;;  %3418 = vmatprep.subr.bf16.mxu1 %v6784_v4  ;;  %v6891_v30 = vld [vmem:[#allocation46_spill] sm:$0xff]  ;;  %s6430_s28 = scalar_lea.vmem [#allocation3], %s4227_s27  ;;  %s4759_s29 = smov 64   ;;  %vm4761_vm1 = vmmov 0  }
 0x51e   : >> { %v4179_v32 = vcombine.low %v6889_v45, %v6888_v22  ;;  %v4164_v6 = vcombine.low %v6891_v30, %v6890_v61  ;;  %v6892_v21 = vld [vmem:[#allocation31_spill] sm:$0xff]  ;;  %v6893_v17 = vld [vmem:[#allocation30_spill] sm:$0xff]  ;;  %v6894_v39 = vld [vmem:[#allocation49_spill] sm:$0xff]  ;;  %vm3696_vm2 = vcmask 130048   ;;  %s4213_s30 = sshll.u32 %s4750_s26, 4  ;;  %s2820_s26 = sadd.s32 1, %s4750_s26  }
 0x51f   : >> { %3279 = vmatpush1.bf16.msra.mxu0 %v4163_v18  ;;  %v4180_v7 = vcombine.low %v6893_v17, %v6892_v21  ;;  %v6433_v18 = vld [vmem:[%s6430_s28 + $0x10] sm:$0xff]  ;;  %v6439_v8 = vld [vmem:[%s6430_s28] sm:$0xff]  ;;  %v6445_v22 = vld [vmem:[%s6430_s28 + $0x8] sm:$0xff]  ;;  %s3742_s8 = sshra.s32 %s4213_s30, 3  ;;  %s4234_s10 = sadd.s32 8, %s4213_s30 }
 0x520   : >> { %3419 = vmatpush1.bf16.msra.mxu1 %v4179_v32  ;;  %3280 = vmatprep.subr.bf16.mxu0 %v6784_v4  ;;  %v6436_v32 = vld [vmem:[%s6430_s28 + $0x18] sm:$0xff]  ;;  %v2889_v17 = vshrl.u32 %v6433_v18, 16  ;;  %v2891_v21 = vshll.u32 %v6433_v18, 16  ;;  %v6448_v30 = vld [vmem:[%s6430_s28 + $0x20] sm:$0xff]  ;;  %v6895_v23 = vld [vmem:[#allocation48_spill] sm:$0xff]  ;;  %v2859_v51 = vshrl.u32 %v6439_v8, 16 }
 0x521   : >> { %3420 = vmatprep.subr.bf16.mxu1 %v6784_v4  ;;  %v2896_v4 = vshll.u32 %v6436_v32, 16  ;;  %v4165_v45 = vcombine.low %v6895_v23, %v6894_v39  ;;  %v2861_v61 = vshll.u32 %v6439_v8, 16  ;;  %v2866_v55 = vshll.u32 %v6445_v22, 16  ;;  %v6456_v50 = vld [vmem:[%s6430_s28 + $0x28] sm:$0xff]  ;;  %v6896_v59 = vld [vmem:[#allocation33_spill] sm:$0xff]  ;;  %v6475_v49 = vld [vmem:[%s6430_s28 + $0x40] sm:$0xff] }
 0x522   : >> { %v6897_v2 = vld [vmem:[#allocation32_spill] sm:$0xff]  ;;  %v2893_v12 = vrot.slane %v2891_v21, 1  ;;  %v2900_v14 = vshrl.u32 %v6436_v32, 16  ;;  %v2919_v23 = vshll.u32 %v6448_v30, 16  ;;  %v6463_v39 = vld [vmem:[%s6430_s28 + $0x30] sm:$0xff]  ;;  %v2870_v43 = vshrl.u32 %v6445_v22, 16 }
 0x523   : >> { %3281 = vmatpush1.bf16.msra.mxu0 %v4164_v6  ;;  %v4181_v11 = vcombine.low %v6897_v2, %v6896_v59  ;;  %v2898_v35 = vrot.slane %v2896_v4, 1  ;;  %v2863_v6 = vrot.slane %v2861_v61, 1  ;;  %v2917_v21 = vshrl.u32 %v6448_v30, 16  ;;  %v6471_v59 = vld [vmem:[%s6430_s28 + $0x38] sm:$0xff]  ;;  %v6478_v19 = vld [vmem:[%s6430_s28 + $0x48] sm:$0xff]  ;;  %v6899_v13 = vld [vmem:[#allocation51_spill] sm:$0xff] }
 0x524   : >> { %3421 = vmatpush1.bf16.msra.mxu1 %v4180_v7  ;;  %3282 = vmatprep.subr.bf16.mxu0 %v6898_v20  ;;  %v2868_v7 = vrot.slane %v2866_v55, 1  ;;  %v2894_v46 = vor.u32 %v2893_v12, %v2889_v17  ;;  %v2921_v4 = vrot.slane %v2919_v23, 1  ;;  %v2924_v2 = vshll.u32 %v6456_v50, 16  ;;  %v6900_v36 = vld [vmem:[#allocation50_spill] sm:$0xff]  ;;  %v6901_v58 = vld [vmem:[#allocation35_spill] sm:$0xff]  ;;  %v6903_v60 = vld [vmem:[#allocation53_spill] sm:$0xff] }
 0x525   : >> { %3422 = vmatprep.subr.bf16.mxu1 %v6898_v20  ;;  %v2864_v40 = vor.u32 %v2863_v6, %v2859_v51  ;;  %v2947_v31 = vshll.u32 %v6463_v39, 16  ;;  %v4166_v17 = vcombine.low %v6900_v36, %v6899_v13  ;;  %v6902_v53 = vld [vmem:[#allocation34_spill] sm:$0xff]  ;;  %v2902_v12 = vor.u32 %v2900_v14, %v2898_v35  ;;  %v6904_v38 = vld [vmem:[#allocation52_spill] sm:$0xff]  ;;  %v6908_v24 = vld [vmem:[#allocation37_spill] sm:$0xff]  ;;  %s4214_s9 = sshll.u32 %s3742_s8, 2  ;;  %s3800_s12 = sshra.s32 %s4234_s10, 3 }
 0x526   : >> { %v4182_v61 = vcombine.low %v6902_v53, %v6901_v58  ;;  %v2899_v23 = vsel %vm1636_vm13, %v2894_v46, %v2898_v35  ;;  %v2928_v51 = vshrl.u32 %v6456_v50, 16  ;;  %v2945_v55 = vshrl.u32 %v6463_v39, 16  ;;  %v6493_v46 = vld [vmem:[%s6430_s28 + $0x50] sm:$0xff]  ;;  %v6905_v56 = vld [vmem:[#allocation36_spill] sm:$0xff]  ;;  %v6906_v5 = vld [vmem:[#allocation54_spill] sm:$0xff]  ;;  %s3745_s11 = scalar_lea.vmem %s5097_s21, %s4214_s9  ;;  %s4218_s13 = sshll.u32 %s3800_s12, 2 }
 0x527   : >> { %3283 = vmatpush1.bf16.msra.mxu0 %v4165_v45  ;;  %2903 = vrot.lane.b32.xlu0 %v2899_v23, %s4759_s29  ;;  %v2869_v45 = vsel %vm1636_vm13, %v2864_v40, %v2868_v7  ;;  %v2949_v6 = vrot.slane %v2947_v31, 1  ;;  %v2952_v13 = vshll.u32 %v6471_v59, 16  ;;  %v2922_v14 = vor.u32 %v2921_v4, %v2917_v21  ;;  %v6907_v25 = vld [vmem:[#allocation38_spill] sm:$0xff]  ;;  %v6909_v15 = vld [vmem:[#allocation55_spill] sm:$0xff]  ;;  %v6911_v3 = vld [vmem:[#allocation56_spill] sm:$0xff]  ;;  %s3803_s14 = scalar_lea.vmem %s5097_s21, %s4218_s13  ;;  %p2817_p6 = scmp.ge.s32.totalorder %s2820_s26, 4  }
 0x528   : >> { %3423 = vmatpush1.bf16.msra.mxu1 %v4181_v11  ;;  %3284 = vmatprep.subr.bf16.mxu0 %v6898_v20  ;;  %v2872_v11 = vor.u32 %v2870_v43, %v2868_v7  ;;  %v2926_v35 = vrot.slane %v2924_v2, 1  ;;  %v2975_v36 = vshll.u32 %v6475_v49, 16  ;;  %v2980_v53 = vshll.u32 %v6478_v19, 16  ;;  %v6910_v1 = vld [vmem:[#allocation39_spill] sm:$0xff]  ;;  %v6912_v10 = vld [vmem:[#allocation41_spill] sm:$0xff]  ;;  %v6913_v9 = vld [vmem:[#allocation40_spill] sm:$0xff] }
 0x529   : >> { %3424 = vmatprep.subr.bf16.mxu1 %v6898_v20  ;;  %2873 = vrot.lane.b32.xlu1 %v2869_v45, %s4759_s29  ;;  %v4167_v40 = vcombine.low %v6904_v38, %v6903_v60  ;;  %v4183_v31 = vcombine.low %v6095_v62, %v6905_v56  ;;  %v2956_v43 = vshrl.u32 %v6471_v59, 16  ;;  %v2973_v7 = vshrl.u32 %v6475_v49, 16  ;;  %v6505_v45 = vld [vmem:[%s6430_s28 + $0x58] sm:$0xff]  ;;  %v6914_v0 = vld [vmem:[#allocation57_spill] sm:$0xff] }
 0x52a   : >> { %v2977_v23 = vrot.slane %v2975_v36, 1  ;;  %v3003_v2 = vshll.u32 %v6493_v46, 16  ;;  %v2950_v21 = vor.u32 %v2949_v6, %v2945_v55  ;;  %v2954_v4 = vrot.slane %v2952_v13, 1 }
 0x52b   : >> { %3285 = vmatpush1.bf16.msra.mxu0 %v4166_v17  ;;  %2905 = vrot.lane.b32.xlu0 %v2902_v12, %s4759_s29  ;;  %v2982_v17 = vrot.slane %v2980_v53, 1  ;;  %v2927_v38 = vsel %vm1636_vm13, %v2922_v14, %v2926_v35  ;;  %v2930_v36 = vor.u32 %v2928_v51, %v2926_v35  ;;  %v4168_v56 = vcombine.low %v6225_v42, %v6906_v5 }
 0x52c   : >> { %3425 = vmatpush1.bf16.msra.mxu1 %v4182_v61  ;;  %3286 = vmatprep.subr.bf16.mxu0 %v6898_v20  ;;  %v2984_v61 = vshrl.u32 %v6478_v19, 16  ;;  %v4184_v58 = vcombine.low %v6908_v24, %v6907_v25  ;;  %v3008_v60 = vshll.u32 %v6505_v45, 16  ;;  %v4169_v53 = vcombine.low %v6235_v41, %v6909_v15 }
 0x52d   : >> { %3426 = vmatprep.subr.bf16.mxu1 %v6898_v20  ;;  %2875 = vrot.lane.b32.xlu1 %v2872_v11, %s4759_s29  ;;  %v4185_v13 = vcombine.low %v6115_v27, %v6120_v28  ;;  %v2909_v12 = vrot.slane %v6433_v18, 1  ;;  %v2978_v55 = vor.u32 %v2977_v23, %v2973_v7  ;;  %v3001_v51 = vshrl.u32 %v6493_v46, 16 }
 0x52e   : >> { %v3005_v11 = vrot.slane %v3003_v2, 1  ;;  %v2910_v6 = vrot.slane %v6436_v32, 1  ;;  %v2955_v14 = vsel %vm1636_vm13, %v2950_v21, %v2954_v4  ;;  %v2958_v35 = vor.u32 %v2956_v43, %v2954_v4 }
 0x52f   : >> { %3287 = vmatpush1.bf16.msra.mxu0 %v4167_v40  ;;  %2931 = vrot.lane.b32.xlu0 %v2927_v38, %s4759_s29  ;;  %v2986_v40 = vor.u32 %v2984_v61, %v2982_v17  ;;  %v2880_v5 = vrot.slane %v6439_v8, 1  ;;  %v3010_v15 = vrot.slane %v3008_v60, 1  ;;  %v2881_v38 = vrot.slane %v6445_v22, 1 }
 0x530   : >> { %3427 = vmatpush1.bf16.msra.mxu1 %v4183_v31  ;;  %3288 = vmatprep.subr.bf16.mxu0 %v6898_v20  ;;  %v3012_v31 = vshrl.u32 %v6505_v45, 16  ;;  %v2911_v7 = vsel %vm1669_vm12, %v2909_v12, %v2910_v6  ;;  %v3086_v23 = vshrl.u32 %v2910_v6, 16  ;;  %v3089_v2 = vshll.u32 %v2910_v6, 16 }
 0x531   : >> { %3428 = vmatprep.subr.bf16.mxu1 %v6898_v20  ;;  %2933 = vrot.lane.b32.xlu1 %v2930_v36, %s4759_s29  ;;  %v3078_v24 = vshrl.u32 %v2911_v7, 16  ;;  %v3081_v25 = vshll.u32 %v2911_v7, 16  ;;  %v2983_v43 = vsel %vm1636_vm13, %v2978_v55, %v2982_v17  ;;  %v3006_v21 = vor.u32 %v3005_v11, %v3001_v51 }
 0x532   : >> { %v3088_v4 = vrot.slane %v3086_v23, 3  ;;  %v3091_v61 = vrot.slane %v3089_v2, 4  ;;  %v3056_v17 = vshll.u32 %v2881_v38, 16  ;;  %v4170_v55 = vcombine.low %v6245_v16, %v6250_v37 }
 0x533   : >> { %3289 = vmatpush1.bf16.msra.mxu0 %v4168_v56  ;;  %2959 = vrot.lane.b32.xlu0 %v2955_v14, %s4759_s29  ;;  %v3080_v36 = vrot.slane %v3078_v24, 3  ;;  %v3083_v12 = vrot.slane %v3081_v25, 4  ;;  %v2882_v56 = vsel %vm1669_vm12, %v2880_v5, %v2881_v38  ;;  %v4186_v51 = vcombine.low %v6125_v29, %v6130_v34 }
 0x534   : >> { %3429 = vmatpush1.bf16.msra.mxu1 %v4184_v58  ;;  %3290 = vmatprep.subr.bf16.mxu0 %v6898_v20  ;;  %v3053_v58 = vshrl.u32 %v2881_v38, 16  ;;  %v3092_v60 = vor.u32 %v3091_v61, %v3088_v4  ;;  %v3045_v6 = vshrl.u32 %v2882_v56, 16  ;;  %v3048_v7 = vshll.u32 %v2882_v56, 16 }
 0x535   : >> { %3430 = vmatprep.subr.bf16.mxu1 %v6898_v20  ;;  %2961 = vrot.lane.b32.xlu1 %v2958_v35, %s4759_s29  ;;  %v3084_v11 = vor.u32 %v3083_v12, %v3080_v36  ;;  %v3058_v14 = vrot.slane %v3056_v17, 4  ;;  %v3014_v35 = vor.u32 %v3012_v31, %v3010_v15  ;;  %v4171_v38 = vcombine.low %v6255_v54, %v6260_v47  ;;  %v6915_v36 = vld [vmem:[#allocation43_spill] sm:$0xff]  ;;  %v6916_v12 = vld [vmem:[#allocation42_spill] sm:$0xff] }
 0x536   : >> { %v3055_v24 = vrot.slane %v3053_v58, 3  ;;  %v3047_v25 = vrot.slane %v3045_v6, 3  ;;  %v3050_v5 = vrot.slane %v3048_v7, 4  ;;  %v4187_v31 = vcombine.low %v6135_v63, %v6910_v1 }
 0x537   : >> { %3291 = vmatpush1.bf16.msra.mxu0 %v4169_v53  ;;  %2987 = vrot.lane.b32.xlu0 %v2983_v43, %s4759_s29  ;;  %v6549_v53 = vsel %vm1969_vm14, %v3084_v11, %v3092_v60  ;;  %v4188_v43 = vcombine.low %v6145_v26, %v6150_v57  ;;  %v4189_v4 = vcombine.low %v6913_v9, %v6912_v10  ;;  %v2937_v58 = vrot.slane %v6448_v30, 1 }
 0x538   : >> { %3431 = vmatpush1.bf16.msra.mxu1 %v4185_v13  ;;  %3292 = vmatprep.subr.bf16.mxu0 %v6898_v20  ;;  %v3011_v13 = vsel %vm1636_vm13, %v3006_v21, %v3010_v15  ;;  %v3051_v23 = vor.u32 %v3050_v5, %v3047_v25  ;;  %v3059_v2 = vor.u32 %v3058_v14, %v3055_v24  ;;  %v2938_v60 = vrot.slane %v6456_v50, 1 }
 0x539   : >> { %3432 = vmatprep.subr.bf16.mxu1 %v6898_v20  ;;  %2989 = vrot.lane.b32.xlu1 %v2986_v40, %s4759_s29  ;;  %v4172_v15 = vcombine.low %v6265_v48, %v6270_v44  ;;  %v4173_v21 = vcombine.low %v6275_v52, %v6911_v3  ;;  %v4174_v61 = vcombine.low %v6914_v0, %v6290_v33  ;;  %v2965_v14 = vrot.slane %v6463_v39, 1 }
 0x53a   : >> { %4175 = vmatprep.mubr.msk.bf16.mxu0 %vm1170_vm9, %v6549_v53  ;;  %v3060_v40 = vsel %vm1969_vm14, %v3051_v23, %v3059_v2  ;;  %v4190_v56 = vcombine.low %v6916_v12, %v6915_v36  ;;  %v2939_v6 = vsel %vm1669_vm12, %v2937_v58, %v2938_v60  ;;  %v6917_v23 = vld [vmem:[#allocation59_spill] sm:$0xff]  ;;  %v6918_v2 = vld [vmem:[#allocation58_spill] sm:$0xff]  ;;  %v2993_v12 = vrot.slane %v6475_v49, 1 }
 0x53b   : >> { %3293 = vmatpush1.bf16.msra.mxu0 %v4170_v55  ;;  %3015 = vrot.lane.b32.xlu0 %v3011_v13, %s4759_s29  ;;  %v3111_v7 = vshrl.u32 %v2939_v6, 16  ;;  %v3114_v17 = vshll.u32 %v2939_v6, 16  ;;  %v3119_v55 = vshrl.u32 %v2938_v60, 16 }
 0x53c   : >> { %3433 = vmatpush1.bf16.msra.mxu1 %v4186_v51  ;;  %3294 = vmatprep.subr.bf16.mxu0 %v6898_v20  ;;  %v3122_v51 = vshll.u32 %v2938_v60, 16 }
 0x53d   : >> { %3434 = vmatprep.subr.bf16.mxu1 %v6898_v20  ;;  %4191 = vmatprep.mubr.msk.bf16.mxu1 %vm1170_vm9, %v3060_v40  ;;  %v3113_v11 = vrot.slane %v3111_v7, 3  ;;  %v3116_v24 = vrot.slane %v3114_v17, 4  ;;  %v3121_v25 = vrot.slane %v3119_v55, 3  ;;  %v6920_v40 = vld [vmem:[#allocation60_spill] sm:$0xff]  ;;  %v6921_v7 = vld [vmem:[#allocation63_spill] sm:$0xff]  ;;  %v6922_v17 = vld [vmem:[#allocation62_spill] sm:$0xff] }
 0x53e   : >> { %3017 = vrot.lane.b32.xlu1 %v3014_v35, %s4759_s29  ;;  %v3124_v5 = vrot.slane %v3122_v51, 4  ;;  %v2966_v35 = vrot.slane %v6471_v59, 1  ;;  %v6609_v55 = vcombine.low %v6922_v17, %v6921_v7 }
 0x53f   : >> { %3295 = vmatpush1.bf16.msra.mxu0 %v4171_v38  ;;  %v6592_v38 = vcombine.low %v6918_v2, %v6917_v23 }
 0x540   : >> { %3435 = vmatpush1.bf16.msra.mxu1 %v4187_v31  ;;  %3296 = vmatprep.subr.bf16.mxu0 %v6898_v20  ;;  %v6919_v31 = vld [vmem:[#allocation61_spill] sm:$0xff]  ;;  %v2967_v36 = vsel %vm1669_vm12, %v2965_v14, %v2966_v35 }
 0x541   : >> { %3436 = vmatprep.subr.bf16.mxu1 %v6898_v20  ;;  %v3144_v23 = vshrl.u32 %v2967_v36, 16 }
 0x543   : >> { %3297 = vmatpush1.bf16.msra.mxu0 %v4172_v15  ;;  %v6596_v15 = vcombine.low %v6920_v40, %v6919_v31  ;;  %v3146_v3 = vrot.slane %v3144_v23, 3 }
 0x544   : >> { %3437 = vmatpush1.bf16.msra.mxu1 %v4188_v43  ;;  %3298 = vmatprep.subr.bf16.mxu0 %v6898_v20  ;;  %v3117_v43 = vor.u32 %v3116_v24, %v3113_v11  ;;  %v3155_v24 = vshll.u32 %v2966_v35, 16 }
 0x545   : >> { %3438 = vmatprep.subr.bf16.mxu1 %v6898_v20 }
 0x546   : >> { %v6624_v7 = vrot.slane %v3155_v24, 4 }
 0x547   : >> { %3299 = vmatpush1.bf16.msra.mxu0 %v4173_v21  ;;  %v3125_v21 = vor.u32 %v3124_v5, %v3121_v25 }
 0x548   : >> { %3439 = vmatpush1.bf16.msra.mxu1 %v4189_v4  ;;  %3300 = vmatprep.subr.bf16.mxu0 %v6898_v20 }
 0x549   : >> { %3440 = vmatprep.subr.bf16.mxu1 %v6898_v20 }
 0x54b   : >> { %3301 = vmatpush1.bf16.msra.mxu0 %v4174_v61 }
 0x54c   : >> { %3441 = vmatpush1.bf16.msra.mxu1 %v4190_v56  ;;  %3591 = vmatprep.subr.bf16.mxu0 %v6898_v20  ;;  %v6603_v56 = vrot.slane %v6478_v19, 1 }
 0x54d   : >> { %4622 = vmatprep.subr.bf16.mxu1 %v6898_v20 }
 0x599   : >> { %v2904_v13 = vpop.permute.xlu0 %2903 }
 0x59a   : >> { %v2913_v4 = vsel %vm1170_vm9, %v6433_v18, %v2904_v13  ;;  %v3152_v18 = vshrl.u32 %v2966_v35, 16  ;;  %v6612_v13 = vsel %vm1969_vm14, %v3117_v43, %v3125_v21 }
 0x59b   : >> { %v2874_v61 = vpop.permute.xlu1 %2873  ;;  %v3062_v58 = vshrl.u32 %v2913_v4, 16  ;;  %v3065_v60 = vshll.u32 %v2913_v4, 16  ;;  %v6618_v4 = vsel %vm1669_vm12, %v2993_v12, %v6603_v56 }
 0x59c   : >> { %v2885_v6 = vsel %vm1170_vm9, %v6439_v8, %v2874_v61  ;;  %v6622_v21 = vrot.slane %v3152_v18, 3 }
 0x59d   : >> { %v3029_v51 = vshrl.u32 %v2885_v6, 16  ;;  %v3032_v11 = vshll.u32 %v2885_v6, 16  ;;  %v3064_v25 = vrot.slane %v3062_v58, 3  ;;  %v3067_v5 = vrot.slane %v3065_v60, 4  ;;  %v2906_v14 = vpop.permute.xlu0 %2905 }
 0x59e   : >> { %v2915_v8 = vsel %vm1170_vm9, %v6436_v32, %v2906_v14  ;;  %v3147_v58 = vshll.u32 %v2967_v36, 16  ;;  %v3177_v14 = vshrl.u32 %v6618_v4, 16 }
 0x59f   : >> { %v3031_v2 = vrot.slane %v3029_v51, 3  ;;  %v3034_v31 = vrot.slane %v3032_v11, 4  ;;  %v2876_v40 = vpop.permute.xlu1 %2875  ;;  %v3069_v61 = vshrl.u32 %v2915_v8, 16  ;;  %v3072_v6 = vshll.u32 %v2915_v8, 16 }
 0x5a0   : >> { %v2887_v35 = vsel %vm1170_vm9, %v6445_v22, %v2876_v40  ;;  %v3068_v11 = vor.u32 %v3067_v5, %v3064_v25  ;;  %v3149_v9 = vrot.slane %v3147_v58, 4 }
 0x5a1   : >> { %v3036_v60 = vshrl.u32 %v2887_v35, 16  ;;  %v3039_v43 = vshll.u32 %v2887_v35, 16  ;;  %v3071_v17 = vrot.slane %v3069_v61, 3  ;;  %v3074_v51 = vrot.slane %v3072_v6, 4  ;;  %v2932_v32 = vpop.permute.xlu0 %2931 }
 0x5a2   : >> { %v2941_v8 = vsel %vm1170_vm9, %v6448_v30, %v2932_v32  ;;  %v3035_v22 = vor.u32 %v3034_v31, %v3031_v2 }
 0x5a3   : >> { %v3038_v12 = vrot.slane %v3036_v60, 3  ;;  %v3041_v0 = vrot.slane %v3039_v43, 4  ;;  %v2934_v1 = vpop.permute.xlu1 %2933  ;;  %v3095_v36 = vshrl.u32 %v2941_v8, 16  ;;  %v3098_v40 = vshll.u32 %v2941_v8, 16 }
 0x5a4   : >> { %v2943_v18 = vsel %vm1170_vm9, %v6456_v50, %v2934_v1  ;;  %v3075_v24 = vor.u32 %v3074_v51, %v3071_v17  ;;  %v3158_v8 = vor.u32 %v6624_v7, %v6622_v21  ;;  %v6924_v7 = vld [vmem:[#allocation64_spill] sm:$0xff] }
 0x5a5   : >> { %v3102_v35 = vshrl.u32 %v2943_v18, 16  ;;  %v3105_v61 = vshll.u32 %v2943_v18, 16  ;;  %v3042_v6 = vor.u32 %v3041_v0, %v3038_v12  ;;  %v3097_v25 = vrot.slane %v3095_v36, 3  ;;  %v2960_v43 = vpop.permute.xlu0 %2959 }
 0x5a6   : >> { %v3100_v5 = vrot.slane %v3098_v40, 4  ;;  %v3076_v60 = vsel %vm1969_vm14, %v3068_v11, %v3075_v24  ;;  %v2969_v31 = vsel %vm1170_vm9, %v6463_v39, %v2960_v43  ;;  %v3180_v11 = vshll.u32 %v6618_v4, 16 }
 0x5a7   : >> { %v3104_v10 = vrot.slane %v3102_v35, 3  ;;  %v3107_v30 = vrot.slane %v3105_v61, 4  ;;  %3311 = vmatmul.mubr.bf16.vlgmr.msra.gmra.mrb[0].mxu0 %v3076_v60  ;;  %v3043_v2 = vsel %vm1969_vm14, %v3035_v22, %v3042_v6  ;;  %v2962_v1 = vpop.permute.xlu1 %2961  ;;  %v3128_v50 = vshrl.u32 %v2969_v31, 16 }
 0x5a8   : >> { %3451 = vmatmul.mubr.bf16.vlgmr.msra.gmra.mrb[0].mxu1 %v3043_v2  ;;  %3592 = vmatpush1.bf16.msra.mxu0 %v6592_v38  ;;  %v3101_v0 = vor.u32 %v3100_v5, %v3097_v25  ;;  %v3131_v23 = vshll.u32 %v2969_v31, 16  ;;  %v2971_v17 = vsel %vm1170_vm9, %v6471_v59, %v2962_v1  ;;  %v3150_v12 = vor.u32 %v3149_v9, %v3146_v3  ;;  %v6926_v1 = vld [vmem:[#allocation66_spill] sm:$0xff] }
 0x5a9   : >> { %4634 = vmatpush1.bf16.msra.mxu1 %v6592_v38  ;;  %3593 = vmatprep.subr.bf16.mxu0 %v6898_v20  ;;  %v3108_v58 = vor.u32 %v3107_v30, %v3104_v10  ;;  %v3135_v51 = vshrl.u32 %v2971_v17, 16  ;;  %v3138_v32 = vshll.u32 %v2971_v17, 16  ;;  %v2988_v39 = vpop.permute.xlu0 %2987  ;;  %v3185_v59 = vshrl.u32 %v6603_v56, 16 }
 0x5aa   : >> { %4623 = vmatprep.subr.bf16.mxu1 %v6898_v20  ;;  %4176 = vmatprep.mubr.msk.bf16.mxu0 %vm1170_vm9, %v6612_v13  ;;  %v3188_v38 = vshll.u32 %v6603_v56, 16  ;;  %v3130_v10 = vrot.slane %v3128_v50, 3  ;;  %v3133_v22 = vrot.slane %v3131_v23, 4  ;;  %v3021_v36 = vrot.slane %v6493_v46, 1 }
 0x5ab   : >> { %4192 = vmatprep.mubr.msk.bf16.mxu1 %vm1170_vm9, %v6549_v53  ;;  %v2990_v4 = vpop.permute.xlu1 %2989  ;;  %v3022_v40 = vrot.slane %v6505_v45, 1  ;;  %v6654_v9 = vsel %vm1969_vm14, %v3101_v0, %v3108_v58  ;;  %v3137_v3 = vrot.slane %v3135_v51, 3  ;;  %v3140_v21 = vrot.slane %v3138_v32, 4  ;;  %v6923_v53 = vld [vmem:[#allocation65_spill] sm:$0xff] }
 0x5ac   : >> { %3594 = vmatpush1.bf16.msra.mxu0 %v6596_v15  ;;  %v2997_v56 = vsel %vm1170_vm9, %v6475_v49, %v2988_v39  ;;  %v4198_v18 = vcombine.low %v6924_v7, %v6923_v53  ;;  %v2999_v24 = vsel %vm1170_vm9, %v6478_v19, %v2990_v4  ;;  %v3179_v35 = vrot.slane %v3177_v14, 3  ;;  %v6925_v14 = vld [vmem:[#allocation67_spill] sm:$0xff]  ;;  %v6930_v53 = vld [vmem:[#allocation70_spill] sm:$0xff] }
 0x5ad   : >> { %4635 = vmatpush1.bf16.msra.mxu1 %v6596_v15  ;;  %3595 = vmatprep.subr.bf16.mxu0 %v6898_v20  ;;  %v3182_v61 = vrot.slane %v3180_v11, 4  ;;  %v3187_v6 = vrot.slane %v3185_v59, 3  ;;  %v3190_v25 = vrot.slane %v3188_v38, 4  ;;  %v3161_v5 = vshrl.u32 %v2997_v56, 16  ;;  %v6928_v59 = vld [vmem:[#allocation68_spill] sm:$0xff] }
 0x5ae   : >> { %4624 = vmatprep.subr.bf16.mxu1 %v6898_v20  ;;  %v3164_v49 = vshll.u32 %v2997_v56, 16  ;;  %v6667_v15 = vsel %vm1969_vm14, %v3150_v12, %v3158_v8  ;;  %v3023_v43 = vsel %vm1669_vm12, %v3021_v36, %v3022_v40  ;;  %v3168_v30 = vshrl.u32 %v2999_v24, 16  ;;  %v6927_v8 = vld [vmem:[#allocation69_spill] sm:$0xff]  ;;  %v6929_v56 = vld [vmem:[#allocation71_spill] sm:$0xff] }
 0x5af   : >> { %3319 = vmatmul.mubr.bf16.gmra.mrb[4].mxu0 %v6654_v9  ;;  %v3171_v19 = vshll.u32 %v2999_v24, 16  ;;  %v3134_v2 = vor.u32 %v3133_v22, %v3130_v10  ;;  %v3141_v31 = vor.u32 %v3140_v21, %v3137_v3  ;;  %v4199_v0 = vcombine.low %v6926_v1, %v6925_v14  ;;  %v6936_v1 = vld [vmem:[#allocation76_spill] sm:$0xff] }
 0x5b0   : >> { %3459 = vmatmul.mubr.bf16.gmra.mrb[4].mxu1 %v3076_v60  ;;  %3596 = vmatpush1.bf16.msra.mxu0 %v6609_v55  ;;  %v3183_v50 = vor.u32 %v3182_v61, %v3179_v35  ;;  %v3191_v60 = vor.u32 %v3190_v25, %v3187_v6  ;;  %v3499_v23 = vshrl.u32 %v3023_v43, 16  ;;  %v3163_v17 = vrot.slane %v3161_v5, 3  ;;  %v6931_v61 = vld [vmem:[#allocation73_spill] sm:$0xff]  ;;  %v6932_v6 = vld [vmem:[#allocation72_spill] sm:$0xff] }
 0x5b1   : >> { %4636 = vmatpush1.bf16.msra.mxu1 %v6609_v55  ;;  %3597 = vmatprep.subr.bf16.mxu0 %v6898_v20  ;;  %v3502_v58 = vshll.u32 %v3023_v43, 16  ;;  %v3507_v51 = vshrl.u32 %v3022_v40, 16  ;;  %v3510_v55 = vshll.u32 %v3022_v40, 16  ;;  %v3166_v32 = vrot.slane %v3164_v49, 4  ;;  %v3016_v49 = vpop.permute.xlu0 %3015  ;;  %v3018_v43 = vpop.permute.xlu1 %3017 }
 0x5b2   : >> { %4625 = vmatprep.subr.bf16.mxu1 %v6898_v20  ;;  %4193 = vmatprep.mubr.msk.bf16.mxu1 %vm1170_vm9, %v6612_v13  ;;  %v3170_v11 = vrot.slane %v3168_v30, 3  ;;  %v3173_v39 = vrot.slane %v3171_v19, 4  ;;  %v6681_v12 = vsel %vm1969_vm14, %v3134_v2, %v3141_v31  ;;  %v4200_v38 = vcombine.low %v6928_v59, %v6927_v8  ;;  %v6933_v30 = vld [vmem:[#allocation75_spill] sm:$0xff]  ;;  %v6934_v19 = vld [vmem:[#allocation74_spill] sm:$0xff]  ;;  %v6940_v8 = vld [vmem:[#allocation80_spill] sm:$0xff] }
 0x5b3   : >> { %4177 = vmatprep.mubr.msk.bf16.mxu0 %vm1170_vm9, %v6667_v15  ;;  %v6689_v10 = vsel %vm1969_vm14, %v3183_v50, %v3191_v60  ;;  %v3501_v22 = vrot.slane %v3499_v23, 3  ;;  %v3504_v4 = vrot.slane %v3502_v58, 4  ;;  %v3167_v36 = vor.u32 %v3166_v32, %v3163_v17  ;;  %v6937_v58 = vld [vmem:[#allocation79_spill] sm:$0xff] }
 0x5b4   : >> { %3598 = vmatpush1.bf16.msra.mxu0 %v4198_v18  ;;  %v3174_v40 = vor.u32 %v3173_v39, %v3170_v11  ;;  %v3509_v3 = vrot.slane %v3507_v51, 3  ;;  %v3512_v21 = vrot.slane %v3510_v55, 4  ;;  %v4201_v7 = vcombine.low %v6930_v53, %v6929_v56  ;;  %v6938_v51 = vld [vmem:[#allocation78_spill] sm:$0xff]  ;;  %v6939_v39 = vld [vmem:[#allocation81_spill] sm:$0xff] }
 0x5b5   : >> { %4637 = vmatpush1.bf16.msra.mxu1 %v4198_v18  ;;  %3599 = vmatprep.subr.bf16.mxu0 %v6898_v20  ;;  %v3505_v24 = vor.u32 %v3504_v4, %v3501_v22  ;;  %v4202_v25 = vcombine.low %v6932_v6, %v6931_v61  ;;  %v4203_v2 = vcombine.low %v6934_v19, %v6933_v30 }
 0x5b6   : >> { %4626 = vmatprep.subr.bf16.mxu1 %v6898_v20  ;;  %v3175_v18 = vsel %vm1969_vm14, %v3167_v36, %v3174_v40  ;;  %v3513_v35 = vor.u32 %v3512_v21, %v3509_v3  ;;  %v3025_v31 = vsel %vm1170_vm9, %v6493_v46, %v3016_v49  ;;  %v3027_v14 = vsel %vm1170_vm9, %v6505_v45, %v3018_v43 }
 0x5b7   : >> { %3327 = vmatmul.mubr.bf16.gmra.mrb[8].mxu0 %v6681_v12  ;;  %v3483_v50 = vshrl.u32 %v3025_v31, 16  ;;  %v3486_v60 = vshll.u32 %v3025_v31, 16  ;;  %v3490_v23 = vshrl.u32 %v3027_v14, 16  ;;  %v3493_v17 = vshll.u32 %v3027_v14, 16 }
 0x5b8   : >> { %3600 = vmatpush1.bf16.msra.mxu0 %v4199_v0  ;;  %3467 = vmatmul.mubr.bf16.gmra.mrb[8].mxu1 %v6654_v9  ;;  %v3514_v5 = vsel %vm1969_vm14, %v3505_v24, %v3513_v35  ;;  %v4205_v46 = vcombine.low %v6938_v51, %v6937_v58  ;;  %v4206_v59 = vcombine.low %v6940_v8, %v6939_v39  ;;  %v4760_v36 = vmov 0.0  }
 0x5b9   : >> { %4638 = vmatpush1.bf16.msra.mxu1 %v4199_v0  ;;  %3601 = vmatprep.subr.bf16.mxu0 %v6898_v20  ;;  %v3485_v55 = vrot.slane %v3483_v50, 3  ;;  %v3488_v45 = vrot.slane %v3486_v60, 4  ;;  %v3492_v32 = vrot.slane %v3490_v23, 3  ;;  %v3495_v11 = vrot.slane %v3493_v17, 4 }
 0x5ba   : >> { %4627 = vmatprep.subr.bf16.mxu1 %v6898_v20  ;;  %4194 = vmatprep.mubr.msk.bf16.mxu1 %vm1170_vm9, %v6667_v15 }
 0x5bb   : >> { %4178 = vmatprep.mubr.msk.bf16.mxu0 %vm1170_vm9, %v6689_v10  ;;  %v3496_v22 = vor.u32 %v3495_v11, %v3492_v32 }
 0x5bc   : >> { %3602 = vmatpush1.bf16.msra.mxu0 %v4200_v38 }
 0x5bd   : >> { %4639 = vmatpush1.bf16.msra.mxu1 %v4200_v38  ;;  %3603 = vmatprep.subr.bf16.mxu0 %v6898_v20  ;;  %v3489_v38 = vor.u32 %v3488_v45, %v3485_v55 }
 0x5be   : >> { %4628 = vmatprep.subr.bf16.mxu1 %v6898_v20 }
 0x5bf   : >> { %3335 = vmatmul.mubr.bf16.gmra.mrb[12].mxu0 %v3175_v18  ;;  %v3497_v4 = vsel %vm1969_vm14, %v3489_v38, %v3496_v22 }
 0x5c0   : >> { %3604 = vmatpush1.bf16.msra.mxu0 %v4201_v7  ;;  %3475 = vmatmul.mubr.bf16.gmra.mrb[12].mxu1 %v6681_v12 }
 0x5c1   : >> { %4640 = vmatpush1.bf16.msra.mxu1 %v4201_v7  ;;  %3605 = vmatprep.subr.bf16.mxu0 %v6898_v20 }
 0x5c2   : >> { %4629 = vmatprep.subr.bf16.mxu1 %v6898_v20  ;;  %4207 = vmatprep.mubr.msk.bf16.mxu0 %vm1170_vm9, %v6612_v13  ;;  %v6935_v13 = vld [vmem:[#allocation77_spill] sm:$0xff] }
 0x5c3   : >> { %4210 = vmatprep.mubr.msk.bf16.mxu1 %vm1170_vm9, %v3514_v5  ;;  %v4204_v0 = vcombine.low %v6936_v1, %v6935_v13 }
 0x5c4   : >> { %3606 = vmatpush1.bf16.msra.mxu0 %v4202_v25 }
 0x5c5   : >> { %4641 = vmatpush1.bf16.msra.mxu1 %v4202_v25  ;;  %3607 = vmatprep.subr.bf16.mxu0 %v6898_v20 }
 0x5c6   : >> { %4630 = vmatprep.subr.bf16.mxu1 %v6898_v20 }
 0x5c8   : >> { %3608 = vmatpush1.bf16.msra.mxu0 %v4203_v2 }
 0x5c9   : >> { %4642 = vmatpush1.bf16.msra.mxu1 %v4203_v2  ;;  %3609 = vmatprep.subr.bf16.mxu0 %v6898_v20 }
 0x5ca   : >> { %4631 = vmatprep.subr.bf16.mxu1 %v6898_v20 }
 0x5cc   : >> { %3610 = vmatpush1.bf16.msra.mxu0 %v4204_v0 }
 0x5cd   : >> { %4643 = vmatpush1.bf16.msra.mxu1 %v4204_v0  ;;  %3611 = vmatprep.subr.bf16.mxu0 %v6898_v20 }
 0x5ce   : >> { %4632 = vmatprep.subr.bf16.mxu1 %v6898_v20 }
 0x5d0   : >> { %3612 = vmatpush1.bf16.msra.mxu0 %v4205_v46 }
 0x5d1   : >> { %4644 = vmatpush1.bf16.msra.mxu1 %v4205_v46  ;;  %3613 = vmatprep.subr.bf16.mxu0 %v6898_v20 }
 0x5d2   : >> { %4633 = vmatprep.subr.bf16.mxu1 %v6898_v20 }
 0x5d4   : >> { %3614 = vmatpush1.bf16.msra.mxu0 %v4206_v59 }
 0x5d5   : >> { %4645 = vmatpush1.bf16.msra.mxu1 %v4206_v59 }
 0x5d6   : >> { %4562 = vmatprep.subr.bf16.mxu1 %v4760_v36 }
 0x5d7   : >> { %3624 = vmatmul.mubr.bf16.vlgmr.msra.gmra.mrb[16].mxu0 %v6654_v9 }
 0x5d8   : >> { %3648 = vmatmul.mubr.bf16.vlgmr.msra.gmra.mrb[16].mxu1 %v3497_v4  ;;  %4208 = vmatprep.mubr.msk.bf16.mxu0 %vm1170_vm9, %v6667_v15 }
 0x5d9   : >> { %4564 = vmatprep.mubr.msk.bf16.mxu1 %vm4761_vm1, %v4760_v36 }
 0x5df   : >> { %3632 = vmatmul.mubr.bf16.gmra.mrb[20].mxu0 %v6681_v12 }
 0x5e0   : >> { %4209 = vmatprep.mubr.msk.bf16.mxu0 %vm1170_vm9, %v6689_v10 }
 0x5e7   : >> { %3640 = vmatmul.mubr.bf16.gmra.mrb[24].mxu0 %v3175_v18 }
 0x67a   : >> { %v3312_v20 = vpop.f32.mrb[0].mxu0 }
 0x67b   : >> { %v3452_v40 = vpop.f32.mrb[0].mxu1  ;;  %v3314_v9 = vpop.f32.mrb[1].mxu0 }
 0x67c   : >> { %v3453_v3 = vadd.f32 %v3452_v40, %v3312_v20  ;;  %v3454_v21 = vpop.f32.mrb[1].mxu1  ;;  %v3315_v56 = vpop.f32.mrb[2].mxu0 }
 0x67d   : >> { %v3455_v15 = vpop.f32.mrb[2].mxu1  ;;  %v3317_v53 = vpop.f32.mrb[3].mxu0 }
 0x67e   : >> { %v3456_v12 = vadd.f32 %v3455_v15, %v3315_v56  ;;  %v3457_v7 = vpop.f32.mrb[3].mxu1 }
 0x682   : >> { %v3320_v24 = vpop.f32.mrb[4].mxu0 }
 0x683   : >> { %v3460_v10 = vpop.f32.mrb[4].mxu1  ;;  %v3322_v18 = vpop.f32.mrb[5].mxu0 }
 0x684   : >> { %v3461_v35 = vadd.f32 %v3460_v10, %v3320_v24  ;;  %v3462_v61 = vpop.f32.mrb[5].mxu1  ;;  %v3323_v6 = vpop.f32.mrb[6].mxu0  ;;  %v6941_v24 = vld [vmem:[#allocation27_spill] sm:$0xff] }
 0x685   : >> { %v3463_v25 = vpop.f32.mrb[6].mxu1  ;;  %v3325_v5 = vpop.f32.mrb[7].mxu0 }
 0x686   : >> { %v3464_v49 = vadd.f32 %v3463_v25, %v3323_v6  ;;  %v3465_v43 = vpop.f32.mrb[7].mxu1 }
 0x68a   : >> { %v3328_v30 = vpop.f32.mrb[8].mxu0 }
 0x68b   : >> { %v3468_v19 = vpop.f32.mrb[8].mxu1  ;;  %v3330_v2 = vpop.f32.mrb[9].mxu0 }
 0x68c   : >> { %v3469_v31 = vadd.f32 %v3468_v19, %v3328_v30  ;;  %v3470_v14 = vpop.f32.mrb[9].mxu1  ;;  %v3331_v13 = vpop.f32.mrb[10].mxu0 }
 0x68d   : >> { %v3471_v1 = vpop.f32.mrb[10].mxu1  ;;  %v3333_v0 = vpop.f32.mrb[11].mxu0 }
 0x68e   : >> { %v3472_v50 = vadd.f32 %v3471_v1, %v3331_v13  ;;  %v3473_v60 = vpop.f32.mrb[11].mxu1 }
 0x692   : >> { %v3336_v23 = vpop.f32.mrb[12].mxu0 }
 0x693   : >> { %v3476_v17 = vpop.f32.mrb[12].mxu1  ;;  %v3338_v58 = vpop.f32.mrb[13].mxu0 }
 0x694   : >> { %v3477_v51 = vadd.f32 %v3476_v17, %v3336_v23  ;;  %v3478_v46 = vpop.f32.mrb[13].mxu1  ;;  %v3339_v55 = vpop.f32.mrb[14].mxu0 }
 0x695   : >> { %v3479_v45 = vpop.f32.mrb[14].mxu1  ;;  %v3341_v32 = vpop.f32.mrb[15].mxu0 }
 0x696   : >> { %v3480_v11 = vadd.f32 %v3479_v45, %v3339_v55  ;;  %v3481_v39 = vpop.f32.mrb[15].mxu1 }
 0x6aa   : >> { %v3625_v8 = vpop.f32.mrb[16].mxu0 }
 0x6ab   : >> { %v3656_v59 = vadd.f32 %v3625_v8, %v3453_v3  ;;  %v3649_v38 = vpop.f32.mrb[16].mxu1  ;;  %v3627_v22 = vpop.f32.mrb[17].mxu0 }
 0x6ac   : >> { %v3662_v4 = vadd.f32 %v3649_v38, %v3477_v51  ;;  %v3651_v20 = vpop.f32.mrb[17].mxu1  ;;  %v3628_v40 = vpop.f32.mrb[18].mxu0 }
 0x6ad   : >> { %v3657_v9 = vadd.f32 %v3628_v40, %v3456_v12  ;;  %v3652_v21 = vpop.f32.mrb[18].mxu1  ;;  %v3630_v56 = vpop.f32.mrb[19].mxu0  ;;  %v3670_v10 = vadd.f32 %v6941_v24, %v3656_v59 }
 0x6ae   : >> { %v3663_v15 = vadd.f32 %v3652_v21, %v3480_v11  ;;  %v3654_v53 = vpop.f32.mrb[19].mxu1  ;;  %v3676_v1 = vadd.f32 %v6941_v24, %v3662_v4 }
 0x6af   : >> { %v3671_v25 = vadd.f32 %v6941_v24, %v3657_v9  ;;  %v3678_v30 = vmax.f32 %v3670_v10, 0.0 }
 0x6b0   : >> { %v3677_v17 = vadd.f32 %v6941_v24, %v3663_v15  ;;  %v3684_v32 = vmax.f32 %v3676_v1, 0.0 }
 0x6b1   : >> { %v3679_v2 = vmax.f32 %v3671_v25, 0.0 }
 0x6b2   : >> { %v3633_v7 = vpop.f32.mrb[20].mxu0  ;;  %v3685_v4 = vmax.f32 %v3677_v17, 0.0 }
 0x6b3   : >> { %v3658_v18 = vadd.f32 %v3633_v7, %v3461_v35  ;;  %v3635_v61 = vpop.f32.mrb[21].mxu0  ;;  %v6943_v7 = vld [vmem:[#allocation26_spill] sm:$0xff] }
 0x6b4   : >> { %v3636_v6 = vpop.f32.mrb[22].mxu0 }
 0x6b5   : >> { %v3672_v3 = vadd.f32 %v6941_v24, %v3658_v18  ;;  %v3659_v5 = vadd.f32 %v3636_v6, %v3464_v49  ;;  %v3638_v43 = vpop.f32.mrb[23].mxu0 }
 0x6b7   : >> { %v3680_v19 = vmax.f32 %v3672_v3, 0.0  ;;  %v3673_v12 = vadd.f32 %v6941_v24, %v3659_v5 }
 0x6b9   : >> { %v3686_v14 = vmax.f32 %v3678_v30, %v3680_v19  ;;  %v3681_v13 = vmax.f32 %v3673_v12, 0.0 }
 0x6ba   : >> { %v3641_v0 = vpop.f32.mrb[24].mxu0 }
 0x6bb   : >> { %v3687_v60 = vmax.f32 %v3679_v2, %v3681_v13  ;;  %v3660_v35 = vadd.f32 %v3641_v0, %v3469_v31  ;;  %v3643_v23 = vpop.f32.mrb[25].mxu0  ;;  %v3688_v51 = vrot.slane %v3686_v14, 1 }
 0x6bc   : >> { %v3644_v58 = vpop.f32.mrb[26].mxu0 }
 0x6bd   : >> { %v3689_v46 = vrot.slane %v3687_v60, 1  ;;  %v3674_v49 = vadd.f32 %v6941_v24, %v3660_v35  ;;  %v3661_v55 = vadd.f32 %v3644_v58, %v3472_v50  ;;  %v3646_v45 = vpop.f32.mrb[27].mxu0 }
 0x6bf   : >> { %v3691_v39 = vsel %vm1149_vm10, %v3688_v51, %v3689_v46  ;;  %v3692_v8 = vsel %vm1149_vm10, %v3689_v46, %v3688_v51  ;;  %v3682_v59 = vmax.f32 %v3674_v49, 0.0  ;;  %v3675_v31 = vadd.f32 %v6941_v24, %v3661_v55 }
 0x6c0   : >> { %v3693_v38 = vmax.f32 %v3686_v14, %v3691_v39  ;;  %v3694_v22 = vmax.f32 %v3687_v60, %v3692_v8 }
 0x6c1   : >> { %v3747_v20 = vmax.f32 %v3682_v59, %v3684_v32  ;;  %v3683_v40 = vmax.f32 %v3675_v31, 0.0 }
 0x6c2   : >> { %v3695_v9 = vpack.c.bf16 %v3694_v22, %v3693_v38 }
 0x6c3   : >> { %v3748_v21 = vmax.f32 %v3683_v40, %v3685_v4  ;;  %v3749_v50 = vrot.slane %v3747_v20, 1 }
 0x6c4   : >> { %4563 = vmatpush3.bf16.msra.mxu1 %v3695_v9 }
 0x6c5   : >> { %v3750_v56 = vrot.slane %v3748_v21, 1  ;;  %4568 = vmatprep.subr.bf16.mxu1 %v4760_v36 }
 0x6c7   : >> { %v3751_v15 = vsel %vm1149_vm10, %v3749_v50, %v3750_v56  ;;  %v3752_v53 = vsel %vm1149_vm10, %v3750_v56, %v3749_v50  ;;  %4565 = vmatmul.mubr.msk.bf16.vlgmr.msra.gmra.mrb[20].mxu1 %vm3696_vm2, %v6943_v7 }
 0x6c8   : >> { %v3753_v10 = vmax.f32 %v3747_v20, %v3751_v15  ;;  %v3754_v18 = vmax.f32 %v3748_v21, %v3752_v53  ;;  %4570 = vmatprep.mubr.msk.bf16.mxu1 %vm4761_vm1, %v4760_v36 }
 0x6ca   : >> { %v3755_v61 = vpack.c.bf16 %v3754_v18, %v3753_v10 }
 0x6cc   : >> { %4569 = vmatpush3.bf16.msra.mxu1 %v3755_v61 }
 0x6cf   : >> { %4571 = vmatmul.mubr.msk.bf16.vlgmr.msra.gmra.mrb[24].mxu1 %vm3696_vm2, %v6943_v7 }
 0x79a   : >> { %v3734_v6 = vpop.f32.mrb[20].mxu1 }
 0x79b   : >> { %v3740_v25 = vpack.c.bf16 %v3734_v6, %v3734_v6  ;;  %v4566_v3 = vpop.f32.mrb[21].mxu1 }
 0x79c   : >> { %v3737_v5 = vpop.f32.mrb[22].mxu1 }
 0x79d   : >> { %3746 = vst [vmem:[%s3745_s11] sm:$0xf] %v3740_v25  ;;  %v4567_v43 = vpop.f32.mrb[23].mxu1 }
 0x79f   : > { %2819 = sbr.rel (!%p2817_p6) target bundleno = 1308 (0x51c), region = 144 }
 0x7a2   : >> { %v3790_v36 = vpop.f32.mrb[24].mxu1 }
 0x7a3   : >> { %v3798_v30 = vpack.c.bf16 %v3790_v36, %v3790_v36  ;;  %v4572_v19 = vpop.f32.mrb[25].mxu1 }
 0x7a4   : >> { %v3793_v12 = vpop.f32.mrb[26].mxu1 }
 0x7a5   : >> { %3804 = vst [vmem:[%s3803_s14] sm:$0xf] %v3798_v30  ;;  %v4573_v2 = vpop.f32.mrb[27].mxu1 }
 0x7a6 PF: > { %s17_s24 = sadd.s32 1, %s4738_s24  }
 0x7a7   : > { %p14_p7 = scmp.ge.s32.totalorder %s17_s24, 4  }
 0x7a9   :  { %16 = sbr.rel (!%p14_p7) target bundleno = 1 (0x1), region = 155 }

// kernel: icon_cnn_forward.3
= control target key start
LH: loop header
LB: loop body
LE: loop exit
PB: predicated region body
PF: predicated region fallthrough
CT: control target
= control target key end

     0   :  { %10 = vsyncpa [#allocation4], 0  ;;  %s3280_s18 = smov 0   ;;  %s3750_s0 = inlined_call_operand.vmem [shape: bf16[2,8192], index: 0, kind: input, shape index: {}]   ;;  %s3751_s1 = inlined_call_operand.vmem [shape: bf16[8192,256], index: 1, kind: input, shape index: {}]   ;;  %s3752_s2 = inlined_call_operand.vmem [shape: f32[1,256], index: 2, kind: input, shape index: {}]   ;;  %s3753_s3 = inlined_call_operand.vmem [shape: f32[256,2], index: 3, kind: input, shape index: {}]   ;;  %s3754_s4 = inlined_call_operand.vmem [shape: f32[1,2], index: 4, kind: input, shape index: {}]   ;;  %s3755_s5 = inlined_call_operand.hbm [shape: f32[2,2], index: 5, kind: output, shape index: {}]  }
   0x1 LB: > { %s3286_s19 = sadd.s32 4294967295, %s3244_s18   ;;  %p2442_p0 = scmp.ge.s32.totalorder %s3244_s18, 1  ;;  %s3244_s18 = sphi %s3280_s18, %s16_s18  }
   0x2   : > { %p195_p1 = scmp.lt.s32.totalorder %s3244_s18, 5 }
   0x4   : > { %p196_p2 = pnand %p2442_p0, %p195_p1 }
   0x5   : > { %s2443_s20 = sshll.u32 (!%p196_p2), %s3286_s19, 4  ;;  %s2444_s21 = sshll.u32 (!%p196_p2), %s3286_s19, 8 }
   0x6   : > { %199 = sbr.rel (%p196_p2) target bundleno = 761 (0x2f9), region = 40  ;;  %p224_p3 = scmp.lt.s32.totalorder (!%p196_p2), %s2443_s20, 63 }
   0x7   : > { %p229_p4 = scmp.lt.s32.totalorder (!%p196_p2), %s2444_s21, 1023  ;;  %p2447_p5 = scmp.ne.s32.totalorder (!%p196_p2), %s3286_s19, 0 }
   0xd   : > { %s3757_s20 = smov (!%p224_p3, %s2443_s20), 63  ;;  %s3759_s21 = smov (!%p229_p4, %s2444_s21), 1023 }
   0xe   : > { %s3295_s24 = scalar_lea.vmem %s3750_s0, %s3757_s20  ;;  %s2710_s25 = sshll.u32 %s3759_s21, 3  ;;  %v3246_v0 = vmov (!%p2447_p5), 0.0  }
   0xf   : > { %s3300_s28 = scalar_lea.vmem %s3751_s1, %s2710_s25  ;;  %238 = sbr.rel (%p2447_p5) target bundleno = 22 (0x16), region = 44  ;;  %239 = vst [vmem:[#allocation2] sm:$0xf] (!%p2447_p5), %v3246_v0 }
  0x16 PF: > { %v2822_v1 = vld [vmem:[%s3300_s28 + $0x4] ss:$8 sps:$4 sm:$0xff]   ;;  %v2826_v3 = vld [vmem:[%s3300_s28] ss:$8 sps:$4 sm:$0xff]   ;;  %v2828_v5 = vld [vmem:[%s3300_s28 + $0x14] ss:$8 sps:$4 sm:$0xff]   ;;  %v505_v39 = vlaneseq }
  0x17   : > { %v2824_v2 = vld [vmem:[%s3300_s28 + $0x404] ss:$8 sps:$4 sm:$0xff]   ;;  %1895 = vmatprep.subr.bf16.mxu1 %v2822_v1  ;;  %v2827_v4 = vld [vmem:[%s3300_s28 + $0x400] ss:$8 sps:$4 sm:$0xff]   ;;  %v2830_v6 = vld [vmem:[%s3300_s28 + $0x414] ss:$8 sps:$4 sm:$0xff]  }
  0x18   : > { %2059 = vmatprep.subr.bf16.mxu0 %v2824_v2  ;;  %1896 = vmatpush1.bf16.msra.mxu1 %v2826_v3  ;;  %v2832_v7 = vld [vmem:[%s3300_s28 + $0x10] ss:$8 sps:$4 sm:$0xff]   ;;  %v2834_v9 = vld [vmem:[%s3300_s28 + $0x24] ss:$8 sps:$4 sm:$0xff]   ;;  %v2838_v11 = vld [vmem:[%s3300_s28 + $0x20] ss:$8 sps:$4 sm:$0xff]  }
  0x19   : > { %2060 = vmatpush1.bf16.msra.mxu0 %v2827_v4  ;;  %1897 = vmatprep.subr.bf16.mxu1 %v2828_v5  ;;  %v2833_v8 = vld [vmem:[%s3300_s28 + $0x410] ss:$8 sps:$4 sm:$0xff]   ;;  %v2836_v10 = vld [vmem:[%s3300_s28 + $0x424] ss:$8 sps:$4 sm:$0xff]   ;;  %v2839_v12 = vld [vmem:[%s3300_s28 + $0x420] ss:$8 sps:$4 sm:$0xff]  }
  0x1a   : > { %2061 = vmatprep.subr.bf16.mxu0 %v2830_v6  ;;  %v2840_v13 = vld [vmem:[%s3300_s28 + $0x34] ss:$8 sps:$4 sm:$0xff]   ;;  %v2844_v15 = vld [vmem:[%s3300_s28 + $0x30] ss:$8 sps:$4 sm:$0xff]   ;;  %v2846_v17 = vld [vmem:[%s3300_s28 + $0x44] ss:$8 sps:$4 sm:$0xff]  }
  0x1b   : > { %v2842_v14 = vld [vmem:[%s3300_s28 + $0x434] ss:$8 sps:$4 sm:$0xff]   ;;  %v2845_v16 = vld [vmem:[%s3300_s28 + $0x430] ss:$8 sps:$4 sm:$0xff]   ;;  %v2848_v18 = vld [vmem:[%s3300_s28 + $0x444] ss:$8 sps:$4 sm:$0xff]  }
  0x1c   : > { %1898 = vmatpush1.bf16.msra.mxu1 %v2832_v7  ;;  %v2850_v19 = vld [vmem:[%s3300_s28 + $0x40] ss:$8 sps:$4 sm:$0xff]   ;;  %v2852_v21 = vld [vmem:[%s3300_s28 + $0x54] ss:$8 sps:$4 sm:$0xff]   ;;  %v2856_v23 = vld [vmem:[%s3300_s28 + $0x50] ss:$8 sps:$4 sm:$0xff]  }
  0x1d   : > { %2062 = vmatpush1.bf16.msra.mxu0 %v2833_v8  ;;  %1899 = vmatprep.subr.bf16.mxu1 %v2834_v9  ;;  %v2851_v20 = vld [vmem:[%s3300_s28 + $0x440] ss:$8 sps:$4 sm:$0xff]   ;;  %v2854_v22 = vld [vmem:[%s3300_s28 + $0x454] ss:$8 sps:$4 sm:$0xff]   ;;  %v2857_v24 = vld [vmem:[%s3300_s28 + $0x450] ss:$8 sps:$4 sm:$0xff]  }
  0x1e   : > { %2063 = vmatprep.subr.bf16.mxu0 %v2836_v10  ;;  %v2858_v25 = vld [vmem:[%s3300_s28 + $0x64] ss:$8 sps:$4 sm:$0xff]   ;;  %v2862_v27 = vld [vmem:[%s3300_s28 + $0x60] ss:$8 sps:$4 sm:$0xff]   ;;  %v2864_v29 = vld [vmem:[%s3300_s28 + $0x74] ss:$8 sps:$4 sm:$0xff]  }
  0x1f   : > { %v2860_v26 = vld [vmem:[%s3300_s28 + $0x464] ss:$8 sps:$4 sm:$0xff]   ;;  %v2863_v28 = vld [vmem:[%s3300_s28 + $0x460] ss:$8 sps:$4 sm:$0xff]   ;;  %v2866_v30 = vld [vmem:[%s3300_s28 + $0x474] ss:$8 sps:$4 sm:$0xff]  }
  0x20   : > { %1900 = vmatpush1.bf16.msra.mxu1 %v2838_v11  ;;  %v2868_v31 = vld [vmem:[%s3300_s28 + $0x70] ss:$8 sps:$4 sm:$0xff]   ;;  %v2870_v33 = vld [vmem:[%s3300_s28 + $0x84] ss:$8 sps:$4 sm:$0xff]   ;;  %v2874_v35 = vld [vmem:[%s3300_s28 + $0x80] ss:$8 sps:$4 sm:$0xff]  }
  0x21   : > { %2064 = vmatpush1.bf16.msra.mxu0 %v2839_v12  ;;  %1901 = vmatprep.subr.bf16.mxu1 %v2840_v13  ;;  %v2869_v32 = vld [vmem:[%s3300_s28 + $0x470] ss:$8 sps:$4 sm:$0xff]   ;;  %v2872_v34 = vld [vmem:[%s3300_s28 + $0x484] ss:$8 sps:$4 sm:$0xff]   ;;  %v2875_v36 = vld [vmem:[%s3300_s28 + $0x480] ss:$8 sps:$4 sm:$0xff]  }
  0x22   : > { %2065 = vmatprep.subr.bf16.mxu0 %v2842_v14  ;;  %v3247_v37 = vmov 1966171168   ;;  %v2876_v40 = vld [vmem:[%s3300_s28 + $0x94] ss:$8 sps:$4 sm:$0xff]   ;;  %v2880_v42 = vld [vmem:[%s3300_s28 + $0x90] ss:$8 sps:$4 sm:$0xff]  }
  0x23   : > { %v503_v38 = vunpack.c.l.s4 %v3247_v37  ;;  %v2878_v41 = vld [vmem:[%s3300_s28 + $0x494] ss:$8 sps:$4 sm:$0xff]   ;;  %v3342_v44 = vshrl.u32 %v505_v39, 7  ;;  %v2881_v45 = vld [vmem:[%s3300_s28 + $0x490] ss:$8 sps:$4 sm:$0xff]   ;;  %v241_v53 = vld [vmem:[%s3295_s24] sm:$0xff] }
  0x24   : > { %1902 = vmatpush1.bf16.msra.mxu1 %v2844_v15  ;;  %v2882_v46 = vld [vmem:[%s3300_s28 + $0xa4] ss:$8 sps:$4 sm:$0xff]   ;;  %v2886_v48 = vld [vmem:[%s3300_s28 + $0xa0] ss:$8 sps:$4 sm:$0xff]   ;;  %v2888_v51 = vld [vmem:[%s3300_s28 + $0xb4] ss:$8 sps:$4 sm:$0xff]   ;;  %v501_v13 = vcombine.high %v241_v53, %v241_v53 }
  0x25   : > { %2066 = vmatpush1.bf16.msra.mxu0 %v2845_v16  ;;  %1903 = vmatprep.subr.bf16.mxu1 %v2846_v17  ;;  %v504_v43 = vunpack.c.0.s8 %v503_v38  ;;  %v2884_v47 = vld [vmem:[%s3300_s28 + $0x4a4] ss:$8 sps:$4 sm:$0xff]   ;;  %v2887_v49 = vld [vmem:[%s3300_s28 + $0x4a0] ss:$8 sps:$4 sm:$0xff]   ;;  %v2890_v52 = vld [vmem:[%s3300_s28 + $0x4b4] ss:$8 sps:$4 sm:$0xff]  }
  0x26   : > { %2067 = vmatprep.subr.bf16.mxu0 %v2848_v18  ;;  %v2892_v54 = vld [vmem:[%s3300_s28 + $0xb0] ss:$8 sps:$4 sm:$0xff]   ;;  %v242_v57 = vld [vmem:[%s3295_s24 + $0x8] sm:$0xff]  ;;  %v2900_v2 = vld [vmem:[%s3300_s28 + $0xd4] ss:$8 sps:$4 sm:$0xff]   ;;  %p2704_p6 = scmp.ne.s32.totalorder %s3286_s19, 3 }
  0x27   : > { %v3350_v50 = vsub.s32 %v504_v43, %v3342_v44  ;;  %v2893_v56 = vld [vmem:[%s3300_s28 + $0x4b0] ss:$8 sps:$4 sm:$0xff]   ;;  %v2894_v58 = vld [vmem:[%s3300_s28 + $0xc4] ss:$8 sps:$4 sm:$0xff]   ;;  %v2898_v0 = vld [vmem:[%s3300_s28 + $0xc0] ss:$8 sps:$4 sm:$0xff]   ;;  %v550_v14 = vcombine.high %v242_v57, %v242_v57 }
  0x28   : > { %1904 = vmatpush1.bf16.msra.mxu1 %v2850_v19  ;;  %v2896_v59 = vld [vmem:[%s3300_s28 + $0x4c4] ss:$8 sps:$4 sm:$0xff]   ;;  %v2899_v1 = vld [vmem:[%s3300_s28 + $0x4c0] ss:$8 sps:$4 sm:$0xff]   ;;  %v2902_v3 = vld [vmem:[%s3300_s28 + $0x4d4] ss:$8 sps:$4 sm:$0xff]  }
  0x29   : > { %2068 = vmatpush1.bf16.msra.mxu0 %v2851_v20  ;;  %1905 = vmatprep.subr.bf16.mxu1 %v2852_v21  ;;  %v508_v55 = vrot.slane %v241_v53, %v3350_v50  ;;  %v557_v61 = vrot.slane %v242_v57, %v3350_v50  ;;  %v2904_v5 = vld [vmem:[%s3300_s28 + $0xd0] ss:$8 sps:$4 sm:$0xff]   ;;  %v2906_v7 = vld [vmem:[%s3300_s28 + $0xe4] ss:$8 sps:$4 sm:$0xff]   ;;  %v2910_v9 = vld [vmem:[%s3300_s28 + $0xe0] ss:$8 sps:$4 sm:$0xff]   ;;  %v515_v19 = vrot.slane %v501_v13, %v3350_v50 }
  0x2a   : > { %2069 = vmatprep.subr.bf16.mxu0 %v2854_v22  ;;  %v2905_v6 = vld [vmem:[%s3300_s28 + $0x4d0] ss:$8 sps:$4 sm:$0xff]   ;;  %v2908_v8 = vld [vmem:[%s3300_s28 + $0x4e4] ss:$8 sps:$4 sm:$0xff]   ;;  %v2911_v10 = vld [vmem:[%s3300_s28 + $0x4e0] ss:$8 sps:$4 sm:$0xff]   ;;  %v564_v20 = vrot.slane %v550_v14, %v3350_v50 }
  0x2b   : > { %v516_v60 = vcombine.high %v508_v55, %v508_v55  ;;  %v565_v63 = vcombine.high %v557_v61, %v557_v61  ;;  %v2912_v11 = vld [vmem:[%s3300_s28 + $0xf4] ss:$8 sps:$4 sm:$0xff]   ;;  %v2916_v15 = vld [vmem:[%s3300_s28 + $0xf0] ss:$8 sps:$4 sm:$0xff]   ;;  %v2921_v17 = vld [vmem:[%s3300_s28 + $0x104] ss:$8 sps:$4 sm:$0xff]   ;;  %v3386_v21 = vrot.slane %v508_v55, %v3350_v50  ;;  %v3389_v22 = vrot.slane %v557_v61, %v3350_v50 }
  0x2c   : > { %1906 = vmatpush1.bf16.msra.mxu1 %v2856_v23  ;;  %v2914_v12 = vld [vmem:[%s3300_s28 + $0x4f4] ss:$8 sps:$4 sm:$0xff]   ;;  %v2917_v16 = vld [vmem:[%s3300_s28 + $0x4f0] ss:$8 sps:$4 sm:$0xff]   ;;  %v2925_v18 = vld [vmem:[%s3300_s28 + $0x504] ss:$8 sps:$4 sm:$0xff]   ;;  %v517_v23 = vcombine.high %v515_v19, %v515_v19 }
  0x2d   : > { %2070 = vmatpush1.bf16.msra.mxu0 %v2857_v24  ;;  %1907 = vmatprep.subr.bf16.mxu1 %v2858_v25  ;;  %v3363_v62 = vrot.slane %v516_v60, %v3350_v50  ;;  %v587_v4 = vrot.slane %v565_v63, %v3350_v50  ;;  %v566_v24 = vcombine.high %v564_v20, %v564_v20  ;;  %v2919_v25 = vld [vmem:[%s3300_s28 + $0x100] ss:$8 sps:$4 sm:$0xff]   ;;  %v2934_v37 = vld [vmem:[%s3300_s28 + $0x124] ss:$8 sps:$4 sm:$0xff]   ;;  %v2938_v43 = vld [vmem:[%s3300_s28 + $0x130] ss:$8 sps:$4 sm:$0xff]  }
  0x2e   : > { %2071 = vmatprep.subr.bf16.mxu0 %v2860_v26  ;;  %v2923_v26 = vld [vmem:[%s3300_s28 + $0x500] ss:$8 sps:$4 sm:$0xff]   ;;  %v2937_v38 = vld [vmem:[%s3300_s28 + $0x524] ss:$8 sps:$4 sm:$0xff]   ;;  %v2953_v53 = vld [vmem:[%s3300_s28 + $0x550] ss:$8 sps:$4 sm:$0xff]  }
  0x2f   : > { %1927 = vmatprep.mubr.bf16.mxu1 %v3363_v62  ;;  %2091 = vmatprep.mubr.bf16.mxu0 %v587_v4  ;;  %v2932_v39 = vld [vmem:[%s3300_s28 + $0x120] ss:$8 sps:$4 sm:$0xff]   ;;  %v2961_v55 = vld [vmem:[%s3300_s28 + $0x564] ss:$8 sps:$4 sm:$0xff]   ;;  %v2962_v60 = vld [vmem:[%s3300_s28 + $0x170] ss:$8 sps:$4 sm:$0xff]  }
  0x30   : > { %1908 = vmatpush1.bf16.msra.mxu1 %v2862_v27  ;;  %v2928_v27 = vld [vmem:[%s3300_s28 + $0x114] ss:$8 sps:$4 sm:$0xff]   ;;  %v2959_v57 = vld [vmem:[%s3300_s28 + $0x560] ss:$8 sps:$4 sm:$0xff]   ;;  %v2965_v61 = vld [vmem:[%s3300_s28 + $0x570] ss:$8 sps:$4 sm:$0xff]  }
  0x31   : > { %2072 = vmatpush1.bf16.msra.mxu0 %v2863_v28  ;;  %1909 = vmatprep.subr.bf16.mxu1 %v2864_v29  ;;  %v2931_v28 = vld [vmem:[%s3300_s28 + $0x514] ss:$8 sps:$4 sm:$0xff]   ;;  %v3396_v29 = vrot.slane %v517_v23, %v3350_v50  ;;  %v2973_v63 = vld [vmem:[%s3300_s28 + $0x584] ss:$8 sps:$4 sm:$0xff]   ;;  %v2989_v13 = vld [vmem:[%s3300_s28 + $0x5b0] ss:$8 sps:$4 sm:$0xff]  }
  0x32   : > { %2073 = vmatprep.subr.bf16.mxu0 %v2866_v30  ;;  %v3399_v30 = vrot.slane %v566_v24, %v3350_v50  ;;  %v2994_v14 = vld [vmem:[%s3300_s28 + $0x1c4] ss:$8 sps:$4 sm:$0xff]   ;;  %v3001_v23 = vld [vmem:[%s3300_s28 + $0x5d0] ss:$8 sps:$4 sm:$0xff]   ;;  %vm2382_vm0 = vcmask (!%p2704_p6), 9216  }
  0x33   : > { %v3006_v24 = vld [vmem:[%s3300_s28 + $0x1e4] ss:$8 sps:$4 sm:$0xff]  }
  0x34   : > { %1910 = vmatpush1.bf16.msra.mxu1 %v2868_v31  ;;  %v3402_v31 = vrot.slane %v515_v19, %v3350_v50  ;;  %v3003_v19 = vld [vmem:[%s3300_s28 + $0x5d4] ss:$8 sps:$4 sm:$0xff]  }
  0x35   : > { %2074 = vmatpush1.bf16.msra.mxu0 %v2869_v32  ;;  %1911 = vmatprep.subr.bf16.mxu1 %v2870_v33  ;;  %v548_v32 = vcombine.high %v3363_v62, %v3363_v62  ;;  %v597_v33 = vcombine.high %v587_v4, %v587_v4  ;;  %v2970_v62 = vld [vmem:[%s3300_s28 + $0x184] ss:$8 sps:$4 sm:$0xff]   ;;  %v2974_v4 = vld [vmem:[%s3300_s28 + $0x190] ss:$8 sps:$4 sm:$0xff]  }
  0x36   : > { %2075 = vmatprep.subr.bf16.mxu0 %v2872_v34  ;;  %v3407_v34 = vrot.slane %v564_v20, %v3350_v50  ;;  %v2952_v50 = vld [vmem:[%s3300_s28 + $0x154] ss:$8 sps:$4 sm:$0xff]   ;;  %v2998_v20 = vld [vmem:[%s3300_s28 + $0x1d0] ss:$8 sps:$4 sm:$0xff]  }
  0x38   : > { %1912 = vmatpush1.bf16.msra.mxu1 %v2874_v35  ;;  %v2926_v35 = vld [vmem:[%s3300_s28 + $0x110] ss:$8 sps:$4 sm:$0xff]  }
  0x39   : > { %2076 = vmatpush1.bf16.msra.mxu0 %v2875_v36  ;;  %1913 = vmatprep.subr.bf16.mxu1 %v2876_v40  ;;  %v2929_v36 = vld [vmem:[%s3300_s28 + $0x510] ss:$8 sps:$4 sm:$0xff]   ;;  %v2935_v40 = vld [vmem:[%s3300_s28 + $0x520] ss:$8 sps:$4 sm:$0xff]  }
  0x3a   : > { %2077 = vmatprep.subr.bf16.mxu0 %v2878_v41  ;;  %v2940_v41 = vld [vmem:[%s3300_s28 + $0x134] ss:$8 sps:$4 sm:$0xff]  }
  0x3c   : > { %1914 = vmatpush1.bf16.msra.mxu1 %v2880_v42  ;;  %v2943_v42 = vld [vmem:[%s3300_s28 + $0x534] ss:$8 sps:$4 sm:$0xff]  }
  0x3d   : > { %2078 = vmatpush1.bf16.msra.mxu0 %v2881_v45  ;;  %1915 = vmatprep.subr.bf16.mxu1 %v2882_v46  ;;  %v2941_v45 = vld [vmem:[%s3300_s28 + $0x530] ss:$8 sps:$4 sm:$0xff]   ;;  %v2946_v46 = vld [vmem:[%s3300_s28 + $0x144] ss:$8 sps:$4 sm:$0xff]  }
  0x3e   : > { %2079 = vmatprep.subr.bf16.mxu0 %v2884_v47  ;;  %v2949_v47 = vld [vmem:[%s3300_s28 + $0x544] ss:$8 sps:$4 sm:$0xff]  }
  0x40   : > { %1916 = vmatpush1.bf16.msra.mxu1 %v2886_v48  ;;  %v2944_v48 = vld [vmem:[%s3300_s28 + $0x140] ss:$8 sps:$4 sm:$0xff]  }
  0x41   : > { %2080 = vmatpush1.bf16.msra.mxu0 %v2887_v49  ;;  %1917 = vmatprep.subr.bf16.mxu1 %v2888_v51  ;;  %v2947_v49 = vld [vmem:[%s3300_s28 + $0x540] ss:$8 sps:$4 sm:$0xff]   ;;  %v2955_v51 = vld [vmem:[%s3300_s28 + $0x554] ss:$8 sps:$4 sm:$0xff]  }
  0x42   : > { %2081 = vmatprep.subr.bf16.mxu0 %v2890_v52  ;;  %v2950_v52 = vld [vmem:[%s3300_s28 + $0x150] ss:$8 sps:$4 sm:$0xff]  }
  0x44   : > { %1918 = vmatpush1.bf16.msra.mxu1 %v2892_v54  ;;  %v2958_v54 = vld [vmem:[%s3300_s28 + $0x164] ss:$8 sps:$4 sm:$0xff]  }
  0x45   : > { %2082 = vmatpush1.bf16.msra.mxu0 %v2893_v56  ;;  %1919 = vmatprep.subr.bf16.mxu1 %v2894_v58  ;;  %v2956_v56 = vld [vmem:[%s3300_s28 + $0x160] ss:$8 sps:$4 sm:$0xff]   ;;  %v2964_v58 = vld [vmem:[%s3300_s28 + $0x174] ss:$8 sps:$4 sm:$0xff]  }
  0x46   : > { %2083 = vmatprep.subr.bf16.mxu0 %v2896_v59  ;;  %v2967_v59 = vld [vmem:[%s3300_s28 + $0x574] ss:$8 sps:$4 sm:$0xff]  }
  0x48   : > { %1920 = vmatpush1.bf16.msra.mxu1 %v2898_v0  ;;  %v2968_v0 = vld [vmem:[%s3300_s28 + $0x180] ss:$8 sps:$4 sm:$0xff]  }
  0x49   : > { %2084 = vmatpush1.bf16.msra.mxu0 %v2899_v1  ;;  %1921 = vmatprep.subr.bf16.mxu1 %v2900_v2  ;;  %v2971_v1 = vld [vmem:[%s3300_s28 + $0x580] ss:$8 sps:$4 sm:$0xff]   ;;  %v2976_v2 = vld [vmem:[%s3300_s28 + $0x194] ss:$8 sps:$4 sm:$0xff]  }
  0x4a   : > { %2085 = vmatprep.subr.bf16.mxu0 %v2902_v3  ;;  %v2979_v3 = vld [vmem:[%s3300_s28 + $0x594] ss:$8 sps:$4 sm:$0xff]  }
  0x4c   : > { %1922 = vmatpush1.bf16.msra.mxu1 %v2904_v5  ;;  %v2977_v5 = vld [vmem:[%s3300_s28 + $0x590] ss:$8 sps:$4 sm:$0xff]  }
  0x4d   : > { %2086 = vmatpush1.bf16.msra.mxu0 %v2905_v6  ;;  %1923 = vmatprep.subr.bf16.mxu1 %v2906_v7  ;;  %v2982_v6 = vld [vmem:[%s3300_s28 + $0x1a4] ss:$8 sps:$4 sm:$0xff]  }
  0x4e   : > { %2087 = vmatprep.subr.bf16.mxu0 %v2908_v8  ;;  %v2985_v7 = vld [vmem:[%s3300_s28 + $0x5a4] ss:$8 sps:$4 sm:$0xff]   ;;  %v2980_v8 = vld [vmem:[%s3300_s28 + $0x1a0] ss:$8 sps:$4 sm:$0xff]  }
  0x50   : > { %1924 = vmatpush1.bf16.msra.mxu1 %v2910_v9  ;;  %v2983_v9 = vld [vmem:[%s3300_s28 + $0x5a0] ss:$8 sps:$4 sm:$0xff]  }
  0x51   : > { %2088 = vmatpush1.bf16.msra.mxu0 %v2911_v10  ;;  %1925 = vmatprep.subr.bf16.mxu1 %v2912_v11  ;;  %v2988_v10 = vld [vmem:[%s3300_s28 + $0x1b4] ss:$8 sps:$4 sm:$0xff]  }
  0x52   : > { %2089 = vmatprep.subr.bf16.mxu0 %v2914_v12  ;;  %v2991_v11 = vld [vmem:[%s3300_s28 + $0x5b4] ss:$8 sps:$4 sm:$0xff]   ;;  %v2986_v12 = vld [vmem:[%s3300_s28 + $0x1b0] ss:$8 sps:$4 sm:$0xff]  }
  0x54   : > { %1926 = vmatpush1.bf16.msra.mxu1 %v2916_v15  ;;  %v2997_v15 = vld [vmem:[%s3300_s28 + $0x5c4] ss:$8 sps:$4 sm:$0xff]  }
  0x55   : > { %2090 = vmatpush1.bf16.msra.mxu0 %v2917_v16  ;;  %1936 = vmatprep.subr.bf16.mxu1 %v2921_v17  ;;  %v2992_v16 = vld [vmem:[%s3300_s28 + $0x1c0] ss:$8 sps:$4 sm:$0xff]  }
  0x56   : > { %2100 = vmatprep.subr.bf16.mxu0 %v2925_v18  ;;  %v2995_v17 = vld [vmem:[%s3300_s28 + $0x5c0] ss:$8 sps:$4 sm:$0xff]   ;;  %v3000_v18 = vld [vmem:[%s3300_s28 + $0x1d4] ss:$8 sps:$4 sm:$0xff]  }
  0x57   : > { %1928 = vmatmul.mubr.bf16.vlgmr.msra.gmra.mrb[0].mxu1 %v3386_v21 }
  0x58   : > { %2092 = vmatmul.mubr.bf16.vlgmr.msra.gmra.mrb[0].mxu0 %v3389_v22  ;;  %1937 = vmatpush1.bf16.msra.mxu1 %v2919_v25  ;;  %v3009_v25 = vld [vmem:[%s3300_s28 + $0x5e4] ss:$8 sps:$4 sm:$0xff]  }
  0x59   : > { %2101 = vmatpush1.bf16.msra.mxu0 %v2923_v26  ;;  %1938 = vmatprep.subr.bf16.mxu1 %v2928_v27  ;;  %v3004_v26 = vld [vmem:[%s3300_s28 + $0x1e0] ss:$8 sps:$4 sm:$0xff]  }
  0x5a   : > { %2102 = vmatprep.subr.bf16.mxu0 %v2931_v28  ;;  %1968 = vmatprep.mubr.bf16.mxu1 %v548_v32  ;;  %v3007_v27 = vld [vmem:[%s3300_s28 + $0x5e0] ss:$8 sps:$4 sm:$0xff]   ;;  %v3012_v28 = vld [vmem:[%s3300_s28 + $0x1f4] ss:$8 sps:$4 sm:$0xff]  }
  0x5b   : > { %2132 = vmatprep.mubr.bf16.mxu0 %v597_v33  ;;  %v3015_v32 = vld [vmem:[%s3300_s28 + $0x5f4] ss:$8 sps:$4 sm:$0xff]   ;;  %v3010_v33 = vld [vmem:[%s3300_s28 + $0x1f0] ss:$8 sps:$4 sm:$0xff]  }
  0x5c   : > { %1939 = vmatpush1.bf16.msra.mxu1 %v2926_v35  ;;  %v3013_v35 = vld [vmem:[%s3300_s28 + $0x5f0] ss:$8 sps:$4 sm:$0xff]  }
  0x5d   : > { %2103 = vmatpush1.bf16.msra.mxu0 %v2929_v36  ;;  %1940 = vmatprep.subr.bf16.mxu1 %v2934_v37  ;;  %v3018_v36 = vld [vmem:[%s3300_s28 + $0x204] ss:$8 sps:$4 sm:$0xff]  }
  0x5e   : > { %2104 = vmatprep.subr.bf16.mxu0 %v2937_v38  ;;  %v3021_v37 = vld [vmem:[%s3300_s28 + $0x604] ss:$8 sps:$4 sm:$0xff]   ;;  %v546_v38 = vcombine.high %v3386_v21, %v3386_v21  ;;  %v3022_v21 = vld [vmem:[%s3300_s28 + $0x210] ss:$8 sps:$4 sm:$0xff]  }
  0x60   : > { %1941 = vmatpush1.bf16.msra.mxu1 %v2932_v39  ;;  %v595_v39 = vcombine.high %v3389_v22, %v3389_v22  ;;  %v3025_v22 = vld [vmem:[%s3300_s28 + $0x610] ss:$8 sps:$4 sm:$0xff]  }
  0x61   : > { %2105 = vmatpush1.bf16.msra.mxu0 %v2935_v40  ;;  %1942 = vmatprep.subr.bf16.mxu1 %v2940_v41  ;;  %v3016_v40 = vld [vmem:[%s3300_s28 + $0x200] ss:$8 sps:$4 sm:$0xff]  }
  0x62   : > { %2106 = vmatprep.subr.bf16.mxu0 %v2943_v42  ;;  %v3019_v41 = vld [vmem:[%s3300_s28 + $0x600] ss:$8 sps:$4 sm:$0xff]   ;;  %v3024_v42 = vld [vmem:[%s3300_s28 + $0x214] ss:$8 sps:$4 sm:$0xff]  }
  0x64   : > { %1943 = vmatpush1.bf16.msra.mxu1 %v2938_v43  ;;  %v3027_v43 = vld [vmem:[%s3300_s28 + $0x614] ss:$8 sps:$4 sm:$0xff]  }
  0x65   : > { %2107 = vmatpush1.bf16.msra.mxu0 %v2941_v45  ;;  %1944 = vmatprep.subr.bf16.mxu1 %v2946_v46  ;;  %v3030_v45 = vld [vmem:[%s3300_s28 + $0x224] ss:$8 sps:$4 sm:$0xff]  }
  0x66   : > { %2108 = vmatprep.subr.bf16.mxu0 %v2949_v47  ;;  %v3033_v46 = vld [vmem:[%s3300_s28 + $0x624] ss:$8 sps:$4 sm:$0xff]   ;;  %v3028_v47 = vld [vmem:[%s3300_s28 + $0x220] ss:$8 sps:$4 sm:$0xff]  }
  0x68   : > { %1945 = vmatpush1.bf16.msra.mxu1 %v2944_v48  ;;  %v3031_v48 = vld [vmem:[%s3300_s28 + $0x620] ss:$8 sps:$4 sm:$0xff]  }
  0x69   : > { %2109 = vmatpush1.bf16.msra.mxu0 %v2947_v49  ;;  %1946 = vmatprep.subr.bf16.mxu1 %v2952_v50  ;;  %v3036_v49 = vld [vmem:[%s3300_s28 + $0x234] ss:$8 sps:$4 sm:$0xff]  }
  0x6a   : > { %2110 = vmatprep.subr.bf16.mxu0 %v2955_v51  ;;  %v3039_v50 = vld [vmem:[%s3300_s28 + $0x634] ss:$8 sps:$4 sm:$0xff]   ;;  %v3034_v51 = vld [vmem:[%s3300_s28 + $0x230] ss:$8 sps:$4 sm:$0xff]  }
  0x6c   : > { %1947 = vmatpush1.bf16.msra.mxu1 %v2950_v52  ;;  %v3037_v52 = vld [vmem:[%s3300_s28 + $0x630] ss:$8 sps:$4 sm:$0xff]  }
  0x6d   : > { %2111 = vmatpush1.bf16.msra.mxu0 %v2953_v53  ;;  %1948 = vmatprep.subr.bf16.mxu1 %v2958_v54  ;;  %v3042_v53 = vld [vmem:[%s3300_s28 + $0x244] ss:$8 sps:$4 sm:$0xff]  }
  0x6e   : > { %2112 = vmatprep.subr.bf16.mxu0 %v2961_v55  ;;  %v3045_v54 = vld [vmem:[%s3300_s28 + $0x644] ss:$8 sps:$4 sm:$0xff]   ;;  %v3040_v55 = vld [vmem:[%s3300_s28 + $0x240] ss:$8 sps:$4 sm:$0xff]  }
  0x70   : > { %1949 = vmatpush1.bf16.msra.mxu1 %v2956_v56  ;;  %v3043_v56 = vld [vmem:[%s3300_s28 + $0x640] ss:$8 sps:$4 sm:$0xff]  }
  0x71   : > { %2113 = vmatpush1.bf16.msra.mxu0 %v2959_v57  ;;  %1950 = vmatprep.subr.bf16.mxu1 %v2964_v58  ;;  %v3048_v57 = vld [vmem:[%s3300_s28 + $0x254] ss:$8 sps:$4 sm:$0xff]  }
  0x72   : > { %2114 = vmatprep.subr.bf16.mxu0 %v2967_v59  ;;  %v3051_v58 = vld [vmem:[%s3300_s28 + $0x654] ss:$8 sps:$4 sm:$0xff]   ;;  %v3046_v59 = vld [vmem:[%s3300_s28 + $0x250] ss:$8 sps:$4 sm:$0xff]  }
  0x74   : > { %1951 = vmatpush1.bf16.msra.mxu1 %v2962_v60  ;;  %v3049_v60 = vld [vmem:[%s3300_s28 + $0x650] ss:$8 sps:$4 sm:$0xff]  }
  0x75   : > { %2115 = vmatpush1.bf16.msra.mxu0 %v2965_v61  ;;  %1952 = vmatprep.subr.bf16.mxu1 %v2970_v62  ;;  %v3054_v61 = vld [vmem:[%s3300_s28 + $0x264] ss:$8 sps:$4 sm:$0xff]  }
  0x76   : > { %2116 = vmatprep.subr.bf16.mxu0 %v2973_v63  ;;  %v3057_v62 = vld [vmem:[%s3300_s28 + $0x664] ss:$8 sps:$4 sm:$0xff]   ;;  %v3052_v63 = vld [vmem:[%s3300_s28 + $0x260] ss:$8 sps:$4 sm:$0xff]  }
  0x78   : > { %1953 = vmatpush1.bf16.msra.mxu1 %v2968_v0  ;;  %v3055_v0 = vld [vmem:[%s3300_s28 + $0x660] ss:$8 sps:$4 sm:$0xff]  }
  0x79   : > { %2117 = vmatpush1.bf16.msra.mxu0 %v2971_v1  ;;  %1954 = vmatprep.subr.bf16.mxu1 %v2976_v2  ;;  %v3060_v1 = vld [vmem:[%s3300_s28 + $0x274] ss:$8 sps:$4 sm:$0xff]  }
  0x7a   : > { %2118 = vmatprep.subr.bf16.mxu0 %v2979_v3  ;;  %v3063_v2 = vld [vmem:[%s3300_s28 + $0x674] ss:$8 sps:$4 sm:$0xff]   ;;  %v3058_v3 = vld [vmem:[%s3300_s28 + $0x270] ss:$8 sps:$4 sm:$0xff]  }
  0x7c   : > { %1955 = vmatpush1.bf16.msra.mxu1 %v2974_v4  ;;  %v3061_v4 = vld [vmem:[%s3300_s28 + $0x670] ss:$8 sps:$4 sm:$0xff]  }
  0x7d   : > { %2119 = vmatpush1.bf16.msra.mxu0 %v2977_v5  ;;  %1956 = vmatprep.subr.bf16.mxu1 %v2982_v6  ;;  %v3066_v5 = vld [vmem:[%s3300_s28 + $0x284] ss:$8 sps:$4 sm:$0xff]  }
  0x7e   : > { %2120 = vmatprep.subr.bf16.mxu0 %v2985_v7  ;;  %v3069_v6 = vld [vmem:[%s3300_s28 + $0x684] ss:$8 sps:$4 sm:$0xff]   ;;  %v3064_v7 = vld [vmem:[%s3300_s28 + $0x280] ss:$8 sps:$4 sm:$0xff]  }
  0x80   : > { %1957 = vmatpush1.bf16.msra.mxu1 %v2980_v8  ;;  %v3067_v8 = vld [vmem:[%s3300_s28 + $0x680] ss:$8 sps:$4 sm:$0xff]  }
  0x81   : > { %2121 = vmatpush1.bf16.msra.mxu0 %v2983_v9  ;;  %1958 = vmatprep.subr.bf16.mxu1 %v2988_v10  ;;  %v3072_v9 = vld [vmem:[%s3300_s28 + $0x294] ss:$8 sps:$4 sm:$0xff]  }
  0x82   : > { %2122 = vmatprep.subr.bf16.mxu0 %v2991_v11  ;;  %v3075_v10 = vld [vmem:[%s3300_s28 + $0x694] ss:$8 sps:$4 sm:$0xff]   ;;  %v3070_v11 = vld [vmem:[%s3300_s28 + $0x290] ss:$8 sps:$4 sm:$0xff]  }
  0x84   : > { %1959 = vmatpush1.bf16.msra.mxu1 %v2986_v12  ;;  %v3073_v12 = vld [vmem:[%s3300_s28 + $0x690] ss:$8 sps:$4 sm:$0xff]  }
  0x85   : > { %2123 = vmatpush1.bf16.msra.mxu0 %v2989_v13  ;;  %1960 = vmatprep.subr.bf16.mxu1 %v2994_v14  ;;  %v3078_v13 = vld [vmem:[%s3300_s28 + $0x2a4] ss:$8 sps:$4 sm:$0xff]  }
  0x86   : > { %2124 = vmatprep.subr.bf16.mxu0 %v2997_v15  ;;  %v3081_v14 = vld [vmem:[%s3300_s28 + $0x6a4] ss:$8 sps:$4 sm:$0xff]   ;;  %v3076_v15 = vld [vmem:[%s3300_s28 + $0x2a0] ss:$8 sps:$4 sm:$0xff]  }
  0x88   : > { %1961 = vmatpush1.bf16.msra.mxu1 %v2992_v16  ;;  %v3079_v16 = vld [vmem:[%s3300_s28 + $0x6a0] ss:$8 sps:$4 sm:$0xff]  }
  0x89   : > { %2125 = vmatpush1.bf16.msra.mxu0 %v2995_v17  ;;  %1962 = vmatprep.subr.bf16.mxu1 %v3000_v18  ;;  %v3084_v17 = vld [vmem:[%s3300_s28 + $0x2b4] ss:$8 sps:$4 sm:$0xff]  }
  0x8a   : > { %2126 = vmatprep.subr.bf16.mxu0 %v3003_v19  ;;  %v3087_v18 = vld [vmem:[%s3300_s28 + $0x6b4] ss:$8 sps:$4 sm:$0xff]   ;;  %v3082_v19 = vld [vmem:[%s3300_s28 + $0x2b0] ss:$8 sps:$4 sm:$0xff]  }
  0x8c   : > { %1963 = vmatpush1.bf16.msra.mxu1 %v2998_v20  ;;  %v3085_v20 = vld [vmem:[%s3300_s28 + $0x6b0] ss:$8 sps:$4 sm:$0xff]  }
  0x8d   : > { %2127 = vmatpush1.bf16.msra.mxu0 %v3001_v23  ;;  %1964 = vmatprep.subr.bf16.mxu1 %v3006_v24  ;;  %v3090_v23 = vld [vmem:[%s3300_s28 + $0x2c4] ss:$8 sps:$4 sm:$0xff]  }
  0x8e   : > { %2128 = vmatprep.subr.bf16.mxu0 %v3009_v25  ;;  %v3093_v24 = vld [vmem:[%s3300_s28 + $0x6c4] ss:$8 sps:$4 sm:$0xff]   ;;  %v3088_v25 = vld [vmem:[%s3300_s28 + $0x2c0] ss:$8 sps:$4 sm:$0xff]  }
  0x90   : > { %1965 = vmatpush1.bf16.msra.mxu1 %v3004_v26  ;;  %v3091_v26 = vld [vmem:[%s3300_s28 + $0x6c0] ss:$8 sps:$4 sm:$0xff]  }
  0x91   : > { %2129 = vmatpush1.bf16.msra.mxu0 %v3007_v27  ;;  %1966 = vmatprep.subr.bf16.mxu1 %v3012_v28  ;;  %v3096_v27 = vld [vmem:[%s3300_s28 + $0x2d4] ss:$8 sps:$4 sm:$0xff]  }
  0x92   : > { %2130 = vmatprep.subr.bf16.mxu0 %v3015_v32  ;;  %v3099_v28 = vld [vmem:[%s3300_s28 + $0x6d4] ss:$8 sps:$4 sm:$0xff]   ;;  %v3094_v32 = vld [vmem:[%s3300_s28 + $0x2d0] ss:$8 sps:$4 sm:$0xff]  }
  0x94   : > { %1967 = vmatpush1.bf16.msra.mxu1 %v3010_v33  ;;  %v3097_v33 = vld [vmem:[%s3300_s28 + $0x6d0] ss:$8 sps:$4 sm:$0xff]  }
  0x95   : > { %2131 = vmatpush1.bf16.msra.mxu0 %v3013_v35  ;;  %1977 = vmatprep.subr.bf16.mxu1 %v3018_v36  ;;  %v3102_v35 = vld [vmem:[%s3300_s28 + $0x2e4] ss:$8 sps:$4 sm:$0xff]  }
  0x96   : > { %2141 = vmatprep.subr.bf16.mxu0 %v3021_v37  ;;  %v3105_v36 = vld [vmem:[%s3300_s28 + $0x6e4] ss:$8 sps:$4 sm:$0xff]   ;;  %v3100_v37 = vld [vmem:[%s3300_s28 + $0x2e0] ss:$8 sps:$4 sm:$0xff]  }
  0x97   : > { %1969 = vmatmul.mubr.bf16.vlgmr.msra.gmra.mrb[0].mxu1 %v546_v38  ;;  %v3103_v38 = vld [vmem:[%s3300_s28 + $0x6e0] ss:$8 sps:$4 sm:$0xff]  }
  0x98   : > { %2133 = vmatmul.mubr.bf16.vlgmr.msra.gmra.mrb[0].mxu0 %v595_v39  ;;  %1978 = vmatpush1.bf16.msra.mxu1 %v3016_v40  ;;  %v3108_v39 = vld [vmem:[%s3300_s28 + $0x2f4] ss:$8 sps:$4 sm:$0xff]  }
  0x99   : > { %2142 = vmatpush1.bf16.msra.mxu0 %v3019_v41  ;;  %1979 = vmatprep.subr.bf16.mxu1 %v3024_v42  ;;  %v3111_v40 = vld [vmem:[%s3300_s28 + $0x6f4] ss:$8 sps:$4 sm:$0xff]   ;;  %v3106_v41 = vld [vmem:[%s3300_s28 + $0x2f0] ss:$8 sps:$4 sm:$0xff]  }
  0x9a   : > { %2143 = vmatprep.subr.bf16.mxu0 %v3027_v43  ;;  %2009 = vmatprep.mubr.bf16.mxu1 %v3396_v29  ;;  %v3109_v42 = vld [vmem:[%s3300_s28 + $0x6f0] ss:$8 sps:$4 sm:$0xff]   ;;  %v3114_v43 = vld [vmem:[%s3300_s28 + $0x304] ss:$8 sps:$4 sm:$0xff]  }
  0x9b   : > { %2173 = vmatprep.mubr.bf16.mxu0 %v3399_v30 }
  0x9c   : > { %1980 = vmatpush1.bf16.msra.mxu1 %v3022_v21  ;;  %v3117_v21 = vld [vmem:[%s3300_s28 + $0x704] ss:$8 sps:$4 sm:$0xff]  }
  0x9d   : > { %2144 = vmatpush1.bf16.msra.mxu0 %v3025_v22  ;;  %1981 = vmatprep.subr.bf16.mxu1 %v3030_v45  ;;  %v3112_v22 = vld [vmem:[%s3300_s28 + $0x300] ss:$8 sps:$4 sm:$0xff]  }
  0x9e   : > { %2145 = vmatprep.subr.bf16.mxu0 %v3033_v46  ;;  %v3115_v45 = vld [vmem:[%s3300_s28 + $0x700] ss:$8 sps:$4 sm:$0xff]   ;;  %v3120_v46 = vld [vmem:[%s3300_s28 + $0x314] ss:$8 sps:$4 sm:$0xff]  }
  0xa0   : > { %1982 = vmatpush1.bf16.msra.mxu1 %v3028_v47  ;;  %v3123_v47 = vld [vmem:[%s3300_s28 + $0x714] ss:$8 sps:$4 sm:$0xff]  }
  0xa1   : > { %2146 = vmatpush1.bf16.msra.mxu0 %v3031_v48  ;;  %1983 = vmatprep.subr.bf16.mxu1 %v3036_v49  ;;  %v549_v48 = vcombine.high %v3396_v29, %v3396_v29  ;;  %v598_v49 = vcombine.high %v3399_v30, %v3399_v30  ;;  %v3126_v29 = vld [vmem:[%s3300_s28 + $0x324] ss:$8 sps:$4 sm:$0xff]   ;;  %v3124_v30 = vld [vmem:[%s3300_s28 + $0x320] ss:$8 sps:$4 sm:$0xff]  }
  0xa2   : > { %2147 = vmatprep.subr.bf16.mxu0 %v3039_v50  ;;  %v3118_v50 = vld [vmem:[%s3300_s28 + $0x310] ss:$8 sps:$4 sm:$0xff]  }
  0xa4   : > { %1984 = vmatpush1.bf16.msra.mxu1 %v3034_v51  ;;  %v3121_v51 = vld [vmem:[%s3300_s28 + $0x710] ss:$8 sps:$4 sm:$0xff]  }
  0xa5   : > { %2148 = vmatpush1.bf16.msra.mxu0 %v3037_v52  ;;  %1985 = vmatprep.subr.bf16.mxu1 %v3042_v53  ;;  %v3129_v52 = vld [vmem:[%s3300_s28 + $0x724] ss:$8 sps:$4 sm:$0xff]   ;;  %v3127_v53 = vld [vmem:[%s3300_s28 + $0x720] ss:$8 sps:$4 sm:$0xff]  }
  0xa6   : > { %2149 = vmatprep.subr.bf16.mxu0 %v3045_v54  ;;  %v3132_v54 = vld [vmem:[%s3300_s28 + $0x334] ss:$8 sps:$4 sm:$0xff]  }
  0xa8   : > { %1986 = vmatpush1.bf16.msra.mxu1 %v3040_v55  ;;  %v3135_v55 = vld [vmem:[%s3300_s28 + $0x734] ss:$8 sps:$4 sm:$0xff]  }
  0xa9   : > { %2150 = vmatpush1.bf16.msra.mxu0 %v3043_v56  ;;  %1987 = vmatprep.subr.bf16.mxu1 %v3048_v57  ;;  %v3130_v56 = vld [vmem:[%s3300_s28 + $0x330] ss:$8 sps:$4 sm:$0xff]  }
  0xaa   : > { %2151 = vmatprep.subr.bf16.mxu0 %v3051_v58  ;;  %v3133_v57 = vld [vmem:[%s3300_s28 + $0x730] ss:$8 sps:$4 sm:$0xff]   ;;  %v3138_v58 = vld [vmem:[%s3300_s28 + $0x344] ss:$8 sps:$4 sm:$0xff]  }
  0xac   : > { %1988 = vmatpush1.bf16.msra.mxu1 %v3046_v59  ;;  %v3141_v59 = vld [vmem:[%s3300_s28 + $0x744] ss:$8 sps:$4 sm:$0xff]  }
  0xad   : > { %2152 = vmatpush1.bf16.msra.mxu0 %v3049_v60  ;;  %1989 = vmatprep.subr.bf16.mxu1 %v3054_v61  ;;  %v3136_v60 = vld [vmem:[%s3300_s28 + $0x340] ss:$8 sps:$4 sm:$0xff]  }
  0xae   : > { %2153 = vmatprep.subr.bf16.mxu0 %v3057_v62  ;;  %v3139_v61 = vld [vmem:[%s3300_s28 + $0x740] ss:$8 sps:$4 sm:$0xff]   ;;  %v3144_v62 = vld [vmem:[%s3300_s28 + $0x354] ss:$8 sps:$4 sm:$0xff]  }
  0xb0   : > { %1990 = vmatpush1.bf16.msra.mxu1 %v3052_v63  ;;  %v3147_v63 = vld [vmem:[%s3300_s28 + $0x754] ss:$8 sps:$4 sm:$0xff]  }
  0xb1   : > { %2154 = vmatpush1.bf16.msra.mxu0 %v3055_v0  ;;  %1991 = vmatprep.subr.bf16.mxu1 %v3060_v1  ;;  %v3142_v0 = vld [vmem:[%s3300_s28 + $0x350] ss:$8 sps:$4 sm:$0xff]  }
  0xb2   : > { %2155 = vmatprep.subr.bf16.mxu0 %v3063_v2  ;;  %v3145_v1 = vld [vmem:[%s3300_s28 + $0x750] ss:$8 sps:$4 sm:$0xff]   ;;  %v3150_v2 = vld [vmem:[%s3300_s28 + $0x364] ss:$8 sps:$4 sm:$0xff]  }
  0xb4   : > { %1992 = vmatpush1.bf16.msra.mxu1 %v3058_v3  ;;  %v3153_v3 = vld [vmem:[%s3300_s28 + $0x764] ss:$8 sps:$4 sm:$0xff]  }
  0xb5   : > { %2156 = vmatpush1.bf16.msra.mxu0 %v3061_v4  ;;  %1993 = vmatprep.subr.bf16.mxu1 %v3066_v5  ;;  %v3148_v4 = vld [vmem:[%s3300_s28 + $0x360] ss:$8 sps:$4 sm:$0xff]  }
  0xb6   : > { %2157 = vmatprep.subr.bf16.mxu0 %v3069_v6  ;;  %v3151_v5 = vld [vmem:[%s3300_s28 + $0x760] ss:$8 sps:$4 sm:$0xff]   ;;  %v3156_v6 = vld [vmem:[%s3300_s28 + $0x374] ss:$8 sps:$4 sm:$0xff]  }
  0xb8   : > { %1994 = vmatpush1.bf16.msra.mxu1 %v3064_v7  ;;  %v3159_v7 = vld [vmem:[%s3300_s28 + $0x774] ss:$8 sps:$4 sm:$0xff]  }
  0xb9   : > { %2158 = vmatpush1.bf16.msra.mxu0 %v3067_v8  ;;  %1995 = vmatprep.subr.bf16.mxu1 %v3072_v9  ;;  %v3154_v8 = vld [vmem:[%s3300_s28 + $0x370] ss:$8 sps:$4 sm:$0xff]  }
  0xba   : > { %2159 = vmatprep.subr.bf16.mxu0 %v3075_v10  ;;  %v3157_v9 = vld [vmem:[%s3300_s28 + $0x770] ss:$8 sps:$4 sm:$0xff]   ;;  %v3162_v10 = vld [vmem:[%s3300_s28 + $0x384] ss:$8 sps:$4 sm:$0xff]  }
  0xbc   : > { %1996 = vmatpush1.bf16.msra.mxu1 %v3070_v11  ;;  %v3165_v11 = vld [vmem:[%s3300_s28 + $0x784] ss:$8 sps:$4 sm:$0xff]  }
  0xbd   : > { %2160 = vmatpush1.bf16.msra.mxu0 %v3073_v12  ;;  %1997 = vmatprep.subr.bf16.mxu1 %v3078_v13  ;;  %v3160_v12 = vld [vmem:[%s3300_s28 + $0x380] ss:$8 sps:$4 sm:$0xff]  }
  0xbe   : > { %2161 = vmatprep.subr.bf16.mxu0 %v3081_v14  ;;  %v3163_v13 = vld [vmem:[%s3300_s28 + $0x780] ss:$8 sps:$4 sm:$0xff]   ;;  %v3168_v14 = vld [vmem:[%s3300_s28 + $0x394] ss:$8 sps:$4 sm:$0xff]  }
  0xc0   : > { %1998 = vmatpush1.bf16.msra.mxu1 %v3076_v15  ;;  %v3171_v15 = vld [vmem:[%s3300_s28 + $0x794] ss:$8 sps:$4 sm:$0xff]  }
  0xc1   : > { %2162 = vmatpush1.bf16.msra.mxu0 %v3079_v16  ;;  %1999 = vmatprep.subr.bf16.mxu1 %v3084_v17  ;;  %v3166_v16 = vld [vmem:[%s3300_s28 + $0x390] ss:$8 sps:$4 sm:$0xff]  }
  0xc2   : > { %2163 = vmatprep.subr.bf16.mxu0 %v3087_v18  ;;  %v3169_v17 = vld [vmem:[%s3300_s28 + $0x790] ss:$8 sps:$4 sm:$0xff]   ;;  %v3174_v18 = vld [vmem:[%s3300_s28 + $0x3a4] ss:$8 sps:$4 sm:$0xff]  }
  0xc4   : > { %2000 = vmatpush1.bf16.msra.mxu1 %v3082_v19  ;;  %v3177_v19 = vld [vmem:[%s3300_s28 + $0x7a4] ss:$8 sps:$4 sm:$0xff]  }
  0xc5   : > { %2164 = vmatpush1.bf16.msra.mxu0 %v3085_v20  ;;  %2001 = vmatprep.subr.bf16.mxu1 %v3090_v23  ;;  %v3172_v20 = vld [vmem:[%s3300_s28 + $0x3a0] ss:$8 sps:$4 sm:$0xff]  }
  0xc6   : > { %2165 = vmatprep.subr.bf16.mxu0 %v3093_v24  ;;  %v3175_v23 = vld [vmem:[%s3300_s28 + $0x7a0] ss:$8 sps:$4 sm:$0xff]   ;;  %v3180_v24 = vld [vmem:[%s3300_s28 + $0x3b4] ss:$8 sps:$4 sm:$0xff]  }
  0xc8   : > { %2002 = vmatpush1.bf16.msra.mxu1 %v3088_v25  ;;  %v3183_v25 = vld [vmem:[%s3300_s28 + $0x7b4] ss:$8 sps:$4 sm:$0xff]  }
  0xc9   : > { %2166 = vmatpush1.bf16.msra.mxu0 %v3091_v26  ;;  %2003 = vmatprep.subr.bf16.mxu1 %v3096_v27  ;;  %v3178_v26 = vld [vmem:[%s3300_s28 + $0x3b0] ss:$8 sps:$4 sm:$0xff]  }
  0xca   : > { %2167 = vmatprep.subr.bf16.mxu0 %v3099_v28  ;;  %v3181_v27 = vld [vmem:[%s3300_s28 + $0x7b0] ss:$8 sps:$4 sm:$0xff]   ;;  %v3186_v28 = vld [vmem:[%s3300_s28 + $0x3c4] ss:$8 sps:$4 sm:$0xff]  }
  0xcc   : > { %2004 = vmatpush1.bf16.msra.mxu1 %v3094_v32  ;;  %v3189_v32 = vld [vmem:[%s3300_s28 + $0x7c4] ss:$8 sps:$4 sm:$0xff]  }
  0xcd   : > { %2168 = vmatpush1.bf16.msra.mxu0 %v3097_v33  ;;  %2005 = vmatprep.subr.bf16.mxu1 %v3102_v35  ;;  %v3184_v33 = vld [vmem:[%s3300_s28 + $0x3c0] ss:$8 sps:$4 sm:$0xff]  }
  0xce   : > { %2169 = vmatprep.subr.bf16.mxu0 %v3105_v36  ;;  %v3187_v35 = vld [vmem:[%s3300_s28 + $0x7c0] ss:$8 sps:$4 sm:$0xff]   ;;  %v3192_v36 = vld [vmem:[%s3300_s28 + $0x3d4] ss:$8 sps:$4 sm:$0xff]  }
  0xd0   : > { %2006 = vmatpush1.bf16.msra.mxu1 %v3100_v37  ;;  %v3195_v37 = vld [vmem:[%s3300_s28 + $0x7d4] ss:$8 sps:$4 sm:$0xff]  }
  0xd1   : > { %2170 = vmatpush1.bf16.msra.mxu0 %v3103_v38  ;;  %2007 = vmatprep.subr.bf16.mxu1 %v3108_v39  ;;  %v3190_v38 = vld [vmem:[%s3300_s28 + $0x3d0] ss:$8 sps:$4 sm:$0xff]  }
  0xd2   : > { %2171 = vmatprep.subr.bf16.mxu0 %v3111_v40  ;;  %v3193_v39 = vld [vmem:[%s3300_s28 + $0x7d0] ss:$8 sps:$4 sm:$0xff]   ;;  %v3198_v40 = vld [vmem:[%s3300_s28 + $0x3e4] ss:$8 sps:$4 sm:$0xff]  }
  0xd4   : > { %2008 = vmatpush1.bf16.msra.mxu1 %v3106_v41  ;;  %v3201_v41 = vld [vmem:[%s3300_s28 + $0x7e4] ss:$8 sps:$4 sm:$0xff]  }
  0xd5   : > { %2172 = vmatpush1.bf16.msra.mxu0 %v3109_v42  ;;  %2018 = vmatprep.subr.bf16.mxu1 %v3114_v43  ;;  %v3196_v42 = vld [vmem:[%s3300_s28 + $0x3e0] ss:$8 sps:$4 sm:$0xff]  }
  0xd6   : > { %2182 = vmatprep.subr.bf16.mxu0 %v3117_v21  ;;  %v3199_v43 = vld [vmem:[%s3300_s28 + $0x7e0] ss:$8 sps:$4 sm:$0xff]   ;;  %v3204_v21 = vld [vmem:[%s3300_s28 + $0x3f4] ss:$8 sps:$4 sm:$0xff]  }
  0xd7   : > { %2010 = vmatmul.mubr.bf16.vlgmr.msra.gmra.mrb[0].mxu1 %v3402_v31 }
  0xd8   : > { %2174 = vmatmul.mubr.bf16.vlgmr.msra.gmra.mrb[0].mxu0 %v3407_v34  ;;  %2019 = vmatpush1.bf16.msra.mxu1 %v3112_v22  ;;  %v3207_v22 = vld [vmem:[%s3300_s28 + $0x7f4] ss:$8 sps:$4 sm:$0xff]  }
  0xd9   : > { %2183 = vmatpush1.bf16.msra.mxu0 %v3115_v45  ;;  %2020 = vmatprep.subr.bf16.mxu1 %v3120_v46  ;;  %v3202_v45 = vld [vmem:[%s3300_s28 + $0x3f0] ss:$8 sps:$4 sm:$0xff]  }
  0xda   : > { %2184 = vmatprep.subr.bf16.mxu0 %v3123_v47  ;;  %2050 = vmatprep.mubr.bf16.mxu1 %v549_v48  ;;  %v3205_v46 = vld [vmem:[%s3300_s28 + $0x7f0] ss:$8 sps:$4 sm:$0xff]   ;;  %v547_v47 = vcombine.high %v3402_v31, %v3402_v31  ;;  %v596_v48 = vcombine.high %v3407_v34, %v3407_v34 }
  0xdb   : > { %2214 = vmatprep.mubr.bf16.mxu0 %v598_v49  ;;  %v3248_v49 = vmov 1983009808  }
  0xdc   : > { %2021 = vmatpush1.bf16.msra.mxu1 %v3118_v50  ;;  %v2227_v50 = vunpack.c.l.s4 %v3248_v49 }
  0xdd   : > { %2185 = vmatpush1.bf16.msra.mxu0 %v3121_v51  ;;  %2022 = vmatprep.subr.bf16.mxu1 %v3126_v29 }
  0xde   : > { %2186 = vmatprep.subr.bf16.mxu0 %v3129_v52  ;;  %v2228_v51 = vunpack.c.0.s8 %v2227_v50 }
  0xe0   : > { %2023 = vmatpush1.bf16.msra.mxu1 %v3124_v30 }
  0xe1   : > { %2187 = vmatpush1.bf16.msra.mxu0 %v3127_v53  ;;  %2024 = vmatprep.subr.bf16.mxu1 %v3132_v54 }
  0xe2   : > { %2188 = vmatprep.subr.bf16.mxu0 %v3135_v55 }
  0xe4   : > { %2025 = vmatpush1.bf16.msra.mxu1 %v3130_v56  ;;  %v3614_v56 = vsub.s32 %v2228_v51, %v3342_v44 }
  0xe5   : > { %2189 = vmatpush1.bf16.msra.mxu0 %v3133_v57  ;;  %2026 = vmatprep.subr.bf16.mxu1 %v3138_v58 }
  0xe6   : > { %2190 = vmatprep.subr.bf16.mxu0 %v3141_v59 }
  0xe8   : > { %2027 = vmatpush1.bf16.msra.mxu1 %v3136_v60  ;;  %v240_v60 = vld [vmem:[#allocation2] sm:$0xf] }
  0xe9   : > { %2191 = vmatpush1.bf16.msra.mxu0 %v3139_v61  ;;  %2028 = vmatprep.subr.bf16.mxu1 %v3144_v62 }
  0xea   : > { %2192 = vmatprep.subr.bf16.mxu0 %v3147_v63  ;;  %v2278_v63 = vld [vmem:[%s3753_s3 + $0x80] sm:$0xff] (!%p2704_p6) }
  0xec   : > { %2029 = vmatpush1.bf16.msra.mxu1 %v3142_v0  ;;  %v2279_v0 = vld [vmem:[%s3753_s3 + $0x88] sm:$0xff] (!%p2704_p6) }
  0xed   : > { %2193 = vmatpush1.bf16.msra.mxu0 %v3145_v1  ;;  %2030 = vmatprep.subr.bf16.mxu1 %v3150_v2  ;;  %v2262_v1 = vld [vmem:[%s3753_s3] sm:$0xff] (!%p2704_p6)  ;;  %v2746_v2 = vpack.c.bf16 (!%p2704_p6), %v2279_v0, %v2278_v63 }
  0xee   : > { %2194 = vmatprep.subr.bf16.mxu0 %v3153_v3  ;;  %v2263_v3 = vld [vmem:[%s3753_s3 + $0x8] sm:$0xff] (!%p2704_p6) }
  0xf0   : > { %2031 = vmatpush1.bf16.msra.mxu1 %v3148_v4  ;;  %v2280_v4 = vld [vmem:[%s3753_s3 + $0x90] sm:$0xff] (!%p2704_p6) }
  0xf1   : > { %2195 = vmatpush1.bf16.msra.mxu0 %v3151_v5  ;;  %2032 = vmatprep.subr.bf16.mxu1 %v3156_v6  ;;  %v2281_v5 = vld [vmem:[%s3753_s3 + $0x98] sm:$0xff] (!%p2704_p6)  ;;  %v2748_v6 = vpack.c.bf16 (!%p2704_p6), %v2263_v3, %v2262_v1 }
  0xf2   : > { %2196 = vmatprep.subr.bf16.mxu0 %v3159_v7  ;;  %v2750_v7 = vpack.c.bf16 (!%p2704_p6), %v2281_v5, %v2280_v4 }
  0xf4   : > { %2033 = vmatpush1.bf16.msra.mxu1 %v3154_v8  ;;  %v2264_v8 = vld [vmem:[%s3753_s3 + $0x10] sm:$0xff] (!%p2704_p6) }
  0xf5   : > { %2197 = vmatpush1.bf16.msra.mxu0 %v3157_v9  ;;  %2034 = vmatprep.subr.bf16.mxu1 %v3162_v10  ;;  %v2265_v9 = vld [vmem:[%s3753_s3 + $0x18] sm:$0xff] (!%p2704_p6)  ;;  %v2282_v10 = vld [vmem:[%s3753_s3 + $0xa0] sm:$0xff] (!%p2704_p6) }
  0xf6   : > { %2198 = vmatprep.subr.bf16.mxu0 %v3165_v11  ;;  %v2283_v11 = vld [vmem:[%s3753_s3 + $0xa8] sm:$0xff] (!%p2704_p6) }
  0xf8   : > { %2035 = vmatpush1.bf16.msra.mxu1 %v3160_v12  ;;  %v2752_v12 = vpack.c.bf16 (!%p2704_p6), %v2265_v9, %v2264_v8 }
  0xf9   : > { %2199 = vmatpush1.bf16.msra.mxu0 %v3163_v13  ;;  %2036 = vmatprep.subr.bf16.mxu1 %v3168_v14  ;;  %v2754_v13 = vpack.c.bf16 (!%p2704_p6), %v2283_v11, %v2282_v10  ;;  %v2266_v14 = vld [vmem:[%s3753_s3 + $0x20] sm:$0xff] (!%p2704_p6) }
  0xfa   : > { %2200 = vmatprep.subr.bf16.mxu0 %v3171_v15  ;;  %v2267_v15 = vld [vmem:[%s3753_s3 + $0x28] sm:$0xff] (!%p2704_p6) }
  0xfc   : > { %2037 = vmatpush1.bf16.msra.mxu1 %v3166_v16  ;;  %v2284_v16 = vld [vmem:[%s3753_s3 + $0xb0] sm:$0xff] (!%p2704_p6) }
  0xfd   : > { %2201 = vmatpush1.bf16.msra.mxu0 %v3169_v17  ;;  %2038 = vmatprep.subr.bf16.mxu1 %v3174_v18  ;;  %v2285_v17 = vld [vmem:[%s3753_s3 + $0xb8] sm:$0xff] (!%p2704_p6)  ;;  %v2756_v18 = vpack.c.bf16 (!%p2704_p6), %v2267_v15, %v2266_v14 }
  0xfe   : > { %2202 = vmatprep.subr.bf16.mxu0 %v3177_v19  ;;  %v2245_v19 = vsub.s32 (!%p2704_p6), 0, %v3342_v44 }
 0x100   : > { %2039 = vmatpush1.bf16.msra.mxu1 %v3172_v20  ;;  %v2249_v20 = vsub.s32 (!%p2704_p6), 1, %v3342_v44  ;;  %v2241_v44 = vld [vmem:[%s3752_s2] sm:$0x3] (!%p2704_p6) }
 0x101   : > { %2203 = vmatpush1.bf16.msra.mxu0 %v3175_v23  ;;  %2040 = vmatprep.subr.bf16.mxu1 %v3180_v24  ;;  %v2758_v23 = vpack.c.bf16 (!%p2704_p6), %v2285_v17, %v2284_v16  ;;  %v2268_v24 = vld [vmem:[%s3753_s3 + $0x30] sm:$0xff] (!%p2704_p6) }
 0x102   : > { %2204 = vmatprep.subr.bf16.mxu0 %v3183_v25  ;;  %v2269_v25 = vld [vmem:[%s3753_s3 + $0x38] sm:$0xff] (!%p2704_p6) }
 0x104   : > { %2041 = vmatpush1.bf16.msra.mxu1 %v3178_v26  ;;  %v2286_v26 = vld [vmem:[%s3753_s3 + $0xc0] sm:$0xff] (!%p2704_p6) }
 0x105   : > { %2205 = vmatpush1.bf16.msra.mxu0 %v3181_v27  ;;  %2042 = vmatprep.subr.bf16.mxu1 %v3186_v28  ;;  %v2287_v27 = vld [vmem:[%s3753_s3 + $0xc8] sm:$0xff] (!%p2704_p6)  ;;  %v2760_v28 = vpack.c.bf16 (!%p2704_p6), %v2269_v25, %v2268_v24 }
 0x106   : > { %2206 = vmatprep.subr.bf16.mxu0 %v3189_v32  ;;  %v2246_v32 = vrot.slane (!%p2704_p6), %v2241_v44, %v2245_v19 }
 0x108   : > { %2043 = vmatpush1.bf16.msra.mxu1 %v3184_v33  ;;  %v2250_v33 = vrot.slane (!%p2704_p6), %v2241_v44, %v2249_v20 }
 0x109   : > { %2207 = vmatpush1.bf16.msra.mxu0 %v3187_v35  ;;  %2044 = vmatprep.subr.bf16.mxu1 %v3192_v36  ;;  %v2762_v35 = vpack.c.bf16 (!%p2704_p6), %v2287_v27, %v2286_v26  ;;  %v2270_v36 = vld [vmem:[%s3753_s3 + $0x40] sm:$0xff] (!%p2704_p6) }
 0x10a   : > { %2208 = vmatprep.subr.bf16.mxu0 %v3195_v37  ;;  %v2271_v37 = vld [vmem:[%s3753_s3 + $0x48] sm:$0xff] (!%p2704_p6) }
 0x10c   : > { %2045 = vmatpush1.bf16.msra.mxu1 %v3190_v38  ;;  %v2288_v38 = vld [vmem:[%s3753_s3 + $0xd0] sm:$0xff] (!%p2704_p6) }
 0x10d   : > { %2209 = vmatpush1.bf16.msra.mxu0 %v3193_v39  ;;  %2046 = vmatprep.subr.bf16.mxu1 %v3198_v40  ;;  %v2289_v39 = vld [vmem:[%s3753_s3 + $0xd8] sm:$0xff] (!%p2704_p6)  ;;  %v2251_v40 = vcombine.low (!%p2704_p6), %v2246_v32, %v2250_v33 }
 0x10e   : > { %2210 = vmatprep.subr.bf16.mxu0 %v3201_v41 }
 0x110   : > { %2047 = vmatpush1.bf16.msra.mxu1 %v3196_v42  ;;  %v2764_v42 = vpack.c.bf16 (!%p2704_p6), %v2271_v37, %v2270_v36 }
 0x111   : > { %2211 = vmatpush1.bf16.msra.mxu0 %v3199_v43  ;;  %2048 = vmatprep.subr.bf16.mxu1 %v3204_v21  ;;  %v2258_v43 = vrot.slane (!%p2704_p6), %v2251_v40, %v3614_v56  ;;  %v2766_v21 = vpack.c.bf16 (!%p2704_p6), %v2289_v39, %v2288_v38 }
 0x112   : > { %2212 = vmatprep.subr.bf16.mxu0 %v3207_v22  ;;  %v2272_v22 = vld [vmem:[%s3753_s3 + $0x50] sm:$0xff] (!%p2704_p6) }
 0x114   : > { %2049 = vmatpush1.bf16.msra.mxu1 %v3202_v45  ;;  %v2273_v45 = vld [vmem:[%s3753_s3 + $0x58] sm:$0xff] (!%p2704_p6) }
 0x115   : > { %2213 = vmatpush1.bf16.msra.mxu0 %v3205_v46  ;;  %v2290_v46 = vld [vmem:[%s3753_s3 + $0xe0] sm:$0xff] (!%p2704_p6)  ;;  %v2768_v49 = vpack.c.bf16 (!%p2704_p6), %v2273_v45, %v2272_v22 }
 0x116   : > { %2747 = vmatprep.subr.bf16.mxu0 (!%p2704_p6), %v2746_v2 }
 0x117   : > { %2051 = vmatmul.mubr.bf16.vlgmr.msra.gmra.mrb[0].mxu1 %v547_v47  ;;  %v2291_v47 = vld [vmem:[%s3753_s3 + $0xe8] sm:$0xff] (!%p2704_p6) }
 0x118   : > { %2215 = vmatmul.mubr.bf16.vlgmr.msra.gmra.mrb[0].mxu0 %v596_v48  ;;  %v2770_v51 = vpack.c.bf16 (!%p2704_p6), %v2291_v47, %v2290_v46 }
 0x119   : > { %2749 = vmatpush3.bf16.msra.mxu0 (!%p2704_p6), %v2748_v6 }
 0x11a   : > { %2751 = vmatprep.subr.bf16.mxu0 (!%p2704_p6), %v2750_v7 }
 0x11d   : > { %2753 = vmatpush3.bf16.msra.mxu0 (!%p2704_p6), %v2752_v12 }
 0x11e   : > { %2755 = vmatprep.subr.bf16.mxu0 (!%p2704_p6), %v2754_v13 }
 0x121   : > { %2757 = vmatpush3.bf16.msra.mxu0 (!%p2704_p6), %v2756_v18 }
 0x122   : > { %2759 = vmatprep.subr.bf16.mxu0 (!%p2704_p6), %v2758_v23 }
 0x125   : > { %2761 = vmatpush3.bf16.msra.mxu0 (!%p2704_p6), %v2760_v28 }
 0x126   : > { %2763 = vmatprep.subr.bf16.mxu0 (!%p2704_p6), %v2762_v35 }
 0x129   : > { %2765 = vmatpush3.bf16.msra.mxu0 (!%p2704_p6), %v2764_v42 }
 0x12a   : > { %2767 = vmatprep.subr.bf16.mxu0 (!%p2704_p6), %v2766_v21 }
 0x12d   : > { %2769 = vmatpush3.bf16.msra.mxu0 (!%p2704_p6), %v2768_v49 }
 0x12e   : > { %2771 = vmatprep.subr.bf16.mxu0 (!%p2704_p6), %v2770_v51 }
 0x1ea   : > { %v2052_v29 = vpop.f32.mrb[0].mxu1 }
 0x1eb   : > { %v2216_v52 = vpop.f32.mrb[0].mxu0  ;;  %v2054_v53 = vpop.f32.mrb[1].mxu1 }
 0x1ec   : > { %v2778_v30 = vadd.f32 %v2216_v52, %v2052_v29  ;;  %v2218_v54 = vpop.f32.mrb[1].mxu0  ;;  %v2056_v31 = vpop.f32.mrb[2].mxu1  ;;  %v2274_v29 = vld [vmem:[%s3753_s3 + $0x60] sm:$0xff] (!%p2704_p6)  ;;  %v2275_v52 = vld [vmem:[%s3753_s3 + $0x68] sm:$0xff] (!%p2704_p6) }
 0x1ed   : > { %v2779_v55 = vadd.f32 %v2218_v54, %v2054_v53  ;;  %v2220_v57 = vpop.f32.mrb[2].mxu0  ;;  %v2057_v58 = vpop.f32.mrb[3].mxu1  ;;  %v2293_v53 = vld [vmem:[%s3753_s3 + $0xf8] sm:$0xff] (!%p2704_p6) }
 0x1ee   : > { %v2221_v34 = vpop.f32.mrb[3].mxu0  ;;  %v2276_v58 = vld [vmem:[%s3753_s3 + $0x70] sm:$0xff] (!%p2704_p6) }
 0x1ef   : > { %v2225_v59 = vcombine.low %v2778_v30, %v2779_v55  ;;  %2239 = sbr.rel (%p2704_p6) target bundleno = 736 (0x2e0), region = 48  ;;  %v2292_v30 = vld [vmem:[%s3753_s3 + $0xf0] sm:$0xff] (!%p2704_p6)  ;;  %v2772_v55 = vpack.c.bf16 (!%p2704_p6), %v2275_v52, %v2274_v29  ;;  %v2277_v34 = vld [vmem:[%s3753_s3 + $0x78] sm:$0xff] (!%p2704_p6) }
 0x1f0   : > { %v2774_v57 = vpack.c.bf16 (!%p2704_p6), %v2293_v53, %v2292_v30 }
 0x1f1   : > { %v2232_v61 = vrot.slane %v2225_v59, %v3614_v56  ;;  %2773 = vmatpush3.bf16.msra.mxu0 (!%p2704_p6), %v2772_v55  ;;  %v2776_v59 = vpack.c.bf16 (!%p2704_p6), %v2277_v34, %v2276_v58 }
 0x1f2   : > { %2775 = vmatprep.subr.bf16.mxu0 (!%p2704_p6), %v2774_v57 }
 0x1f3   : > { %v2234_v62 = vadd.f32 %v2232_v61, %v240_v60  ;;  %v2705_v60 = vld [vmem:[%s3754_s4] ss:$0 sm:$0xff] (!%p2704_p6) }
 0x1f5   : > { %2235 = vst [vmem:[#allocation2] sm:$0xf] %v2234_v62  ;;  %2777 = vmatpush3.bf16.msra.mxu0 (!%p2704_p6), %v2776_v59 }
 0x1fc   : > { %v2240_v41 = vld [vmem:[#allocation2] sm:$0xf] }
 0x1fd   : > { %v2260_v48 = vadd.f32 %v2258_v43, %v2240_v41 }
 0x1ff   : > { %v2261_v50 = vmax.f32 %v2260_v48, 0.0 }
 0x201   : > { %v2308_v54 = vrot.slane %v2261_v50, %v3614_v56 }
 0x203   : > { %v2309_v31 = vcombine.high %v2308_v54, %v2308_v54 }
 0x205   : > { %2376 = vmatprep.mubr.f32.mxu0 %v2309_v31 }
 0x206   : > { %2377 = vmatmul.mubr.f32.vlgmr.msra.gmra.mrb[0].mxu0 %v2308_v54 }
 0x2d9   : > { %v2743_v56 = vpop.f32.mrb[0].mxu0 }
 0x2da   : > { %v2744_v61 = vpop.f32.mrb[1].mxu0 }
 0x2db   : > { %v2745_v62 = vadd.f32 %v2744_v61, %v2743_v56 }
 0x2dd   : > { %v2379_v63 = vadd.f32 %v2745_v62, %v2705_v60 }
 0x2df   : > { %2383 = vst.msk [vmem:[#allocation3] sm:$0x3] %vm2382_vm0, %v2379_v63 }
 0x2e0 PF: > { %p2808_p7 = scmp.eq.s32.totalorder %s3286_s19, 3  ;;  %s3249_s28 = smov [#allocation3]  }
 0x2e1   : > { %s2391_s29 = sshll.u32 %s3249_s28, 4  ;;  %s2392_s29 = int_to_ptr.vmem [resolvable:$true] %s2391_s29 }
 0x2e2   : > { %s3208_s30 = scalar_lea.vmem %s2392_s29, 32  ;;  %p3215_p11 = scmp.lt.s32.totalorder %s2392_s29, %s2392_s29 }
 0x2e3   : > { %p3209_p8 = scmp.ne.s32.totalorder %s2392_s29, %s3208_s30  ;;  %p3216_p12 = scmp.lt.s32.totalorder %s3208_s30, %s3208_s30 }
 0x2e5   : > { %p3210_p9 = pnand %p3209_p8, %p2808_p7  ;;  %p3217_p13 = por %p3216_p12, %p3215_p11 }
 0x2e7   : > { %p3211_p10 = pneg %p3210_p9 }
 0x2e9   : > { %p3218_p0 = pnand %p3217_p13, %p3211_p10 }
 0x2eb   : > { %3221 = shalt.err (!%p3218_p0)
}
 0x2ec   : > { %s3222_s8 = scalar_lea.hbm %s3755_s5, 32 }
 0x2ed   : > { %p3223_p1 = scmp.ne.s32.totalorder %s3755_s5, %s3222_s8  ;;  %p3228_p4 = scmp.lt.u32.totalorder %s3222_s8, %s3755_s5 }
 0x2ef   : > { %p3224_p2 = pnand %p3223_p1, %p2808_p7 }
 0x2f1   : > { %p3225_p3 = pneg %p3224_p2 }
 0x2f3   : > { %p3230_p5 = pnand %p3228_p4, %p3225_p3 }
 0x2f5   : > { %3233 = shalt.err (!%p3230_p5)
}
 0x2f6   : > { %2805 = dma.vmem_to_hbm [thread:$0]  (%p2808_p7), %s2392_s29, 32, %s3755_s5, [#allocation4]  }
 0x2f7   : > { %3239 = dma.done.wait (%p2808_p7), [#allocation4], 32  }
 0x2f8   : > { %3241 = vsyncadd (%p2808_p7), [#allocation4], 4294967264 }
 0x2f9 PF: > { %s16_s18 = sadd.s32 1, %s3244_s18  }
 0x2fa   : > { %p13_p6 = scmp.ge.s32.totalorder %s16_s18, 6  }
 0x2fc   :  { %15 = sbr.rel (!%p13_p6) target bundleno = 1 (0x1), region = 78 }
 0x303   :  { %2404 = vsyncpa [#allocation4], 1 }
 0x304   :  { %2406 = vsyncpa [#allocation4 + $0x1], 1 }

</bundles_post_ra>
